<compile_context>
chip_gen: v7x
topology: tpu7x:2x2x1
jax: 0.10.0
libtpu: 0.0.40
codegen_flags: <defaults>
</compile_context>

<pallas_src>
import functools

import numpy as np
import jax
import jax.numpy as jnp
from jax.experimental import pallas as pl
from jax.experimental.pallas import tpu as pltpu


IN_EPS = 1e-3          # PointCN: nn.InstanceNorm1d(..., eps=0.001, affine=True)
BN_EPS = 1e-5          # nn.BatchNorm1d default eps (track_running_stats=False)
LANE = 128             # TPU lane width: channels are padded to a multiple of this
_VMEM_LIMIT = 64 * 1024 * 1024   # explicit scoped-VMEM limit (fits v7x's 64 MiB)


# ---------------------------------------------------------------------------
# Kernels
# ---------------------------------------------------------------------------
def _stats_kernel(x_ref, stats_ref):
    """Accumulate per-(batch, channel) sum / sum-of-squares over point tiles."""
    @pl.when(pl.program_id(1) == 0)
    def _init():
        stats_ref[...] = jnp.zeros_like(stats_ref)

    x = x_ref[0].astype(jnp.float32)                          # (tile_n, C)
    tile = jnp.concatenate(
        [jnp.sum(x, axis=0, keepdims=True),
         jnp.sum(x * x, axis=0, keepdims=True)], axis=0)      # (2, C)
    stats_ref[0] += tile


def _make_stage_kernel(*, relu: bool):
    """Fused (IN+BN) normalize -> (ReLU) -> 1x1 conv on one point tile, while
    accumulating the conv output's sum/sumsq (the next stage's statistics)."""

    def kernel(h_ref, norm_ref, w_ref, out_ref, stats_ref):
        @pl.when(pl.program_id(1) == 0)
        def _init():
            stats_ref[...] = jnp.zeros_like(stats_ref)

        nrm = norm_ref[0]                                     # (3, C) f32
        mu, scale, shift = nrm[0:1], nrm[1:2], nrm[2:3]       # (1, C) each
        h = h_ref[0].astype(jnp.float32)                      # (tile_n, C)
        z = (h - mu) * scale + shift                          # fused IN+BN (one FMA)
        if relu:
            z = jnp.maximum(z, 0.0)
        out = jnp.dot(z.astype(w_ref.dtype), w_ref[...],      # MXU, f32 accumulate
                      preferred_element_type=jnp.float32)
        out_ref[0] = out.astype(out_ref.dtype)

        tile = jnp.concatenate(
            [jnp.sum(out, axis=0, keepdims=True),
             jnp.sum(out * out, axis=0, keepdims=True)], axis=0)
        stats_ref[0] += tile

    return kernel


def _make_final_kernel(*, has_shortcut: bool, attention: bool):
    """Last stage: normalize -> conv, + shortcut conv (or identity residual),
    then * sigmoid(attention).  Attention logits use a VPU lane reduction."""
    use_extras = has_shortcut or attention

    def kernel(*refs):
        refs = list(refs)
        out_ref = refs.pop()
        h_ref, norm_ref, w_ref, x_ref = refs[:4]
        idx = 4
        scw_ref = None
        ex_ref = None
        if has_shortcut:
            scw_ref = refs[idx]; idx += 1
        if use_extras:
            ex_ref = refs[idx]; idx += 1

        nrm = norm_ref[0]
        mu, scale, shift = nrm[0:1], nrm[1:2], nrm[2:3]
        h = h_ref[0].astype(jnp.float32)
        z = (h - mu) * scale + shift                          # no ReLU on block 3
        out = jnp.dot(z.astype(w_ref.dtype), w_ref[...],
                      preferred_element_type=jnp.float32)

        x = x_ref[0].astype(jnp.float32)
        if has_shortcut:
            sc = jnp.dot(x.astype(scw_ref.dtype), scw_ref[...],
                         preferred_element_type=jnp.float32)
            out = out + sc + ex_ref[0:1, :]                   # + shortcut bias
        else:
            out = out + x                                     # identity residual

        if attention:
            att_w = ex_ref[1:2, :]                            # (1, C)
            att_b = ex_ref[2:3, 0:1]                          # (1, 1)
            # C_out -> 1 "conv" = VPU multiply + lane reduction (no MXU pass).
            logits = jnp.sum(out * att_w, axis=-1, keepdims=True) + att_b
            out = out * jax.nn.sigmoid(logits)

        out_ref[0] = out.astype(out_ref.dtype)

    return kernel


# ---------------------------------------------------------------------------
# Tiny O(B*C) glue: fold IN(affine) + BN(batch stats) into (mu, scale, shift)
# ---------------------------------------------------------------------------
def _fused_norm_coeffs(stats, n_points, in_w, in_b, bn_w, bn_b):
    """stats: (B, 2, C) per-(b,c) sum and sum-of-squares over N points.
    Returns (B, 3, C): rows = mu, scale, shift with z = (x - mu)*scale + shift.
    BN statistics of the IN output are derived analytically from the IN stats:
    bn_mean == in_b (so in_b cancels), bn_var == mean_b[w_in^2*var/(var+eps)]."""
    del in_b                                                   # cancels exactly
    mean = stats[:, 0, :] / n_points                           # (B, C)
    var = jnp.maximum(stats[:, 1, :] / n_points - mean * mean, 0.0)
    inv_in = jax.lax.rsqrt(var + IN_EPS)                       # (B, C)
    bn_var = jnp.mean((in_w * in_w)[None, :] * var * (inv_in * inv_in), axis=0)
    inv_bn = jax.lax.rsqrt(bn_var + BN_EPS)                    # (C,)
    scale = inv_in * (in_w * inv_bn * bn_w)[None, :]           # (B, C)
    shift = jnp.broadcast_to(bn_b[None, :], scale.shape)       # (B, C)
    return jnp.stack([mean, scale, shift], axis=1)             # (B, 3, C)


# ---------------------------------------------------------------------------
# Wrapper
# ---------------------------------------------------------------------------
def _round_up(x, m):
    return (x + m - 1) // m * m


def _pick_tile_n(n):
    # 256-point tiles: multiple of both MXU-native M tiles (128 on v5e, 256 on
    # v6e/v7x) while keeping several grid steps in flight for pipelining.
    for t in (256, 128, 64, 32, 16, 8):
        if n % t == 0:
            return t
    # TODO(synk): mask the stats reduction to support N not divisible by 8.
    return n


def pointcn_forward(x_bnc, params, *, has_shortcut, attention,
                    dot_dtype=jnp.bfloat16):
    """PointCN forward.  x_bnc is channels-last (B, N, C_in) float32; returns
    (B, N, C_out).  Channels-last is the TPU-friendly layout; callers with
    PyTorch NCW tensors transpose once at the model boundary."""
    B, N, Cin = x_bnc.shape
    Cout = params["w1"].shape[1]
    C = _round_up(max(Cin, Cout, LANE), LANE)      # lane-dense channel width
    tile_n = _pick_tile_n(N)
    nt = N // tile_n
    f32 = jnp.float32

    # ---- zero-pad activations / parameters to the lane-dense width ---------
    # (Padded channels carry exact zeros through every stage; at the real
    #  BMNet width C=128 this padding is a no-op.)
    x = jnp.zeros((B, N, C), f32).at[:, :, :Cin].set(x_bnc.astype(f32))

    def pad_vec(v, c_real):
        return jnp.zeros((C,), f32).at[:c_real].set(v.astype(f32).reshape(-1))

    def pad_mat(w, ci, co):
        return jnp.zeros((C, C), f32).at[:ci, :co].set(w.astype(f32)).astype(dot_dtype)

    w1 = pad_mat(params["w1"], Cin, Cout)
    w2 = pad_mat(params["w2"], Cout, Cout)
    w3 = pad_mat(params["w3"], Cout, Cout)

    norm_p = []
    for i, c_real in zip((1, 2, 3), (Cin, Cout, Cout)):
        norm_p.append(tuple(pad_vec(params[f"{k}{i}"], c_real)
                            for k in ("in_w", "in_b", "bn_w", "bn_b")))

    use_extras = has_shortcut or attention
    extras = jnp.zeros((3, C), f32)
    if has_shortcut:
        sc_w = pad_mat(params["sc_w"], Cin, Cout)
        extras = extras.at[0, :Cout].set(params["sc_b"].astype(f32).reshape(-1))
    if attention:
        extras = extras.at[1, :Cout].set(params["att_w"].astype(f32).reshape(-1))
        extras = extras.at[2, :].set(params["att_b"].astype(f32).reshape(()))

    # ---- grid / BlockSpecs --------------------------------------------------
    grid = (B, nt)
    tile_spec = pl.BlockSpec((1, tile_n, C), lambda b, n: (b, n, 0))
    norm_spec = pl.BlockSpec((1, 3, C), lambda b, n: (b, 0, 0))   # per-b, resident
    stats_spec = pl.BlockSpec((1, 2, C), lambda b, n: (b, 0, 0))  # accumulator
    w_spec = pl.BlockSpec((C, C), lambda b, n: (0, 0))            # resident weight
    ex_spec = pl.BlockSpec((3, C), lambda b, n: (0, 0))

    cp_acc = pltpu.CompilerParams(
        dimension_semantics=("parallel", "arbitrary"),
        vmem_limit_bytes=_VMEM_LIMIT)
    cp_par = pltpu.CompilerParams(
        dimension_semantics=("parallel", "parallel"),
        vmem_limit_bytes=_VMEM_LIMIT)

    stats_shape = jax.ShapeDtypeStruct((B, 2, C), f32)
    act_shape = jax.ShapeDtypeStruct((B, N, C), f32)

    # ---- pass 0: per-(b,c) sum / sumsq of x ---------------------------------
    s1 = pl.pallas_call(
        _stats_kernel,
        grid=grid,
        in_specs=[tile_spec],
        out_specs=stats_spec,
        out_shape=stats_shape,
        compiler_params=cp_acc,
    )(x)

    # ---- stages 1 & 2: fused norm -> ReLU -> conv, accumulating next stats --
    stage_call = pl.pallas_call(
        _make_stage_kernel(relu=True),
        grid=grid,
        in_specs=[tile_spec, norm_spec, w_spec],
        out_specs=[tile_spec, stats_spec],
        out_shape=(act_shape, stats_shape),
        compiler_params=cp_acc,
    )
    n1 = _fused_norm_coeffs(s1, N, *norm_p[0])
    h1, s2 = stage_call(x, n1, w1)
    n2 = _fused_norm_coeffs(s2, N, *norm_p[1])
    h2, s3 = stage_call(h1, n2, w2)

    # ---- stage 3 + shortcut / residual + attention --------------------------
    n3 = _fused_norm_coeffs(s3, N, *norm_p[2])
    in_specs = [tile_spec, norm_spec, w_spec, tile_spec]
    args = [h2, n3, w3, x]
    if has_shortcut:
        in_specs.append(w_spec)
        args.append(sc_w)
    if use_extras:
        in_specs.append(ex_spec)
        args.append(extras)

    out = pl.pallas_call(
        _make_final_kernel(has_shortcut=has_shortcut, attention=attention),
        grid=grid,
        in_specs=in_specs,
        out_specs=tile_spec,
        out_shape=act_shape,
        compiler_params=cp_par,
    )(*args)

    return out[:, :, :Cout]


# ---------------------------------------------------------------------------
# Deterministic parameter init (shapes from PointCN.__init__)
# ---------------------------------------------------------------------------
def init_params(key, cin, cout):
    keys = iter(jax.random.split(key, 24))
    nk = lambda: next(keys)
    r = lambda shape, s=0.5: (s * jax.random.normal(nk(), shape)).astype(jnp.float32)

    p = {}
    for i, c in zip((1, 2, 3), (cin, cout, cout)):
        p[f"in_w{i}"] = 1.0 + r((c,), 0.1)    # InstanceNorm1d affine
        p[f"in_b{i}"] = r((c,), 0.1)
        p[f"bn_w{i}"] = 1.0 + r((c,), 0.1)    # BatchNorm1d affine
        p[f"bn_b{i}"] = r((c,), 0.1)
    # Conv1d weights stored pre-transposed to (C_in, C_out): h @ w.
    p["w1"] = r((cin, cout))
    p["w2"] = r((cout, cout))
    p["w3"] = r((cout, cout))
    p["sc_w"] = r((cin, cout))                # shot_cut Conv1d (with bias)
    p["sc_b"] = r((cout,), 0.1)
    p["att_w"] = r((cout,), 0.5)              # attention Conv1d(out, 1, 1, bias=True)
    p["att_b"] = r((), 0.1)
    return p


# ---------------------------------------------------------------------------
# Pure-JAX reference mirroring the PyTorch module (channels-last layout).
# conv_dtype applies to the encoder/shortcut convolutions only (the kernel's
# attention logits are computed on the VPU in f32, so the reference keeps the
# attention projection in f32 too).
# ---------------------------------------------------------------------------
def reference(x_bnc, params, *, has_shortcut, attention, conv_dtype=None):
    f32 = jnp.float32
    x = x_bnc.astype(f32)

    def inorm(h, w, b):          # stats over points N, per (batch, channel)
        mu = jnp.mean(h, axis=1, keepdims=True)
        var = jnp.mean((h - mu) ** 2, axis=1, keepdims=True)
        return (h - mu) * jax.lax.rsqrt(var + IN_EPS) * w + b

    def bnorm(h, w, b):          # stats over (batch, points)
        mu = jnp.mean(h, axis=(0, 1), keepdims=True)
        var = jnp.mean((h - mu) ** 2, axis=(0, 1), keepdims=True)
        return (h - mu) * jax.lax.rsqrt(var + BN_EPS) * w + b

    def conv(h, w):              # 1x1 Conv1d == channel matmul
        if conv_dtype is not None:
            h, w = h.astype(conv_dtype), w.astype(conv_dtype)
        return jnp.einsum("bnc,co->bno", h, w,
                          preferred_element_type=f32,
                          precision=jax.lax.Precision.HIGHEST).astype(f32)

    h = x
    for i, w in zip((1, 2, 3), (params["w1"], params["w2"], params["w3"])):
        h = bnorm(inorm(h, params[f"in_w{i}"], params[f"in_b{i}"]),
                  params[f"bn_w{i}"], params[f"bn_b{i}"])
        if i != 3:
            h = jnp.maximum(h, 0.0)
        h = conv(h, w)

    if has_shortcut:
        out = h + conv(x, params["sc_w"]) + params["sc_b"]
    else:
        out = h + x
    if attention:
        a = jnp.einsum("bnc,c->bn", out, params["att_w"].astype(f32))[..., None]
        a = a + params["att_b"]
        out = out * jax.nn.sigmoid(a)
    return out


# ---------------------------------------------------------------------------
if __name__ == "__main__":
    key = jax.random.PRNGKey(0)
    kx1, kp1, kx2, kp2 = jax.random.split(key, 4)

    # Config A: in != out channels (shot_cut conv) + attention, bf16 MXU dots.
    B, CIN, COUT, N = 2, 32, 64, 1024
    x1 = jax.random.normal(kx1, (B, N, CIN), jnp.float32)
    p1 = init_params(kp1, CIN, COUT)
    fwd1 = jax.jit(functools.partial(pointcn_forward, has_shortcut=True,
                                     attention=True, dot_dtype=jnp.bfloat16))
    out1 = jax.block_until_ready(fwd1(x1, p1))
    assert out1.shape == (B, N, COUT)
    ref1 = reference(x1, p1, has_shortcut=True, attention=True,
                     conv_dtype=jnp.bfloat16)
    np.testing.assert_allclose(np.asarray(out1), np.asarray(ref1),
                               rtol=1e-2, atol=1e-2)

    # Config B: in == out channels (identity residual), no attention.
    B2, C2, N2 = 2, 64, 512
    x2 = jax.random.normal(kx2, (B2, N2, C2), jnp.float32)
    p2 = init_params(kp2, C2, C2)
    fwd2 = jax.jit(functools.partial(pointcn_forward, has_shortcut=False,
                                     attention=False, dot_dtype=jnp.bfloat16))
    out2 = jax.block_until_ready(fwd2(x2, p2))
    assert out2.shape == (B2, N2, C2)
    ref2 = reference(x2, p2, has_shortcut=False, attention=False,
                     conv_dtype=jnp.bfloat16)
    np.testing.assert_allclose(np.asarray(out2), np.asarray(ref2),
                               rtol=1e-2, atol=1e-2)

    print("KERNEL_OK")
</pallas_src>

<mosaic_0001>
module attributes {stable_mosaic.version = 11 : i64} {
  func.func @_stats_kernel(%arg0: i32, %arg1: i32, %arg2: memref<1x256x128xf32, #tpu.memory_space<vmem>>, %arg3: memref<1x2x128xf32, #tpu.memory_space<vmem>>) attributes {dimension_semantics = [#tpu.dimension_semantics<parallel>, #tpu.dimension_semantics<arbitrary>], iteration_bounds = array<i64: 2, 4>, scalar_prefetch = 0 : i64, scratch_operands = 0 : i64, tpu.core_type = #tpu.core_type<tc>, window_params = [{transform_indices = @transform_0, window_bounds = array<i64: 1, 256, 128>}, {transform_indices = @transform_1, window_bounds = array<i64: 1, 2, 128>}]} {
    %c0_i32 = arith.constant 0 : i32
    %0 = arith.cmpi eq, %arg1, %c0_i32 : i32
    %1 = arith.extui %0 : i1 to i32
    %c0_i32_0 = arith.constant 0 : i32
    %2 = arith.cmpi ne, %1, %c0_i32_0 : i32
    scf.if %2 {
      %cst_10 = arith.constant 0.000000e+00 : f32
      %17 = vector.broadcast %cst_10 : f32 to vector<1x2x128xf32>
      %c0_11 = arith.constant 0 : index
      %c0_12 = arith.constant 0 : index
      %c0_13 = arith.constant 0 : index
      %18 = vector.load %arg3[%c0_11, %c0_12, %c0_13] : memref<1x2x128xf32, #tpu.memory_space<vmem>>, vector<1x2x128xf32>
      tpu.vector_store %arg3[%c0_11, %c0_12, %c0_13], %17 {strides = array<i32>} : memref<1x2x128xf32, #tpu.memory_space<vmem>>, vector<1x2x128xf32>,
    } else {
    }
    %c0 = arith.constant 0 : index
    %c0_1 = arith.constant 0 : index
    %c0_2 = arith.constant 0 : index
    %3 = vector.load %arg2[%c0, %c0_1, %c0_2] : memref<1x256x128xf32, #tpu.memory_space<vmem>>, vector<1x256x128xf32>
    %4 = vector.shape_cast %3 : vector<1x256x128xf32> to vector<256x128xf32>
    %cst = arith.constant dense<0.000000e+00> : vector<128xf32>
    %5 = vector.multi_reduction <add>, %4, %cst [0] : vector<256x128xf32> to vector<128xf32>
    %6 = vector.shape_cast %5 : vector<128xf32> to vector<1x128xf32>
    %7 = arith.mulf %4, %4 : vector<256x128xf32>
    %cst_3 = arith.constant dense<0.000000e+00> : vector<128xf32>
    %8 = vector.multi_reduction <add>, %7, %cst_3 [0] : vector<256x128xf32> to vector<128xf32>
    %9 = vector.shape_cast %8 : vector<128xf32> to vector<1x128xf32>
    %10 = tpu.concatenate %6, %9 in 0 : vector<1x128xf32>, vector<1x128xf32> -> vector<2x128xf32>
    %c0_4 = arith.constant 0 : index
    %c0_5 = arith.constant 0 : index
    %c0_6 = arith.constant 0 : index
    %11 = vector.load %arg3[%c0_4, %c0_5, %c0_6] : memref<1x2x128xf32, #tpu.memory_space<vmem>>, vector<1x2x128xf32>
    %12 = vector.shape_cast %11 : vector<1x2x128xf32> to vector<2x128xf32>
    %13 = arith.addf %12, %10 : vector<2x128xf32>
    %c0_7 = arith.constant 0 : index
    %c0_8 = arith.constant 0 : index
    %c0_9 = arith.constant 0 : index
    %14 = vector.load %arg3[%c0_7, %c0_8, %c0_9] : memref<1x2x128xf32, #tpu.memory_space<vmem>>, vector<1x2x128xf32>
    %15 = vector.shape_cast %14 : vector<1x2x128xf32> to vector<2x128xf32>
    %16 = vector.shape_cast %13 : vector<2x128xf32> to vector<1x2x128xf32>
    tpu.vector_store %arg3[%c0_7, %c0_8, %c0_9], %16 {strides = array<i32>} : memref<1x2x128xf32, #tpu.memory_space<vmem>>, vector<1x2x128xf32>,
    return
  }
  func.func @transform_0(%arg0: i32, %arg1: i32) -> (i32, i32, i32) {
    %c0_i32 = arith.constant 0 : i32
    %c0_i32_0 = arith.constant 0 : i32
    return %arg0, %arg1, %c0_i32 : i32, i32, i32
  }
  func.func @transform_1(%arg0: i32, %arg1: i32) -> (i32, i32, i32) {
    %c0_i32 = arith.constant 0 : i32
    %c0_i32_0 = arith.constant 0 : i32
    %c0_i32_1 = arith.constant 0 : i32
    return %arg0, %c0_i32, %c0_i32_0 : i32, i32, i32
  }
}

module attributes {stable_mosaic.version = 11 : i64} {
  func.func @kernel(%arg0: i32, %arg1: i32, %arg2: memref<1x256x128xf32, #tpu.memory_space<vmem>>, %arg3: memref<1x3x128xf32, #tpu.memory_space<vmem>>, %arg4: memref<128x128xbf16, #tpu.memory_space<vmem>>, %arg5: memref<1x256x128xf32, #tpu.memory_space<vmem>>, %arg6: memref<1x2x128xf32, #tpu.memory_space<vmem>>) attributes {dimension_semantics = [#tpu.dimension_semantics<parallel>, #tpu.dimension_semantics<arbitrary>], iteration_bounds = array<i64: 2, 4>, scalar_prefetch = 0 : i64, scratch_operands = 0 : i64, tpu.core_type = #tpu.core_type<tc>, window_params = [{transform_indices = @transform_0, window_bounds = array<i64: 1, 256, 128>}, {transform_indices = @transform_1, window_bounds = array<i64: 1, 3, 128>}, {pipeline_mode = #tpu.pipeline_mode<synchronous>, transform_indices = @transform_2, window_bounds = array<i64: 128, 128>}, {transform_indices = @transform_3, window_bounds = array<i64: 1, 256, 128>}, {transform_indices = @transform_4, window_bounds = array<i64: 1, 2, 128>}]} {
    %c0_i32 = arith.constant 0 : i32
    %0 = arith.cmpi eq, %arg1, %c0_i32 : i32
    %1 = arith.extui %0 : i1 to i32
    %c0_i32_0 = arith.constant 0 : i32
    %2 = arith.cmpi ne, %1, %c0_i32_0 : i32
    scf.if %2 {
      %cst_20 = arith.constant 0.000000e+00 : f32
      %36 = vector.broadcast %cst_20 : f32 to vector<1x2x128xf32>
      %c0_21 = arith.constant 0 : index
      %c0_22 = arith.constant 0 : index
      %c0_23 = arith.constant 0 : index
      %37 = vector.load %arg6[%c0_21, %c0_22, %c0_23] : memref<1x2x128xf32, #tpu.memory_space<vmem>>, vector<1x2x128xf32>
      tpu.vector_store %arg6[%c0_21, %c0_22, %c0_23], %36 {strides = array<i32>} : memref<1x2x128xf32, #tpu.memory_space<vmem>>, vector<1x2x128xf32>,
    } else {
    }
    %c0 = arith.constant 0 : index
    %c0_1 = arith.constant 0 : index
    %c0_2 = arith.constant 0 : index
    %3 = vector.load %arg3[%c0, %c0_1, %c0_2] : memref<1x3x128xf32, #tpu.memory_space<vmem>>, vector<1x3x128xf32>
    %4 = vector.shape_cast %3 : vector<1x3x128xf32> to vector<3x128xf32>
    %5 = vector.extract_strided_slice %4 {offsets = [0, 0], sizes = [1, 128], strides = [1, 1]} : vector<3x128xf32> to vector<1x128xf32>
    %6 = vector.extract_strided_slice %4 {offsets = [1, 0], sizes = [1, 128], strides = [1, 1]} : vector<3x128xf32> to vector<1x128xf32>
    %7 = vector.extract_strided_slice %4 {offsets = [2, 0], sizes = [1, 128], strides = [1, 1]} : vector<3x128xf32> to vector<1x128xf32>
    %c0_3 = arith.constant 0 : index
    %c0_4 = arith.constant 0 : index
    %c0_5 = arith.constant 0 : index
    %8 = vector.load %arg2[%c0_3, %c0_4, %c0_5] : memref<1x256x128xf32, #tpu.memory_space<vmem>>, vector<1x256x128xf32>
    %9 = vector.shape_cast %8 : vector<1x256x128xf32> to vector<256x128xf32>
    %10 = vector.broadcast %5 : vector<1x128xf32> to vector<256x128xf32>
    %11 = arith.subf %9, %10 : vector<256x128xf32>
    %12 = vector.broadcast %6 : vector<1x128xf32> to vector<256x128xf32>
    %13 = arith.mulf %11, %12 : vector<256x128xf32>
    %14 = vector.broadcast %7 : vector<1x128xf32> to vector<256x128xf32>
    %15 = arith.addf %13, %14 : vector<256x128xf32>
    %cst = arith.constant 0.000000e+00 : f32
    %16 = vector.broadcast %cst : f32 to vector<256x128xf32>
    %17 = arith.maximumf %15, %16 : vector<256x128xf32>
    %18 = arith.truncf %17 : vector<256x128xf32> to vector<256x128xbf16>
    %c0_6 = arith.constant 0 : index
    %c0_7 = arith.constant 0 : index
    %19 = vector.load %arg4[%c0_6, %c0_7] : memref<128x128xbf16, #tpu.memory_space<vmem>>, vector<128x128xbf16>
    %cst_8 = arith.constant dense<0.000000e+00> : vector<256x128xf32>
    %20 = tpu.matmul %18, %19, %cst_8 {dimension_numbers = #tpu.dot_dimension_numbers<[1], [0], [0], [1], [0, 0, 1, 1], [], []>} : vector<256x128xbf16>, vector<128x128xbf16>, vector<256x128xf32> -> vector<256x128xf32>
    %c0_9 = arith.constant 0 : index
    %c0_10 = arith.constant 0 : index
    %c0_11 = arith.constant 0 : index
    %21 = vector.load %arg5[%c0_9, %c0_10, %c0_11] : memref<1x256x128xf32, #tpu.memory_space<vmem>>, vector<1x256x128xf32>
    %22 = vector.shape_cast %21 : vector<1x256x128xf32> to vector<256x128xf32>
    %23 = vector.shape_cast %20 : vector<256x128xf32> to vector<1x256x128xf32>
    tpu.vector_store %arg5[%c0_9, %c0_10, %c0_11], %23 {strides = array<i32>} : memref<1x256x128xf32, #tpu.memory_space<vmem>>, vector<1x256x128xf32>,
    %cst_12 = arith.constant dense<0.000000e+00> : vector<128xf32>
    %24 = vector.multi_reduction <add>, %20, %cst_12 [0] : vector<256x128xf32> to vector<128xf32>
    %25 = vector.shape_cast %24 : vector<128xf32> to vector<1x128xf32>
    %26 = arith.mulf %20, %20 : vector<256x128xf32>
    %cst_13 = arith.constant dense<0.000000e+00> : vector<128xf32>
    %27 = vector.multi_reduction <add>, %26, %cst_13 [0] : vector<256x128xf32> to vector<128xf32>
    %28 = vector.shape_cast %27 : vector<128xf32> to vector<1x128xf32>
    %29 = tpu.concatenate %25, %28 in 0 : vector<1x128xf32>, vector<1x128xf32> -> vector<2x128xf32>
    %c0_14 = arith.constant 0 : index
    %c0_15 = arith.constant 0 : index
    %c0_16 = arith.constant 0 : index
    %30 = vector.load %arg6[%c0_14, %c0_15, %c0_16] : memref<1x2x128xf32, #tpu.memory_space<vmem>>, vector<1x2x128xf32>
    %31 = vector.shape_cast %30 : vector<1x2x128xf32> to vector<2x128xf32>
    %32 = arith.addf %31, %29 : vector<2x128xf32>
    %c0_17 = arith.constant 0 : index
    %c0_18 = arith.constant 0 : index
    %c0_19 = arith.constant 0 : index
    %33 = vector.load %arg6[%c0_17, %c0_18, %c0_19] : memref<1x2x128xf32, #tpu.memory_space<vmem>>, vector<1x2x128xf32>
    %34 = vector.shape_cast %33 : vector<1x2x128xf32> to vector<2x128xf32>
    %35 = vector.shape_cast %32 : vector<2x128xf32> to vector<1x2x128xf32>
    tpu.vector_store %arg6[%c0_17, %c0_18, %c0_19], %35 {strides = array<i32>} : memref<1x2x128xf32, #tpu.memory_space<vmem>>, vector<1x2x128xf32>,
    return
  }
  func.func @transform_0(%arg0: i32, %arg1: i32) -> (i32, i32, i32) {
    %c0_i32 = arith.constant 0 : i32
    %c0_i32_0 = arith.constant 0 : i32
    return %arg0, %arg1, %c0_i32 : i32, i32, i32
  }
  func.func @transform_1(%arg0: i32, %arg1: i32) -> (i32, i32, i32) {
    %c0_i32 = arith.constant 0 : i32
    %c0_i32_0 = arith.constant 0 : i32
    %c0_i32_1 = arith.constant 0 : i32
    return %arg0, %c0_i32, %c0_i32_0 : i32, i32, i32
  }
  func.func @transform_2(%arg0: i32, %arg1: i32) -> (i32, i32) {
    %c0_i32 = arith.constant 0 : i32
    %c0_i32_0 = arith.constant 0 : i32
    %c0_i32_1 = arith.constant 0 : i32
    return %c0_i32, %c0_i32_0 : i32, i32
  }
  func.func @transform_3(%arg0: i32, %arg1: i32) -> (i32, i32, i32) {
    %c0_i32 = arith.constant 0 : i32
    %c0_i32_0 = arith.constant 0 : i32
    return %arg0, %arg1, %c0_i32 : i32, i32, i32
  }
  func.func @transform_4(%arg0: i32, %arg1: i32) -> (i32, i32, i32) {
    %c0_i32 = arith.constant 0 : i32
    %c0_i32_0 = arith.constant 0 : i32
    %c0_i32_1 = arith.constant 0 : i32
    return %arg0, %c0_i32, %c0_i32_0 : i32, i32, i32
  }
}

module attributes {stable_mosaic.version = 11 : i64} {
  func.func @kernel(%arg0: i32, %arg1: i32, %arg2: memref<1x256x128xf32, #tpu.memory_space<vmem>>, %arg3: memref<1x3x128xf32, #tpu.memory_space<vmem>>, %arg4: memref<128x128xbf16, #tpu.memory_space<vmem>>, %arg5: memref<1x256x128xf32, #tpu.memory_space<vmem>>, %arg6: memref<128x128xbf16, #tpu.memory_space<vmem>>, %arg7: memref<3x128xf32, #tpu.memory_space<vmem>>, %arg8: memref<1x256x128xf32, #tpu.memory_space<vmem>>) attributes {dimension_semantics = [#tpu.dimension_semantics<parallel>, #tpu.dimension_semantics<parallel>], iteration_bounds = array<i64: 2, 4>, scalar_prefetch = 0 : i64, scratch_operands = 0 : i64, tpu.core_type = #tpu.core_type<tc>, window_params = [{transform_indices = @transform_0, window_bounds = array<i64: 1, 256, 128>}, {transform_indices = @transform_1, window_bounds = array<i64: 1, 3, 128>}, {pipeline_mode = #tpu.pipeline_mode<synchronous>, transform_indices = @transform_2, window_bounds = array<i64: 128, 128>}, {transform_indices = @transform_3, window_bounds = array<i64: 1, 256, 128>}, {pipeline_mode = #tpu.pipeline_mode<synchronous>, transform_indices = @transform_4, window_bounds = array<i64: 128, 128>}, {pipeline_mode = #tpu.pipeline_mode<synchronous>, transform_indices = @transform_5, window_bounds = array<i64: 3, 128>}, {transform_indices = @transform_6, window_bounds = array<i64: 1, 256, 128>}]} {
    %c0 = arith.constant 0 : index
    %c0_0 = arith.constant 0 : index
    %c0_1 = arith.constant 0 : index
    %0 = vector.load %arg3[%c0, %c0_0, %c0_1] : memref<1x3x128xf32, #tpu.memory_space<vmem>>, vector<1x3x128xf32>
    %1 = vector.shape_cast %0 : vector<1x3x128xf32> to vector<3x128xf32>
    %2 = vector.extract_strided_slice %1 {offsets = [0, 0], sizes = [1, 128], strides = [1, 1]} : vector<3x128xf32> to vector<1x128xf32>
    %3 = vector.extract_strided_slice %1 {offsets = [1, 0], sizes = [1, 128], strides = [1, 1]} : vector<3x128xf32> to vector<1x128xf32>
    %4 = vector.extract_strided_slice %1 {offsets = [2, 0], sizes = [1, 128], strides = [1, 1]} : vector<3x128xf32> to vector<1x128xf32>
    %c0_2 = arith.constant 0 : index
    %c0_3 = arith.constant 0 : index
    %c0_4 = arith.constant 0 : index
    %5 = vector.load %arg2[%c0_2, %c0_3, %c0_4] : memref<1x256x128xf32, #tpu.memory_space<vmem>>, vector<1x256x128xf32>
    %6 = vector.shape_cast %5 : vector<1x256x128xf32> to vector<256x128xf32>
    %7 = vector.broadcast %2 : vector<1x128xf32> to vector<256x128xf32>
    %8 = arith.subf %6, %7 : vector<256x128xf32>
    %9 = vector.broadcast %3 : vector<1x128xf32> to vector<256x128xf32>
    %10 = arith.mulf %8, %9 : vector<256x128xf32>
    %11 = vector.broadcast %4 : vector<1x128xf32> to vector<256x128xf32>
    %12 = arith.addf %10, %11 : vector<256x128xf32>
    %13 = arith.truncf %12 : vector<256x128xf32> to vector<256x128xbf16>
    %c0_5 = arith.constant 0 : index
    %c0_6 = arith.constant 0 : index
    %14 = vector.load %arg4[%c0_5, %c0_6] : memref<128x128xbf16, #tpu.memory_space<vmem>>, vector<128x128xbf16>
    %cst = arith.constant dense<0.000000e+00> : vector<256x128xf32>
    %15 = tpu.matmul %13, %14, %cst {dimension_numbers = #tpu.dot_dimension_numbers<[1], [0], [0], [1], [0, 0, 1, 1], [], []>} : vector<256x128xbf16>, vector<128x128xbf16>, vector<256x128xf32> -> vector<256x128xf32>
    %c0_7 = arith.constant 0 : index
    %c0_8 = arith.constant 0 : index
    %c0_9 = arith.constant 0 : index
    %16 = vector.load %arg5[%c0_7, %c0_8, %c0_9] : memref<1x256x128xf32, #tpu.memory_space<vmem>>, vector<1x256x128xf32>
    %17 = vector.shape_cast %16 : vector<1x256x128xf32> to vector<256x128xf32>
    %18 = arith.truncf %17 : vector<256x128xf32> to vector<256x128xbf16>
    %c0_10 = arith.constant 0 : index
    %c0_11 = arith.constant 0 : index
    %19 = vector.load %arg6[%c0_10, %c0_11] : memref<128x128xbf16, #tpu.memory_space<vmem>>, vector<128x128xbf16>
    %cst_12 = arith.constant dense<0.000000e+00> : vector<256x128xf32>
    %20 = tpu.matmul %18, %19, %cst_12 {dimension_numbers = #tpu.dot_dimension_numbers<[1], [0], [0], [1], [0, 0, 1, 1], [], []>} : vector<256x128xbf16>, vector<128x128xbf16>, vector<256x128xf32> -> vector<256x128xf32>
    %21 = arith.addf %15, %20 : vector<256x128xf32>
    %c0_13 = arith.constant 0 : index
    %c0_14 = arith.constant 0 : index
    %22 = vector.load %arg7[%c0_13, %c0_14] : memref<3x128xf32, #tpu.memory_space<vmem>>, vector<1x128xf32>
    %23 = vector.broadcast %22 : vector<1x128xf32> to vector<256x128xf32>
    %24 = arith.addf %21, %23 : vector<256x128xf32>
    %c1 = arith.constant 1 : index
    %c0_15 = arith.constant 0 : index
    %25 = vector.load %arg7[%c1, %c0_15] : memref<3x128xf32, #tpu.memory_space<vmem>>, vector<1x128xf32>
    %c2 = arith.constant 2 : index
    %c0_16 = arith.constant 0 : index
    %26 = vector.load %arg7[%c2, %c0_16] : memref<3x128xf32, #tpu.memory_space<vmem>>, vector<1x1xf32>
    %27 = vector.broadcast %25 : vector<1x128xf32> to vector<256x128xf32>
    %28 = arith.mulf %24, %27 : vector<256x128xf32>
    %cst_17 = arith.constant dense<0.000000e+00> : vector<256xf32>
    %29 = vector.multi_reduction <add>, %28, %cst_17 [1] : vector<256x128xf32> to vector<256xf32>
    %30 = vector.shape_cast %29 : vector<256xf32> to vector<256x1xf32>
    %31 = vector.broadcast %26 : vector<1x1xf32> to vector<256x1xf32>
    %32 = arith.addf %30, %31 : vector<256x1xf32>
    %33 = arith.negf %32 : vector<256x1xf32>
    %34 = math.exp %33 : vector<256x1xf32>
    %cst_18 = arith.constant 1.000000e+00 : f32
    %35 = vector.broadcast %cst_18 : f32 to vector<256x1xf32>
    %36 = arith.addf %35, %34 : vector<256x1xf32>
    %37 = arith.divf %35, %36 : vector<256x1xf32>
    %38 = vector.broadcast %37 : vector<256x1xf32> to vector<256x128xf32>
    %39 = arith.mulf %24, %38 : vector<256x128xf32>
    %c0_19 = arith.constant 0 : index
    %c0_20 = arith.constant 0 : index
    %c0_21 = arith.constant 0 : index
    %40 = vector.load %arg8[%c0_19, %c0_20, %c0_21] : memref<1x256x128xf32, #tpu.memory_space<vmem>>, vector<1x256x128xf32>
    %41 = vector.shape_cast %40 : vector<1x256x128xf32> to vector<256x128xf32>
    %42 = vector.shape_cast %39 : vector<256x128xf32> to vector<1x256x128xf32>
    tpu.vector_store %arg8[%c0_19, %c0_20, %c0_21], %42 {strides = array<i32>} : memref<1x256x128xf32, #tpu.memory_space<vmem>>, vector<1x256x128xf32>,
    return
  }
  func.func @transform_0(%arg0: i32, %arg1: i32) -> (i32, i32, i32) {
    %c0_i32 = arith.constant 0 : i32
    %c0_i32_0 = arith.constant 0 : i32
    return %arg0, %arg1, %c0_i32 : i32, i32, i32
  }
  func.func @transform_1(%arg0: i32, %arg1: i32) -> (i32, i32, i32) {
    %c0_i32 = arith.constant 0 : i32
    %c0_i32_0 = arith.constant 0 : i32
    %c0_i32_1 = arith.constant 0 : i32
    return %arg0, %c0_i32, %c0_i32_0 : i32, i32, i32
  }
  func.func @transform_2(%arg0: i32, %arg1: i32) -> (i32, i32) {
    %c0_i32 = arith.constant 0 : i32
    %c0_i32_0 = arith.constant 0 : i32
    %c0_i32_1 = arith.constant 0 : i32
    return %c0_i32, %c0_i32_0 : i32, i32
  }
  func.func @transform_3(%arg0: i32, %arg1: i32) -> (i32, i32, i32) {
    %c0_i32 = arith.constant 0 : i32
    %c0_i32_0 = arith.constant 0 : i32
    return %arg0, %arg1, %c0_i32 : i32, i32, i32
  }
  func.func @transform_4(%arg0: i32, %arg1: i32) -> (i32, i32) {
    %c0_i32 = arith.constant 0 : i32
    %c0_i32_0 = arith.constant 0 : i32
    %c0_i32_1 = arith.constant 0 : i32
    return %c0_i32, %c0_i32_0 : i32, i32
  }
  func.func @transform_5(%arg0: i32, %arg1: i32) -> (i32, i32) {
    %c0_i32 = arith.constant 0 : i32
    %c0_i32_0 = arith.constant 0 : i32
    %c0_i32_1 = arith.constant 0 : i32
    return %c0_i32, %c0_i32_0 : i32, i32
  }
  func.func @transform_6(%arg0: i32, %arg1: i32) -> (i32, i32, i32) {
    %c0_i32 = arith.constant 0 : i32
    %c0_i32_0 = arith.constant 0 : i32
    return %arg0, %arg1, %c0_i32 : i32, i32, i32
  }
}

</mosaic_0001>

<bundles_post_ra>
// kernel: pointcn_forward.4
= control target key start
LH: loop header
LB: loop body
LE: loop exit
PB: predicated region body
PF: predicated region fallthrough
CT: control target
= control target key end

     0   :  { %6 = vsyncpa [#allocation3], 0  ;;  %s950_s0 = inlined_call_operand.hbm [shape: f32[2,1024,128], index: 0, kind: input, shape index: {}]   ;;  %s951_s1 = inlined_call_operand.hbm [shape: f32[2,2,128], index: 1, kind: output, shape index: {}]  }
   0x1   :  { %8 = vsyncpa [#allocation3 + $0x1], 0 }
   0x2   :  { %9 = vsyncpa [#allocation4], 0 }
   0x3   :  { %11 = vsyncpa [#allocation4 + $0x1], 0  ;;  %s688_s6 = smov 0   ;;  %s690_s7 = smov 0  }
   0x4   :  { %s692_s8 = smov 0   ;;  %s694_s9 = smov 0  }
   0x5   :  { %s696_s10 = smov 0   ;;  %s698_s11 = smov 0  }
   0x6   :  { %s700_s12 = smov 0   ;;  %s702_s13 = smov 0  }
   0x7   :  { %s704_s14 = smov 0   ;;  %s706_s15 = smov 0  }
   0x8   :  { %s708_s16 = smov 0  }
   0x9 LB: > { %s398_s17 = sadd.s32 4294967295, %s671_s16   ;;  %s399_s18 = sadd.s32 4294967294, %s671_s16   ;;  %s671_s16 = sphi %s708_s16, %s17_s16   ;;  %s667_s15 = sphi %s706_s15, %s972_s15   ;;  %s663_s14 = sphi %s704_s14, %s971_s14   ;;  %s659_s13 = sphi %s702_s13, %s970_s13   ;;  %s655_s12 = sphi %s700_s12, %s969_s12   ;;  %s651_s11 = sphi %s698_s11, %s968_s11   ;;  %s647_s10 = sphi %s696_s10, %s967_s10   ;;  %s643_s9 = sphi %s694_s9, %s966_s9   ;;  %s639_s8 = sphi %s692_s8, %s965_s8   ;;  %s635_s7 = sphi %s690_s7, %s964_s7   ;;  %s631_s6 = sphi %s688_s6, %s963_s6  }
   0xa   : > { %s26_s19 = sadd.s32 1, %s663_s14  ;;  %s29_s20 = sadd.s32 1, %s667_s15 }
   0xb   : > { %p27_p0 = scmp.ge.s32.totalorder %s26_s19, 4  ;;  %s38_s21 = sadd.s32 1, %s651_s11 }
   0xc   : > { %p45_p1 = scmp.ne.s32.totalorder %s651_s11, %s647_s10  ;;  %p46_p2 = scmp.eq.s32.totalorder %s671_s16, 0 }
   0xd   : > { %s974_s19 = smov (%p27_p0, %s26_s19), 0  ;;  %s976_s20 = smov (!%p27_p0, %s29_s20), %s667_s15 }
   0xe   : > { %s34_s22 = ssub.s32 %s663_s14, %s974_s19  ;;  %p754_p3 = por %p46_p2, %p45_p1 }
   0xf   : > { %p31_p4 = scmp.ge.s32.totalorder %s976_s20, 2  ;;  %p51_p5 = scmp.ne.s32.totalorder %s647_s10, %s643_s9 }
  0x10   : > { %p52_p6 = scmp.eq.s32.totalorder %s398_s17, 0  ;;  %s64_s24 = sadd.s32 1, %s639_s8 }
  0x11   : > { %s978_s20 = smov (%p31_p4, %s976_s20), 0  ;;  %p74_p8 = scmp.ne.s32.totalorder %s639_s8, %s635_s7 }
  0x12   : > { %955 = sst [smem:[#allocation8_spill]] %s978_s20  ;;  %p762_p7 = por %p52_p6, %p51_p5 }
  0x13   : > { %s33_s26 = ssub.s32 %s667_s15, %s978_s20  ;;  %p75_p9 = scmp.eq.s32.totalorder %s398_s17, 7 }
  0x14   : > { %s35_s27 = sor.u32 %s34_s22, %s33_s26  ;;  %p62_p10 = scmp.eq.s32.totalorder %s33_s26, 0 }
  0x15   : > { %p36_p11 = scmp.eq.s32.totalorder %s35_s27, 0  ;;  %p770_p12 = por %p75_p9, %p74_p8 }
  0x16   : > { %s775_s29 = scalar_select %p62_p10, %s639_s8, %s64_s24  }
  0x17   : > { %s957_s28 = scalar_select %p770_p12, 1, 0 }
  0x18   : > { %s778_s30 = scalar_select %p36_p11, %s651_s11, %s38_s21  }
  0x19   : > { %p80_p13 = scmp.ne.s32.totalorder %s635_s7, %s631_s6  ;;  %p81_p0 = scmp.eq.s32.totalorder %s399_s18, 7 }
  0x1a   : > { %p426_p1 = scmp.lt.s32.totalorder %s671_s16, 8  ;;  %s101_s3 = sand.u32 1, %s651_s11  }
  0x1b   : > { %p783_p2 = por %p81_p0, %p80_p13  ;;  %s402_s4 = sshll.u32 %s101_s3, 8 }
  0x1c   : > { %s403_s5 = sshll.u32 %s663_s14, 5  ;;  %s404_s9 = sshll.u32 %s667_s15, 7 }
  0x1d   : > { %s958_s2 = scalar_select %p783_p2, 1, 0 }
  0x1e   : > { %s105_s17 = scalar_lea.vmem [#allocation2], %s402_s4  ;;  %s111_s26 = sadd.s32 %s404_s9, %s403_s5 }
  0x1f   : > { %s114_s22 = sshll.u32 %s105_s17, 4  ;;  %s405_s24 = sshll.u32 %s111_s26, 7  ;;  %s790_s22 = int_to_ptr.vmem [resolvable:$true] %s114_s22 }
  0x20   : > { %p794_p4 = pnand %p426_p1, %p754_p3  ;;  %s801_s20 = scalar_lea.hbm %s950_s0, %s405_s24 }
  0x21   : > { %s803_s4 = scalar_lea.sflag [#allocation3], %s101_s3  ;;  %s519_s5 = scalar_lea.hbm %s801_s20, 4096 }
  0x22   : > { %p520_p5 = scmp.ne.s32.totalorder %s801_s20, %s519_s5  ;;  %p521_p3 = pneg %p794_p4 }
  0x23   : > { %s524_s17 = scalar_lea.hbm %s950_s0, 32768  ;;  %p525_p9 = scmp.lt.u32.totalorder %s801_s20, %s950_s0 }
  0x24   : > { %p522_p6 = pnand %p521_p3, %p520_p5  ;;  %p526_p10 = scmp.lt.u32.totalorder %s524_s17, %s519_s5 }
  0x25   : > { %p528_p13 = scmp.lt.u32.totalorder %s519_s5, %s801_s20 }
  0x26   : > { %p523_p8 = pneg %p522_p6  ;;  %p527_p11 = por %p526_p10, %p525_p9 }
  0x28   : > { %p529_p0 = por %p528_p13, %p527_p11 }
  0x2a   : > { %p530_p1 = pnand %p529_p0, %p523_p8 }
  0x2c   : > { %533 = shalt.err (!%p530_p1)
}
  0x2d   : > { %s534_s3 = scalar_lea.vmem %s790_s22, 4096  ;;  %s673_s18 = smov [#allocation2]  }
  0x2e   : > { %p535_p5 = scmp.ne.s32.totalorder %s790_s22, %s534_s3  ;;  %s539_s27 = sshll.u32 %s673_s18, 4  ;;  %s540_s27 = int_to_ptr.vmem [resolvable:$false] %s539_s27 }
  0x2f   : > { %s541_s23 = scalar_lea.vmem %s540_s27, 8192  ;;  %p542_p12 = scmp.lt.s32.totalorder %s790_s22, %s540_s27 }
  0x30   : > { %p537_p6 = pnand %p535_p5, %p521_p3  ;;  %p543_p9 = scmp.lt.s32.totalorder %s541_s23, %s534_s3 }
  0x32   : > { %p538_p2 = pneg %p537_p6  ;;  %p544_p10 = por %p543_p9, %p542_p12 }
  0x34   : > { %p545_p11 = pnand %p544_p10, %p538_p2 }
  0x36   : > { %548 = shalt.err (!%p545_p11)
}
  0x37   : > { %s674_s5 = smov 128   ;;  %s675_s9 = smov 8  }
  0x38   : > { %421 = dma.hbm_to_vmem [thread:$0]  (!%p794_p4), %s801_s20, 4096, %s790_s22, %s803_s4, %s674_s5, %s674_s5, %s675_s9  }
  0x39   : > { %p406_p3 = scmp.ge.s32.totalorder %s671_s16, 1  ;;  %p122_p8 = scmp.lt.s32.totalorder %s671_s16, 9 }
  0x3b   : > { %p123_p13 = pnand %p406_p3, %p122_p8 }
  0x3c   : > { %s128_s17 = sand.u32 (!%p123_p13), 1, %s647_s10  }
  0x3d   : > { %126 = sbr.rel (%p123_p13) target bundleno = 172 (0xac), region = 24  ;;  %s407_s26 = sshll.u32 (!%p123_p13), %s128_s17, 8 }
  0x3e   : > { %s129_s24 = scalar_lea.sflag (!%p123_p13), [#allocation3], %s128_s17  ;;  %s834_s3 = scalar_lea.vmem (!%p123_p13), [#allocation2], %s407_s26 }
  0x44   : > { %622 = dma.done.wait (%p762_p7), %s129_s24, 4096  }
  0x45   : > { %624 = vsyncadd (%p762_p7), %s129_s24, 4294963200  ;;  %s148_s21 = sand.u32 1, %s635_s7   ;;  %p409_p12 = scmp.ne.s32.totalorder %s655_s12, 0 }
  0x46   : > { %s408_s20 = sshll.u32 %s148_s21, 1  ;;  %v676_v0 = vmov (!%p409_p12), 0.0  }
  0x47   : > { %s843_s22 = scalar_lea.vmem [#allocation5], %s408_s20  ;;  %155 = sbr.rel (%p409_p12) target bundleno = 78 (0x4e), region = 32 }
  0x48   : > { %156 = vst [vmem:[%s843_s22] sm:$0x3] (!%p409_p12), %v676_v0 }
  0x4e PF: > { %v157_v1 = vld [vmem:[%s834_s3] sm:$0xff]  ;;  %v158_v2 = vld [vmem:[%s834_s3 + $0x8] sm:$0xff]  ;;  %v159_v3 = vld [vmem:[%s834_s3 + $0x10] sm:$0xff]  ;;  %vm295_vm0 = vcmask 1040384   ;;  %s411_s12 = sshll.u32 %s659_s13, 5  ;;  %s314_s25 = sshll.u32 %s843_s22, 4  ;;  %s887_s25 = int_to_ptr.vmem [resolvable:$true] %s314_s25 }
  0x4f   : > { %v160_v4 = vld [vmem:[%s834_s3 + $0x18] sm:$0xff]  ;;  %v189_v5 = vadd.f32 %v158_v2, %v157_v1  ;;  %v226_v6 = vmul.f32 %v157_v1, %v157_v1  ;;  %v227_v7 = vmul.f32 %v158_v2, %v158_v2  ;;  %v228_v8 = vmul.f32 %v159_v3, %v159_v3  ;;  %v161_v9 = vld [vmem:[%s834_s3 + $0x20] sm:$0xff]  ;;  %v162_v13 = vld [vmem:[%s834_s3 + $0x28] sm:$0xff]  ;;  %s885_s27 = scalar_lea.hbm %s951_s1, %s411_s12  ;;  %s301_s23 = scalar_lea.sflag [#allocation4], %s148_s21 }
  0x50   : > { %v229_v11 = vmul.f32 %v160_v4, %v160_v4  ;;  %v230_v15 = vmul.f32 %v161_v9, %v161_v9  ;;  %v163_v17 = vld [vmem:[%s834_s3 + $0x30] sm:$0xff]  ;;  %v231_v19 = vmul.f32 %v162_v13, %v162_v13  ;;  %v164_v21 = vld [vmem:[%s834_s3 + $0x38] sm:$0xff]  ;;  %v165_v25 = vld [vmem:[%s834_s3 + $0x40] sm:$0xff]  ;;  %s549_s5 = scalar_lea.vmem %s887_s25, 32  ;;  %p960_p2 = scmp.ne.s32.totalorder %s957_s28, 0 }
  0x51   : > { %v190_v10 = vadd.f32 %v189_v5, %v159_v3  ;;  %v258_v12 = vadd.f32 %v227_v7, %v226_v6  ;;  %v232_v23 = vmul.f32 %v163_v17, %v163_v17  ;;  %v233_v27 = vmul.f32 %v164_v21, %v164_v21  ;;  %v166_v29 = vld [vmem:[%s834_s3 + $0x48] sm:$0xff]  ;;  %v167_v33 = vld [vmem:[%s834_s3 + $0x50] sm:$0xff]  ;;  %v168_v37 = vld [vmem:[%s834_s3 + $0x58] sm:$0xff]  ;;  %p550_p7 = scmp.ne.s32.totalorder %s887_s25, %s549_s5  ;;  %s677_s13 = smov [#allocation5]  }
  0x52   : > { %v234_v31 = vmul.f32 %v165_v25, %v165_v25  ;;  %v235_v35 = vmul.f32 %v166_v29, %v166_v29  ;;  %v236_v39 = vmul.f32 %v167_v33, %v167_v33  ;;  %v169_v41 = vld [vmem:[%s834_s3 + $0x60] sm:$0xff]  ;;  %v237_v43 = vmul.f32 %v168_v37, %v168_v37  ;;  %v170_v45 = vld [vmem:[%s834_s3 + $0x68] sm:$0xff]  ;;  %v171_v49 = vld [vmem:[%s834_s3 + $0x70] sm:$0xff]  ;;  %s553_s9 = sshll.u32 %s677_s13, 4  ;;  %s554_s9 = int_to_ptr.vmem [resolvable:$false] %s553_s9 }
  0x53   : > { %v191_v14 = vadd.f32 %v190_v10, %v160_v4  ;;  %v259_v16 = vadd.f32 %v258_v12, %v228_v8  ;;  %v238_v47 = vmul.f32 %v169_v41, %v169_v41  ;;  %v239_v51 = vmul.f32 %v170_v45, %v170_v45  ;;  %v172_v53 = vld [vmem:[%s834_s3 + $0x78] sm:$0xff]  ;;  %v173_v57 = vld [vmem:[%s834_s3 + $0x80] sm:$0xff]  ;;  %v174_v61 = vld [vmem:[%s834_s3 + $0x88] sm:$0xff]  ;;  %p551_p4 = pnand %p550_p7, %p960_p2  ;;  %s555_s17 = scalar_lea.vmem %s554_s9, 64 }
  0x54   : > { %v240_v55 = vmul.f32 %v171_v49, %v171_v49  ;;  %v241_v59 = vmul.f32 %v172_v53, %v172_v53  ;;  %v242_v63 = vmul.f32 %v173_v57, %v173_v57  ;;  %v175_v1 = vld [vmem:[%s834_s3 + $0x90] sm:$0xff]  ;;  %v243_v3 = vmul.f32 %v174_v61, %v174_v61  ;;  %v176_v5 = vld [vmem:[%s834_s3 + $0x98] sm:$0xff]  ;;  %p556_p1 = scmp.lt.s32.totalorder %s887_s25, %s554_s9  ;;  %p557_p5 = scmp.lt.s32.totalorder %s555_s17, %s549_s5 }
  0x55   : > { %v192_v18 = vadd.f32 %v191_v14, %v161_v9  ;;  %v260_v20 = vadd.f32 %v259_v16, %v229_v11  ;;  %v244_v7 = vmul.f32 %v175_v1, %v175_v1  ;;  %v177_v9 = vld [vmem:[%s834_s3 + $0xa0] sm:$0xff]  ;;  %v245_v11 = vmul.f32 %v176_v5, %v176_v5  ;;  %p552_p0 = pneg %p551_p4 }
  0x56   : > { %p558_p6 = por %p557_p5, %p556_p1 }
  0x57   : > { %v193_v22 = vadd.f32 %v192_v18, %v162_v13  ;;  %v261_v24 = vadd.f32 %v260_v20, %v230_v15  ;;  %v178_v13 = vld [vmem:[%s834_s3 + $0xa8] sm:$0xff]  ;;  %v246_v15 = vmul.f32 %v177_v9, %v177_v9 }
  0x58   : > { %p559_p9 = pnand %p558_p6, %p552_p0 }
  0x59   : > { %v194_v26 = vadd.f32 %v193_v22, %v163_v17  ;;  %v262_v28 = vadd.f32 %v261_v24, %v231_v19  ;;  %v179_v17 = vld [vmem:[%s834_s3 + $0xb0] sm:$0xff]  ;;  %v247_v19 = vmul.f32 %v178_v13, %v178_v13 }
  0x5b   : > { %v195_v30 = vadd.f32 %v194_v26, %v164_v21  ;;  %v263_v32 = vadd.f32 %v262_v28, %v232_v23  ;;  %v180_v21 = vld [vmem:[%s834_s3 + $0xb8] sm:$0xff]  ;;  %v248_v23 = vmul.f32 %v179_v17, %v179_v17 }
  0x5d   : > { %v196_v34 = vadd.f32 %v195_v30, %v165_v25  ;;  %v264_v36 = vadd.f32 %v263_v32, %v233_v27  ;;  %v181_v25 = vld [vmem:[%s834_s3 + $0xc0] sm:$0xff]  ;;  %v249_v27 = vmul.f32 %v180_v21, %v180_v21 }
  0x5f   : > { %v197_v38 = vadd.f32 %v196_v34, %v166_v29  ;;  %v265_v40 = vadd.f32 %v264_v36, %v234_v31  ;;  %v182_v29 = vld [vmem:[%s834_s3 + $0xc8] sm:$0xff]  ;;  %v250_v31 = vmul.f32 %v181_v25, %v181_v25 }
  0x61   : > { %v198_v42 = vadd.f32 %v197_v38, %v167_v33  ;;  %v266_v44 = vadd.f32 %v265_v40, %v235_v35  ;;  %v183_v33 = vld [vmem:[%s834_s3 + $0xd0] sm:$0xff]  ;;  %v251_v35 = vmul.f32 %v182_v29, %v182_v29 }
  0x63   : > { %v199_v46 = vadd.f32 %v198_v42, %v168_v37  ;;  %v267_v48 = vadd.f32 %v266_v44, %v236_v39  ;;  %v184_v37 = vld [vmem:[%s834_s3 + $0xd8] sm:$0xff]  ;;  %v252_v39 = vmul.f32 %v183_v33, %v183_v33 }
  0x65   : > { %v200_v50 = vadd.f32 %v199_v46, %v169_v41  ;;  %v268_v52 = vadd.f32 %v267_v48, %v237_v43  ;;  %v185_v41 = vld [vmem:[%s834_s3 + $0xe0] sm:$0xff]  ;;  %v253_v43 = vmul.f32 %v184_v37, %v184_v37 }
  0x67   : > { %v201_v54 = vadd.f32 %v200_v50, %v170_v45  ;;  %v269_v56 = vadd.f32 %v268_v52, %v238_v47  ;;  %v186_v45 = vld [vmem:[%s834_s3 + $0xe8] sm:$0xff]  ;;  %v254_v47 = vmul.f32 %v185_v41, %v185_v41 }
  0x69   : > { %v202_v58 = vadd.f32 %v201_v54, %v171_v49  ;;  %v270_v60 = vadd.f32 %v269_v56, %v239_v51  ;;  %v187_v49 = vld [vmem:[%s834_s3 + $0xf0] sm:$0xff]  ;;  %v255_v51 = vmul.f32 %v186_v45, %v186_v45 }
  0x6b   : > { %v203_v62 = vadd.f32 %v202_v58, %v172_v53  ;;  %v271_v0 = vadd.f32 %v270_v60, %v240_v55  ;;  %v188_v53 = vld [vmem:[%s834_s3 + $0xf8] sm:$0xff]  ;;  %v256_v55 = vmul.f32 %v187_v49, %v187_v49 }
  0x6c   : > { %v257_v58 = vmul.f32 %v188_v53, %v188_v53 }
  0x6d   : > { %v204_v2 = vadd.f32 %v203_v62, %v173_v57  ;;  %v272_v4 = vadd.f32 %v271_v0, %v241_v59 }
  0x6f   : > { %v205_v6 = vadd.f32 %v204_v2, %v174_v61  ;;  %v273_v8 = vadd.f32 %v272_v4, %v242_v63 }
  0x71   : > { %v206_v10 = vadd.f32 %v205_v6, %v175_v1  ;;  %v274_v12 = vadd.f32 %v273_v8, %v243_v3 }
  0x73   : > { %v207_v14 = vadd.f32 %v206_v10, %v176_v5  ;;  %v275_v16 = vadd.f32 %v274_v12, %v244_v7 }
  0x75   : > { %v208_v18 = vadd.f32 %v207_v14, %v177_v9  ;;  %v276_v20 = vadd.f32 %v275_v16, %v245_v11  ;;  %v297_v11 = vld [vmem:[%s843_s22] sm:$0x3] }
  0x77   : > { %v209_v22 = vadd.f32 %v208_v18, %v178_v13  ;;  %v277_v24 = vadd.f32 %v276_v20, %v246_v15 }
  0x79   : > { %v210_v26 = vadd.f32 %v209_v22, %v179_v17  ;;  %v278_v28 = vadd.f32 %v277_v24, %v247_v19 }
  0x7b   : > { %v211_v30 = vadd.f32 %v210_v26, %v180_v21  ;;  %v279_v32 = vadd.f32 %v278_v28, %v248_v23 }
  0x7d   : > { %v212_v34 = vadd.f32 %v211_v30, %v181_v25  ;;  %v280_v36 = vadd.f32 %v279_v32, %v249_v27 }
  0x7f   : > { %v213_v38 = vadd.f32 %v212_v34, %v182_v29  ;;  %v281_v40 = vadd.f32 %v280_v36, %v250_v31 }
  0x81   : > { %v214_v42 = vadd.f32 %v213_v38, %v183_v33  ;;  %v282_v44 = vadd.f32 %v281_v40, %v251_v35 }
  0x83   : > { %v215_v46 = vadd.f32 %v214_v42, %v184_v37  ;;  %v283_v48 = vadd.f32 %v282_v44, %v252_v39 }
  0x85   : > { %v216_v50 = vadd.f32 %v215_v46, %v185_v41  ;;  %v284_v52 = vadd.f32 %v283_v48, %v253_v43 }
  0x87   : > { %v217_v54 = vadd.f32 %v216_v50, %v186_v45  ;;  %v285_v56 = vadd.f32 %v284_v52, %v254_v47 }
  0x89   : > { %v218_v57 = vadd.f32 %v217_v54, %v187_v49  ;;  %v286_v59 = vadd.f32 %v285_v56, %v255_v51 }
  0x8b   : > { %v219_v60 = vadd.f32 %v218_v57, %v188_v53  ;;  %v287_v61 = vadd.f32 %v286_v59, %v256_v55 }
  0x8d   : > { %v220_v62 = vrot.slane %v219_v60, 4  ;;  %v288_v63 = vadd.f32 %v287_v61, %v257_v58 }
  0x8f   : > { %v221_v0 = vadd.f32 %v220_v62, %v219_v60  ;;  %v289_v1 = vrot.slane %v288_v63, 4 }
  0x91   : > { %v222_v2 = vrot.slane %v221_v0, 2  ;;  %v290_v3 = vadd.f32 %v289_v1, %v288_v63 }
  0x93   : > { %v223_v4 = vadd.f32 %v222_v2, %v221_v0  ;;  %v291_v5 = vrot.slane %v290_v3, 2 }
  0x95   : > { %v224_v6 = vrot.slane %v223_v4, 1  ;;  %v292_v7 = vadd.f32 %v291_v5, %v290_v3 }
  0x97   : > { %v225_v8 = vadd.f32 %v224_v6, %v223_v4  ;;  %v293_v9 = vrot.slane %v292_v7, 1 }
  0x99   : > { %v294_v10 = vadd.f32 %v293_v9, %v292_v7 }
  0x9b   : > { %v296_v12 = vsel %vm295_vm0, %v225_v8, %v294_v10 }
  0x9c   : > { %v298_v13 = vadd.f32 %v297_v11, %v296_v12 }
  0x9e   : > { %299 = vst [vmem:[%s843_s22] sm:$0x3] %v298_v13 }
  0x9f   : > { %562 = shalt.err (!%p559_p9)
}
  0xa0   : > { %s563_s26 = scalar_lea.hbm %s885_s27, 32  ;;  %s567_s21 = scalar_lea.hbm %s951_s1, 64 }
  0xa1   : > { %p564_p10 = scmp.ne.s32.totalorder %s885_s27, %s563_s26  ;;  %p568_p8 = scmp.lt.u32.totalorder %s885_s27, %s951_s1 }
  0xa2   : > { %p569_p13 = scmp.lt.u32.totalorder %s567_s21, %s563_s26  ;;  %p571_p7 = scmp.lt.u32.totalorder %s563_s26, %s885_s27 }
  0xa3   : > { %p565_p11 = pnand %p564_p10, %p960_p2 }
  0xa4   : > { %p570_p12 = por %p569_p13, %p568_p8 }
  0xa5   : > { %p566_p3 = pneg %p565_p11 }
  0xa6   : > { %p572_p4 = por %p571_p7, %p570_p12 }
  0xa8   : > { %p573_p0 = pnand %p572_p4, %p566_p3 }
  0xaa   : > { %576 = shalt.err (!%p573_p0)
}
  0xab   : > { %416 = dma.vmem_to_hbm [thread:$0]  (%p960_p2), %s887_s25, 32, %s885_s27, %s301_s23  }
  0xac PF: > { %p427_p1 = scmp.ge.s32.totalorder %s671_s16, 2  ;;  %s326_s12 = sand.u32 1, %s631_s6  }
  0xad   : > { %p961_p5 = scmp.ne.s32.totalorder %s958_s2, 0  ;;  %s327_s4 = scalar_lea.sflag [#allocation4], %s326_s12 }
  0xaf   : > { %p423_p6 = pnand %p427_p1, %p961_p5 }
  0xb1   : > { %626 = dma.done.wait (!%p423_p6), %s327_s4, 32  }
  0xb2   : > { %628 = vsyncadd (!%p423_p6), %s327_s4, 4294967264  ;;  %s17_s16 = sadd.s32 1, %s671_s16   ;;  %s962_s28 = sld [smem:[#allocation8_spill]] }
  0xb3   : > { %p14_p9 = scmp.ge.s32.totalorder %s17_s16, 10   ;;  %s963_s6 = smov %s635_s7 }
  0xb4   : > { %s964_s7 = smov %s639_s8  ;;  %s965_s8 = smov %s775_s29 }
  0xb5   : > { %s966_s9 = smov %s647_s10  ;;  %s967_s10 = smov %s651_s11 }
  0xb6   : > { %s968_s11 = smov %s778_s30  ;;  %s969_s12 = smov %s663_s14 }
  0xb7   : > { %s970_s13 = smov %s667_s15  ;;  %s971_s14 = smov %s974_s19 }
  0xb8   : > { %s972_s15 = smov %s962_s28  ;;  %16 = sbr.rel (!%p14_p9) target bundleno = 9 (0x9), region = 73 }
  0xbf   :  { %332 = vsyncpa [#allocation3], 1 }
  0xc0   :  { %334 = vsyncpa [#allocation3 + $0x1], 1 }
  0xc1   :  { %335 = vsyncpa [#allocation4], 1 }
  0xc2   :  { %337 = vsyncpa [#allocation4 + $0x1], 1 }

// kernel: pointcn_forward.5
= control target key start
LH: loop header
LB: loop body
LE: loop exit
PB: predicated region body
PF: predicated region fallthrough
CT: control target
= control target key end

     0   :  { %s2289_s0 = inlined_call_operand.hbm [shape: f32[2,1024,128], index: 0, kind: input, shape index: {}]   ;;  %s2290_s1 = inlined_call_operand.hbm [shape: f32[2,3,128], index: 1, kind: input, shape index: {}]   ;;  %s2291_s2 = inlined_call_operand.hbm [shape: bf16[128,128], index: 2, kind: input, shape index: {}]   ;;  %s2292_s3 = inlined_call_operand.hbm [shape: f32[2,1024,128], index: 3, kind: output, shape index: {0}]   ;;  %s2293_s4 = inlined_call_operand.hbm [shape: f32[2,2,128], index: 4, kind: output, shape index: {1}]  }
   0x1   :  { %2311 = sst [smem:[#allocation23_spill]] %s2291_s2 }
   0x2   :  { %2312 = sst [smem:[#allocation24_spill]] %s2292_s3 }
   0x3   :  { %2313 = sst [smem:[#allocation25_spill]] %s2293_s4 }
   0x4   :  { %10 = vsyncpa [#allocation3], 0 }
   0x5   :  { %12 = vsyncpa [#allocation3 + $0x1], 0 }
   0x6   :  { %13 = vsyncpa [#allocation6], 0 }
   0x7   :  { %15 = vsyncpa [#allocation6 + $0x1], 0 }
   0x8   :  { %16 = vsyncpa [#allocation4], 0 }
   0x9   :  { %18 = vsyncpa [#allocation4 + $0x1], 0 }
   0xa   :  { %19 = vsyncpa [#allocation10], 0 }
   0xb   :  { %21 = vsyncpa [#allocation10 + $0x1], 0  ;;  %s1598_s15 = smov 0   ;;  %s1600_s16 = smov 0  }
   0xc   :  { %s1602_s17 = smov 0   ;;  %s1604_s18 = smov 0  }
   0xd   :  { %s1606_s19 = smov 0   ;;  %s1608_s20 = smov 0  }
   0xe   :  { %s1610_s21 = smov 0   ;;  %s1612_s22 = smov 0  }
   0xf   :  { %s1614_s23 = smov 0   ;;  %s1616_s24 = smov 0  }
  0x10   :  { %s1618_s25 = smov 0  }
  0x11 LB: > { %2314 = sst [smem:[#allocation16_spill]] %s1531_s18  ;;  %s1654_s26 = sadd.s32 4294967295, %s1559_s25   ;;  %s1559_s25 = sphi %s1618_s25, %s27_s25   ;;  %s1555_s24 = sphi %s1616_s24, %s2368_s24   ;;  %s1551_s23 = sphi %s1614_s23, %s2367_s23   ;;  %s1547_s22 = sphi %s1612_s22, %s2366_s22   ;;  %s1543_s21 = sphi %s1610_s21, %s2365_s21   ;;  %s1539_s20 = sphi %s1608_s20, %s2364_s20   ;;  %s1535_s19 = sphi %s1606_s19, %s2363_s19   ;;  %s1531_s18 = sphi %s1604_s18, %s2362_s18   ;;  %s1527_s17 = sphi %s1602_s17, %s2361_s17   ;;  %s1523_s16 = sphi %s1600_s16, %s2360_s16   ;;  %s1519_s15 = sphi %s1598_s15, %s2359_s15  }
  0x12   : > { %2315 = sst [smem:[#allocation17_spill]] %s1543_s21  ;;  %s1050_s27 = sadd.s32 4294967294, %s1559_s25  }
  0x13   : > { %2316 = sst [smem:[#allocation18_spill]] %s1547_s22  ;;  %p61_p0 = scmp.ne.s32.totalorder %s1535_s19, %s1531_s18 }
  0x14   : > { %p2294_p1 = scmp.eq.s32.totalorder %s1654_s26, 0  ;;  %p1661_p3 = scmp.eq.s32.totalorder %s1050_s27, 7 }
  0x15   : > { %p1051_p5 = scmp.ge.s32.totalorder %s1559_s25, 1  ;;  %p173_p7 = scmp.lt.s32.totalorder %s1559_s25, 9 }
  0x16   : > { %s2317_s28 = scalar_select %p1661_p3, 1, 0 }
  0x17   : > { %p1667_p4 = por %p2294_p1, %p61_p0  ;;  %p1674_p6 = por %p1661_p3, %p61_p0 }
  0x18   : > { %p1679_p8 = pnand %p1051_p5, %p173_p7  ;;  %s1561_s6 = smov [#allocation7]  }
  0x19   : > { %s2318_s29 = scalar_select %p1667_p4, 1, 0 }
  0x1a   : > { %s2319_s30 = scalar_select %p1674_p6, 1, 0 }
  0x1b   : > { %s2321_s5 = scalar_select %p1679_p8, 1, 0 }
  0x1c   : > { %2320 = sst [smem:[#allocation19_spill]] %s2319_s30  ;;  %s185_s7 = sshll.u32 %s1561_s6, 4  ;;  %s186_s7 = int_to_ptr.vmem [resolvable:$true] %s185_s7 }
  0x1d   : > { %p1183_p9 = pneg %p1679_p8  ;;  %s2323_s2 = sld [smem:[#allocation23_spill]] }
  0x1f   : > { %p1687_p10 = pnand %p1183_p9, %p2294_p1 }
  0x21   : > { %p1311_p12 = pneg %p1687_p10 }
  0x23   : > { %s1309_s11 = scalar_lea.hbm %s2323_s2, 1024 }
  0x24   : > { %p1310_p11 = scmp.ne.s32.totalorder %s2323_s2, %s1309_s11  ;;  %p1316_p5 = scmp.lt.u32.totalorder %s1309_s11, %s2323_s2 }
  0x26   : > { %p1312_p13 = pnand %p1311_p12, %p1310_p11 }
  0x28   : > { %p1313_p0 = pneg %p1312_p13 }
  0x2a   : > { %p1318_p7 = pnand %p1316_p5, %p1313_p0 }
  0x2c   : > { %1321 = shalt.err (!%p1318_p7)
}
  0x2d   : > { %s1322_s6 = scalar_lea.vmem %s186_s7, 1024  ;;  %p1330_p6 = scmp.lt.s32.totalorder %s186_s7, %s186_s7 }
  0x2e   : > { %p1323_p9 = scmp.ne.s32.totalorder %s186_s7, %s1322_s6  ;;  %p1331_p4 = scmp.lt.s32.totalorder %s1322_s6, %s1322_s6 }
  0x30   : > { %p1325_p1 = pnand %p1323_p9, %p1311_p12  ;;  %p1332_p8 = por %p1331_p4, %p1330_p6 }
  0x32   : > { %p1326_p2 = pneg %p1325_p1 }
  0x34   : > { %p1333_p3 = pnand %p1332_p8, %p1326_p2 }
  0x36   : > { %1336 = shalt.err (!%p1333_p3)
}
  0x37   : > { %s1562_s9 = smov 64   ;;  %s1563_s10 = smov 4  }
  0x38   : > { %1186 = dma.hbm_to_vmem [thread:$0]  (!%p1687_p10), %s2323_s2, 1024, %s186_s7, [#allocation6], %s1562_s9, %s1562_s9, %s1563_s10  }
  0x39   : > { %s36_s13 = sadd.s32 1, %s1551_s23  ;;  %s39_s14 = sadd.s32 1, %s1555_s24 }
  0x3a   : > { %p37_p1 = scmp.ge.s32.totalorder %s36_s13, 4  ;;  %s48_s27 = sadd.s32 1, %s1539_s20 }
  0x3b   : > { %p55_p2 = scmp.ne.s32.totalorder %s1539_s20, %s1535_s19  ;;  %p2308_p3 = scmp.eq.s32.totalorder %s1559_s25, 0 }
  0x3c   : > { %s2370_s13 = smov (%p37_p1, %s36_s13), 0  ;;  %s2372_s14 = smov (!%p37_p1, %s39_s14), %s1555_s24 }
  0x3d   : > { %2324 = sst [smem:[#allocation20_spill]] %s2370_s13  ;;  %s44_s6 = ssub.s32 %s1551_s23, %s2370_s13 }
  0x3e   : > { %p41_p4 = scmp.ge.s32.totalorder %s2372_s14, 2  ;;  %p2325_p6 = scmp.eq.s32.totalorder %s1654_s26, 7 }
  0x3f   : > { %p1726_p10 = por %p2308_p3, %p55_p2  ;;  %p2307_p11 = scmp.lt.s32.totalorder %s1559_s25, 8 }
  0x40   : > { %p1720_p8 = por %p2325_p6, %p55_p2  ;;  %s2374_s14 = smov (%p41_p4, %s2372_s14), 0 }
  0x41   : > { %2329 = sst [smem:[#allocation22_spill]] %s2374_s14  ;;  %s199_s9 = sand.u32 1, %s1539_s20  }
  0x42   : > { %s2326_s8 = scalar_select %p1720_p8, 1, 0 }
  0x43   : > { %s1055_s10 = sshll.u32 %s1551_s23, 5  ;;  %s1737_s11 = ssub.s32 %s1555_s24, %s2374_s14 }
  0x44   : > { %2327 = sst [smem:[#allocation21_spill]] %s2326_s8  ;;  %s45_s12 = sor.u32 %s44_s6, %s1737_s11 }
  0x45   : > { %p46_p13 = scmp.eq.s32.totalorder %s45_s12, 0  ;;  %s1054_s2 = sshll.u32 %s199_s9, 8 }
  0x46   : > { %s1056_s13 = sshll.u32 %s1555_s24, 7  ;;  %s203_s4 = scalar_lea.vmem [#allocation2], %s1054_s2 }
  0x47   : > { %s1743_s30 = scalar_select %p46_p13, %s1539_s20, %s48_s27  }
  0x48   : > { %s209_s18 = sadd.s32 %s1056_s13, %s1055_s10  ;;  %s212_s3 = sshll.u32 %s203_s4, 4  ;;  %s1745_s3 = int_to_ptr.vmem [resolvable:$true] %s212_s3 }
  0x49   : > { %s1057_s8 = sshll.u32 %s209_s18, 7  ;;  %p1756_p0 = pnand %p2307_p11, %p1726_p10 }
  0x4a   : > { %s1750_s14 = scalar_lea.hbm %s2289_s0, %s1057_s8  ;;  %s1760_s2 = scalar_lea.sflag [#allocation3], %s199_s9 }
  0x4b   : > { %s1337_s4 = scalar_lea.hbm %s1750_s14, 4096  ;;  %p1339_p7 = pneg %p1756_p0 }
  0x4c   : > { %p1338_p5 = scmp.ne.s32.totalorder %s1750_s14, %s1337_s4  ;;  %s1342_s22 = scalar_lea.hbm %s2289_s0, 32768 }
  0x4d   : > { %p1343_p2 = scmp.lt.u32.totalorder %s1750_s14, %s2289_s0  ;;  %p1344_p4 = scmp.lt.u32.totalorder %s1342_s22, %s1337_s4 }
  0x4e   : > { %p1340_p9 = pnand %p1339_p7, %p1338_p5  ;;  %p1346_p10 = scmp.lt.u32.totalorder %s1337_s4, %s1750_s14 }
  0x4f   : > { %p1345_p6 = por %p1344_p4, %p1343_p2 }
  0x50   : > { %p1341_p1 = pneg %p1340_p9 }
  0x51   : > { %p1347_p13 = por %p1346_p10, %p1345_p6 }
  0x53   : > { %p1348_p11 = pnand %p1347_p13, %p1341_p1 }
  0x55   : > { %1351 = shalt.err (!%p1348_p11)
}
  0x56   : > { %s1352_s8 = scalar_lea.vmem %s1745_s3, 4096  ;;  %s1564_s7 = smov [#allocation2]  }
  0x57   : > { %p1353_p5 = scmp.ne.s32.totalorder %s1745_s3, %s1352_s8  ;;  %s1357_s9 = sshll.u32 %s1564_s7, 4  ;;  %s1358_s9 = int_to_ptr.vmem [resolvable:$false] %s1357_s9 }
  0x58   : > { %s1359_s10 = scalar_lea.vmem %s1358_s9, 8192  ;;  %p1360_p12 = scmp.lt.s32.totalorder %s1745_s3, %s1358_s9 }
  0x59   : > { %p1355_p9 = pnand %p1353_p5, %p1339_p7  ;;  %p1361_p2 = scmp.lt.s32.totalorder %s1359_s10, %s1352_s8 }
  0x5b   : > { %p1356_p3 = pneg %p1355_p9  ;;  %p1362_p4 = por %p1361_p2, %p1360_p12 }
  0x5d   : > { %p1363_p6 = pnand %p1362_p4, %p1356_p3 }
  0x5f   : > { %1366 = shalt.err (!%p1363_p6)
}
  0x60   : > { %s1565_s12 = smov 128   ;;  %s1566_s4 = smov 8  }
  0x61   : > { %1190 = dma.hbm_to_vmem [thread:$0]  (!%p1756_p0), %s1750_s14, 4096, %s1745_s3, %s1760_s2, %s1565_s12, %s1565_s12, %s1566_s4  }
  0x62   : > { %s74_s18 = sadd.s32 1, %s1527_s17  ;;  %p2331_p3 = scmp.eq.s32.totalorder %s1737_s11, 0 }
  0x63   : > { %p81_p11 = scmp.ne.s32.totalorder %s1527_s17, %s1523_s16  ;;  %p87_p12 = scmp.ne.s32.totalorder %s1523_s16, %s1519_s15 }
  0x64   : > { %s1792_s21 = scalar_select %p2331_p3, %s1527_s17, %s74_s18  }
  0x65   : > { %s222_s22 = sand.u32 1, %s1559_s25   ;;  %s224_s13 = sand.u32 1, %s1527_s17  }
  0x66   : > { %p2332_p7 = scmp.eq.s32.totalorder %s1559_s25, 0  ;;  %p2333_p10 = scmp.eq.s32.totalorder %s1654_s26, 0 }
  0x67   : > { %p2335_p5 = scmp.eq.s32.totalorder %s1654_s26, 7  ;;  %p2337_p0 = scmp.ne.s32.totalorder %s2317_s28, 0 }
  0x68   : > { %p83_p1 = por %p81_p11, %p2332_p7  ;;  %p1804_p13 = por %p87_p12, %p2333_p10 }
  0x69   : > { %p1810_p9 = por %p2335_p5, %p81_p11  ;;  %p1816_p2 = por %p2337_p0, %p87_p12 }
  0x6a   : > { %s1058_s14 = sshll.u32 %s224_s13, 2  ;;  %s1059_s11 = sshll.u32 %s1555_s24, 6 }
  0x6b   : > { %s2336_s27 = scalar_select %p1810_p9, 1, 0 }
  0x6c   : > { %s2338_s3 = scalar_select %p1816_p2, 1, 0 }
  0x6d   : > { %s1824_s7 = scalar_lea.hbm %s2290_s1, %s1059_s11  ;;  %s226_s9 = scalar_lea.vmem [#allocation5], %s1058_s14 }
  0x6e   : > { %s233_s10 = sshll.u32 %s226_s9, 4  ;;  %p2339_p4 = scmp.lt.s32.totalorder %s1559_s25, 8  ;;  %s1826_s10 = int_to_ptr.vmem [resolvable:$true] %s233_s10 }
  0x6f   : > { %s223_s12 = scalar_lea.sflag [#allocation6], %s222_s22  ;;  %s1367_s4 = scalar_lea.hbm %s1824_s7, 64 }
  0x70   : > { %p1830_p6 = pnand %p2339_p4, %p83_p1  ;;  %p1368_p3 = scmp.ne.s32.totalorder %s1824_s7, %s1367_s4 }
  0x71   : > { %s1372_s14 = scalar_lea.hbm %s2290_s1, 128  ;;  %p1373_p1 = scmp.lt.u32.totalorder %s1824_s7, %s2290_s1 }
  0x72   : > { %p1369_p11 = pneg %p1830_p6  ;;  %p1374_p10 = scmp.lt.u32.totalorder %s1372_s14, %s1367_s4 }
  0x73   : > { %p1376_p0 = scmp.lt.u32.totalorder %s1367_s4, %s1824_s7 }
  0x74   : > { %p1370_p12 = pnand %p1369_p11, %p1368_p3  ;;  %p1375_p5 = por %p1374_p10, %p1373_p1 }
  0x76   : > { %p1371_p7 = pneg %p1370_p12  ;;  %p1377_p4 = por %p1376_p0, %p1375_p5 }
  0x78   : > { %p1378_p2 = pnand %p1377_p4, %p1371_p7 }
  0x7a   : > { %1381 = shalt.err (!%p1378_p2)
}
  0x7b   : > { %s1382_s22 = scalar_lea.vmem %s1826_s10, 64  ;;  %s1567_s8 = smov [#allocation5]  }
  0x7c   : > { %p1383_p3 = scmp.ne.s32.totalorder %s1826_s10, %s1382_s22  ;;  %s1387_s9 = sshll.u32 %s1567_s8, 4  ;;  %s1388_s9 = int_to_ptr.vmem [resolvable:$false] %s1387_s9 }
  0x7d   : > { %s1389_s18 = scalar_lea.vmem %s1388_s9, 128  ;;  %p1390_p8 = scmp.lt.s32.totalorder %s1826_s10, %s1388_s9 }
  0x7e   : > { %p1385_p12 = pnand %p1383_p3, %p1369_p11  ;;  %p1391_p1 = scmp.lt.s32.totalorder %s1389_s18, %s1382_s22 }
  0x80   : > { %p1386_p9 = pneg %p1385_p12  ;;  %p1392_p10 = por %p1391_p1, %p1390_p8 }
  0x82   : > { %p1393_p5 = pnand %p1392_p10, %p1386_p9 }
  0x84   : > { %1396 = shalt.err (!%p1393_p5)
}
  0x85   : > { %1193 = dma.hbm_to_vmem [thread:$0]  (!%p1830_p6), %s1824_s7, 64, %s1826_s10, %s223_s12  }
  0x86   : > { %p2341_p2 = scmp.ne.s32.totalorder %s2321_s5, 0 }
  0x87   : > { %s1862_s4 = sand.u32 (!%p2341_p2), 1, %s1535_s19   ;;  %p2342_p8 = scmp.ne.s32.totalorder (!%p2341_p2), %s2318_s29, 0 }
  0x88   : > { %242 = sbr.rel (%p2341_p2) target bundleno = 519 (0x207), region = 32  ;;  %s1061_s13 = sshll.u32 (!%p2341_p2), %s1862_s4, 8 }
  0x89   : > { %s245_s14 = scalar_lea.sflag (!%p2341_p2), [#allocation3], %s1862_s4  ;;  %s1866_s11 = scalar_lea.vmem (!%p2341_p2), [#allocation2], %s1061_s13 }
  0x8f   : > { %1498 = dma.done.wait (%p2342_p8), %s245_s14, 4096  }
  0x90   : > { %1500 = vsyncadd (%p2342_p8), %s245_s14, 4294963200  ;;  %s253_s5 = sand.u32 1, %s1654_s26   ;;  %s1874_s7 = sand.u32 1, %s1523_s16  }
  0x91   : > { %s1062_s10 = sshll.u32 %s1874_s7, 2  ;;  %s254_s28 = scalar_lea.sflag [#allocation6], %s253_s5 }
  0x92   : > { %s1877_s12 = scalar_lea.vmem [#allocation5], %s1062_s10 }
  0x93   : > { %1502 = dma.done.wait (%p1804_p13), %s254_s28, 64  }
  0x94   : > { %1504 = vsyncadd (%p1804_p13), %s254_s28, 4294967232  ;;  %p2343_p9 = scmp.eq.s32.totalorder %s1654_s26, 0 }
  0x96   : > { %1506 = dma.done.wait (%p2343_p9), [#allocation6], 1024   ;;  %p2344_p6 = pmov %p2343_p9 }
  0x97   : > { %s1065_s29 = sshll.u32 %s1874_s7, 1  ;;  %s1888_s2 = scalar_lea.vmem [#allocation8], %s1061_s13 }
  0x98   : > { %1508 = vsyncadd (%p2344_p6), [#allocation6], 4294966272  ;;  %s1890_s22 = scalar_lea.vmem [#allocation9], %s1065_s29  ;;  %s2345_s8 = sld [smem:[#allocation17_spill]] }
  0x9e   : > { %p1066_p11 = scmp.ne.s32.totalorder %s2345_s8, 0 }
  0x9f   : > { %v1568_v0 = vmov (!%p1066_p11), 0.0  }
  0xa0   : > { %302 = sbr.rel (%p1066_p11) target bundleno = 167 (0xa7), region = 48  ;;  %303 = vst [vmem:[%s1890_s22] sm:$0x3] (!%p1066_p11), %v1568_v0 }
  0xa7 PF: > { %v1301_v1 = vld [vmem:[#allocation7] sm:$0xff]   ;;  %v337_v2 = vlaneseq  ;;  %v1302_v3 = vld [vmem:[#allocation7 + $0x8] sm:$0xff]   ;;  %v1303_v5 = vld [vmem:[#allocation7 + $0x10] sm:$0xff]   ;;  %s2346_s26 = sld [smem:[#allocation17_spill]]  ;;  %s2347_s6 = sld [smem:[#allocation18_spill]] }
  0xa8   : > { %1107 = vmatprep.subr.bf16.mxu0 %v1301_v1  ;;  %1155 = vmatprep.subr.bf16.mxu1 %v1301_v1  ;;  %v1304_v9 = vld [vmem:[#allocation7 + $0x18] sm:$0xff]   ;;  %v306_v12 = vld [vmem:[%s1866_s11 + $0x8] sm:$0xff]  ;;  %v307_v15 = vld [vmem:[%s1866_s11 + $0x10] sm:$0xff]  ;;  %s882_s14 = sshll.u32 %s1888_s2, 4  ;;  %s2348_s5 = sld [smem:[#allocation21_spill]]  ;;  %s2127_s14 = int_to_ptr.vmem [resolvable:$true] %s882_s14 }
  0xa9   : > { %v338_v4 = vshrl.u32 %v337_v2, 7  ;;  %1108 = vmatpush3.bf16.msra.mxu0 %v1301_v1  ;;  %1163 = vmatpush3.bf16.msra.mxu1 %v1301_v1  ;;  %v304_v10 = vld [vmem:[%s1877_s12] sm:$0x7]  ;;  %v308_v16 = vld [vmem:[%s1866_s11 + $0x18] sm:$0xff]  ;;  %v310_v19 = vld [vmem:[%s1866_s11 + $0x28] sm:$0xff]  ;;  %s2349_s12 = sld [smem:[#allocation24_spill]] }
  0xaa   : > { %1109 = vmatprep.subr.bf16.mxu0 %v1302_v3  ;;  %1156 = vmatprep.subr.bf16.mxu1 %v1302_v3  ;;  %v305_v11 = vld [vmem:[%s1866_s11] sm:$0xff]  ;;  %v311_v20 = vld [vmem:[%s1866_s11 + $0x30] sm:$0xff]  ;;  %v312_v25 = vld [vmem:[%s1866_s11 + $0x38] sm:$0xff]  ;;  %s862_s8 = scalar_lea.sflag [#allocation4], %s1862_s4 }
  0xab   : > { %v339_v6 = vsub.s32 0, %v338_v4  ;;  %v375_v7 = vsub.s32 1, %v338_v4  ;;  %v411_v8 = vsub.s32 2, %v338_v4  ;;  %v309_v17 = vld [vmem:[%s1866_s11 + $0x20] sm:$0xff]  ;;  %v1305_v26 = vld [vmem:[#allocation7 + $0x20] sm:$0xff]   ;;  %v1306_v40 = vld [vmem:[#allocation7 + $0x28] sm:$0xff]  }
  0xac   : > { %v313_v44 = vld [vmem:[%s1866_s11 + $0x40] sm:$0xff]  ;;  %v314_v45 = vld [vmem:[%s1866_s11 + $0x48] sm:$0xff]  ;;  %v315_v49 = vld [vmem:[%s1866_s11 + $0x50] sm:$0xff] }
  0xad   : > { %1110 = vmatpush3.bf16.msra.mxu0 %v1302_v3  ;;  %1164 = vmatpush3.bf16.msra.mxu1 %v1302_v3  ;;  %v1897_v13 = vrot.slane %v304_v10, %v339_v6  ;;  %v1899_v14 = vrot.slane %v304_v10, %v375_v7  ;;  %v1904_v18 = vrot.slane %v304_v10, %v411_v8  ;;  %v316_v50 = vld [vmem:[%s1866_s11 + $0x58] sm:$0xff]  ;;  %v317_v53 = vld [vmem:[%s1866_s11 + $0x60] sm:$0xff]  ;;  %v318_v58 = vld [vmem:[%s1866_s11 + $0x68] sm:$0xff]  ;;  %s1077_s9 = sshll.u32 %s2346_s26, 5  ;;  %s1078_s18 = sshll.u32 %s2347_s6, 7 }
  0xae   : > { %1111 = vmatprep.subr.bf16.mxu0 %v1303_v5  ;;  %1157 = vmatprep.subr.bf16.mxu1 %v1303_v5  ;;  %v1307_v59 = vld [vmem:[#allocation7 + $0x30] sm:$0xff]   ;;  %v319_v4 = vld [vmem:[%s1866_s11 + $0x70] sm:$0xff]  ;;  %s879_s13 = sadd.s32 %s1078_s18, %s1077_s9  ;;  %s1397_s26 = scalar_lea.vmem %s2127_s14, 4096 }
  0xaf   : > { %v341_v21 = vsub.f32 %v305_v11, %v1897_v13  ;;  %v342_v22 = vsub.f32 %v306_v12, %v1897_v13  ;;  %v343_v23 = vsub.f32 %v307_v15, %v1897_v13  ;;  %v344_v24 = vsub.f32 %v308_v16, %v1897_v13  ;;  %v320_v15 = vld [vmem:[%s1866_s11 + $0x78] sm:$0xff]  ;;  %v1308_v16 = vld [vmem:[#allocation7 + $0x38] sm:$0xff]   ;;  %p1398_p13 = scmp.ne.s32.totalorder %s2127_s14, %s1397_s26  ;;  %p2350_p7 = scmp.ne.s32.totalorder %s2348_s5, 0 }
  0xb0   : > { %v345_v27 = vsub.f32 %v309_v17, %v1897_v13  ;;  %v346_v28 = vsub.f32 %v310_v19, %v1897_v13  ;;  %v347_v29 = vsub.f32 %v311_v20, %v1897_v13  ;;  %v348_v36 = vsub.f32 %v312_v25, %v1897_v13  ;;  %s1569_s9 = smov [#allocation8]  }
  0xb1   : > { %1112 = vmatpush3.bf16.msra.mxu0 %v1303_v5  ;;  %1165 = vmatpush3.bf16.msra.mxu1 %v1303_v5  ;;  %v377_v30 = vmul.f32 %v1899_v14, %v341_v21  ;;  %v378_v31 = vmul.f32 %v1899_v14, %v342_v22  ;;  %v379_v32 = vmul.f32 %v1899_v14, %v343_v23  ;;  %v321_v21 = vld [vmem:[%s1866_s11 + $0x80] sm:$0xff]  ;;  %v322_v23 = vld [vmem:[%s1866_s11 + $0x88] sm:$0xff]  ;;  %p1399_p0 = pnand %p1398_p13, %p2350_p7  ;;  %s1401_s18 = sshll.u32 %s1569_s9, 4  ;;  %s1402_s18 = int_to_ptr.vmem [resolvable:$false] %s1401_s18 }
  0xb2   : > { %1113 = vmatprep.subr.bf16.mxu0 %v1304_v9  ;;  %v380_v33 = vmul.f32 %v1899_v14, %v344_v24  ;;  %1158 = vmatprep.subr.bf16.mxu1 %v1304_v9  ;;  %v381_v34 = vmul.f32 %v1899_v14, %v345_v27  ;;  %v382_v35 = vmul.f32 %v1899_v14, %v346_v28  ;;  %v323_v28 = vld [vmem:[%s1866_s11 + $0x90] sm:$0xff]  ;;  %p1404_p3 = scmp.lt.s32.totalorder %s2127_s14, %s1402_s18 }
  0xb3   : > { %v383_v37 = vmul.f32 %v1899_v14, %v347_v29  ;;  %v413_v38 = vadd.f32 %v1904_v18, %v377_v30  ;;  %v414_v39 = vadd.f32 %v1904_v18, %v378_v31  ;;  %v415_v41 = vadd.f32 %v1904_v18, %v379_v32  ;;  %v324_v29 = vld [vmem:[%s1866_s11 + $0x98] sm:$0xff]  ;;  %p1400_p4 = pneg %p1399_p0 }
  0xb4   : > { %v416_v42 = vadd.f32 %v1904_v18, %v380_v33  ;;  %v384_v43 = vmul.f32 %v1899_v14, %v348_v36  ;;  %v417_v48 = vadd.f32 %v1904_v18, %v381_v34  ;;  %v418_v51 = vadd.f32 %v1904_v18, %v382_v35  ;;  %v325_v34 = vld [vmem:[%s1866_s11 + $0xa0] sm:$0xff] }
  0xb5   : > { %1114 = vmatpush3.bf16.msra.mxu0 %v1304_v9  ;;  %v445_v46 = vmax.f32 %v413_v38, 0.0  ;;  %v446_v47 = vmax.f32 %v414_v39, 0.0  ;;  %1166 = vmatpush3.bf16.msra.mxu1 %v1304_v9  ;;  %v419_v52 = vadd.f32 %v1904_v18, %v383_v37  ;;  %v349_v56 = vsub.f32 %v313_v44, %v1897_v13  ;;  %v326_v39 = vld [vmem:[%s1866_s11 + $0xa8] sm:$0xff]  ;;  %v327_v44 = vld [vmem:[%s1866_s11 + $0xb0] sm:$0xff] }
  0xb6   : > { %1115 = vmatprep.subr.bf16.mxu0 %v1305_v26  ;;  %1159 = vmatprep.subr.bf16.mxu1 %v1305_v26  ;;  %v420_v55 = vadd.f32 %v1904_v18, %v384_v43  ;;  %v350_v57 = vsub.f32 %v314_v45, %v1897_v13  ;;  %v447_v60 = vmax.f32 %v415_v41, 0.0  ;;  %v448_v61 = vmax.f32 %v416_v42, 0.0 }
  0xb7   : > { %v477_v54 = vpack.c.bf16 %v446_v47, %v445_v46  ;;  %v351_v62 = vsub.f32 %v315_v49, %v1897_v13  ;;  %v352_v63 = vsub.f32 %v316_v50, %v1897_v13  ;;  %v449_v0 = vmax.f32 %v417_v48, 0.0 }
  0xb8   : > { %v385_v1 = vmul.f32 %v1899_v14, %v349_v56  ;;  %v386_v2 = vmul.f32 %v1899_v14, %v350_v57  ;;  %v353_v3 = vsub.f32 %v317_v53, %v1897_v13  ;;  %v450_v5 = vmax.f32 %v418_v51, 0.0  ;;  %v328_v53 = vld [vmem:[%s1866_s11 + $0xb8] sm:$0xff] }
  0xb9   : > { %1116 = vmatpush3.bf16.msra.mxu0 %v1305_v26  ;;  %1123 = vmatprep.mubr.bf16.mxu0 %v477_v54  ;;  %v387_v6 = vmul.f32 %v1899_v14, %v351_v62  ;;  %v388_v7 = vmul.f32 %v1899_v14, %v352_v63  ;;  %v354_v8 = vsub.f32 %v318_v58, %v1897_v13  ;;  %v451_v9 = vmax.f32 %v419_v52, 0.0  ;;  %v329_v58 = vld [vmem:[%s1866_s11 + $0xc0] sm:$0xff] }
  0xba   : > { %1117 = vmatprep.subr.bf16.mxu0 %v1306_v40  ;;  %1167 = vmatpush3.bf16.msra.mxu1 %v1305_v26  ;;  %v452_v10 = vmax.f32 %v420_v55, 0.0  ;;  %v421_v11 = vadd.f32 %v1904_v18, %v385_v1  ;;  %v422_v12 = vadd.f32 %v1904_v18, %v386_v2  ;;  %v389_v19 = vmul.f32 %v1899_v14, %v353_v3  ;;  %v330_v3 = vld [vmem:[%s1866_s11 + $0xc8] sm:$0xff] }
  0xbb   : > { %1160 = vmatprep.subr.bf16.mxu1 %v1306_v40  ;;  %v1954_v17 = vadd.f32 %v1904_v18, %v387_v6  ;;  %v355_v20 = vsub.f32 %v319_v4, %v1897_v13  ;;  %v1960_v22 = vadd.f32 %v1904_v18, %v388_v7  ;;  %v478_v24 = vpack.c.bf16 %v448_v61, %v447_v60 }
  0xbc   : > { %v479_v25 = vpack.c.bf16 %v450_v5, %v449_v0  ;;  %v390_v26 = vmul.f32 %v1899_v14, %v354_v8  ;;  %v356_v27 = vsub.f32 %v320_v15, %v1897_v13  ;;  %v1967_v30 = vpack.c.bf16 %v452_v10, %v451_v9  ;;  %v331_v8 = vld [vmem:[%s1866_s11 + $0xd0] sm:$0xff]  ;;  %v332_v9 = vld [vmem:[%s1866_s11 + $0xd8] sm:$0xff] }
  0xbd   : > { %1118 = vmatpush3.bf16.msra.mxu0 %v1306_v40  ;;  %v453_v31 = vmax.f32 %v421_v11, 0.0  ;;  %v454_v32 = vmax.f32 %v422_v12, 0.0  ;;  %v357_v33 = vsub.f32 %v321_v21, %v1897_v13  ;;  %v455_v35 = vmax.f32 %v1954_v17, 0.0 }
  0xbe   : > { %1119 = vmatprep.subr.bf16.mxu0 %v1307_v59  ;;  %1168 = vmatpush3.bf16.msra.mxu1 %v1306_v40  ;;  %v1973_v36 = vadd.f32 %v1904_v18, %v389_v19  ;;  %v1976_v37 = vmul.f32 %v1899_v14, %v355_v20  ;;  %v358_v38 = vsub.f32 %v322_v23, %v1897_v13  ;;  %v456_v40 = vmax.f32 %v1960_v22, 0.0 }
  0xbf   : > { %1161 = vmatprep.subr.bf16.mxu1 %v1307_v59  ;;  %v393_v41 = vmul.f32 %v1899_v14, %v357_v33  ;;  %v359_v42 = vsub.f32 %v323_v28, %v1897_v13  ;;  %v360_v43 = vsub.f32 %v324_v29, %v1897_v13  ;;  %v1986_v45 = vadd.f32 %v1904_v18, %v390_v26 }
  0xc0   : > { %v1989_v46 = vmul.f32 %v1899_v14, %v356_v27  ;;  %v394_v47 = vmul.f32 %v1899_v14, %v358_v38  ;;  %v361_v48 = vsub.f32 %v325_v34, %v1897_v13  ;;  %v362_v52 = vsub.f32 %v326_v39, %v1897_v13  ;;  %v335_v34 = vld [vmem:[%s1866_s11 + $0xf0] sm:$0xff] }
  0xc1   : > { %1120 = vmatpush3.bf16.msra.mxu0 %v1307_v59  ;;  %v429_v49 = vadd.f32 %v1904_v18, %v393_v41  ;;  %v395_v50 = vmul.f32 %v1899_v14, %v359_v42  ;;  %v396_v51 = vmul.f32 %v1899_v14, %v360_v43  ;;  %v481_v54 = vpack.c.bf16 %v454_v32, %v453_v31  ;;  %v336_v43 = vld [vmem:[%s1866_s11 + $0xf8] sm:$0xff] }
  0xc2   : > { %1121 = vmatprep.subr.bf16.mxu0 %v1308_v16  ;;  %1169 = vmatpush3.bf16.msra.mxu1 %v1307_v59  ;;  %v430_v55 = vadd.f32 %v1904_v18, %v394_v47  ;;  %v397_v56 = vmul.f32 %v1899_v14, %v361_v48  ;;  %v363_v57 = vsub.f32 %v327_v44, %v1897_v13  ;;  %v457_v44 = vmax.f32 %v1973_v36, 0.0 }
  0xc3   : > { %1162 = vmatprep.subr.bf16.mxu1 %v1308_v16  ;;  %v461_v59 = vmax.f32 %v429_v49, 0.0  ;;  %v431_v60 = vadd.f32 %v1904_v18, %v395_v50  ;;  %v432_v61 = vadd.f32 %v1904_v18, %v396_v51  ;;  %v398_v62 = vmul.f32 %v1899_v14, %v362_v52 }
  0xc4   : > { %v462_v63 = vmax.f32 %v430_v55, 0.0  ;;  %v433_v0 = vadd.f32 %v1904_v18, %v397_v56  ;;  %v364_v1 = vsub.f32 %v328_v53, %v1897_v13  ;;  %v399_v2 = vmul.f32 %v1899_v14, %v363_v57 }
  0xc5   : > { %1122 = vmatpush3.bf16.msra.mxu0 %v1308_v16  ;;  %v463_v4 = vmax.f32 %v431_v60, 0.0  ;;  %v464_v5 = vmax.f32 %v432_v61, 0.0  ;;  %v434_v6 = vadd.f32 %v1904_v18, %v398_v62  ;;  %v365_v7 = vsub.f32 %v329_v58, %v1897_v13 }
  0xc6   : > { %1170 = vmatpush3.bf16.msra.mxu1 %v1308_v16  ;;  %v485_v10 = vpack.c.bf16 %v462_v63, %v461_v59  ;;  %v465_v11 = vmax.f32 %v433_v0, 0.0  ;;  %v400_v12 = vmul.f32 %v1899_v14, %v364_v1  ;;  %v435_v15 = vadd.f32 %v1904_v18, %v399_v2  ;;  %v333_v16 = vld [vmem:[%s1866_s11 + $0xe0] sm:$0xff] }
  0xc7   : > { %v486_v19 = vpack.c.bf16 %v464_v5, %v463_v4  ;;  %v466_v20 = vmax.f32 %v434_v6, 0.0  ;;  %v366_v21 = vsub.f32 %v330_v3, %v1897_v13  ;;  %v401_v23 = vmul.f32 %v1899_v14, %v365_v7 }
  0xc8   : > { %1124 = vmatmul.mubr.bf16.vlgmr.msra.gmra.mrb[0].mxu0 %v478_v24  ;;  %v334_v24 = vld [vmem:[%s1866_s11 + $0xe8] sm:$0xff]  ;;  %1139 = vmatprep.mubr.bf16.mxu1 %v485_v10  ;;  %v467_v26 = vmax.f32 %v435_v15, 0.0  ;;  %v367_v27 = vsub.f32 %v331_v8, %v1897_v13  ;;  %v368_v28 = vsub.f32 %v332_v9, %v1897_v13  ;;  %v369_v33 = vsub.f32 %v333_v16, %v1897_v13  ;;  %s1079_s11 = sshll.u32 %s879_s13, 7  ;;  %s1403_s13 = scalar_lea.vmem %s1402_s18, 8192 }
  0xc9   : > { %1127 = vmatprep.mubr.bf16.mxu0 %v479_v25  ;;  %v436_v25 = vadd.f32 %v1904_v18, %v400_v12  ;;  %1140 = vmatmul.mubr.bf16.vlgmr.msra.gmra.mrb[0].mxu1 %v486_v19  ;;  %v487_v29 = vpack.c.bf16 %v466_v20, %v465_v11  ;;  %v402_v31 = vmul.f32 %v1899_v14, %v366_v21  ;;  %v458_v50 = vmax.f32 %v1986_v45, 0.0  ;;  %s2136_s29 = scalar_lea.hbm %s2349_s12, %s1079_s11  ;;  %p1405_p12 = scmp.lt.s32.totalorder %s1403_s13, %s1397_s26 }
  0xca   : > { %v437_v32 = vadd.f32 %v1904_v18, %v401_v23  ;;  %v403_v39 = vmul.f32 %v1899_v14, %v367_v27  ;;  %v404_v41 = vmul.f32 %v1899_v14, %v368_v28  ;;  %v370_v42 = vsub.f32 %v334_v24, %v1897_v13 }
  0xcb   : > { %v468_v38 = vmax.f32 %v436_v25, 0.0  ;;  %1143 = vmatprep.mubr.bf16.mxu1 %v487_v29  ;;  %v438_v47 = vadd.f32 %v1904_v18, %v402_v31  ;;  %v405_v49 = vmul.f32 %v1899_v14, %v369_v33  ;;  %v371_v53 = vsub.f32 %v335_v34, %v1897_v13  ;;  %p1406_p1 = por %p1405_p12, %p1404_p3 }
  0xcc   : > { %v469_v48 = vmax.f32 %v437_v32, 0.0  ;;  %v406_v52 = vmul.f32 %v1899_v14, %v370_v42  ;;  %v439_v56 = vadd.f32 %v1904_v18, %v403_v39  ;;  %v440_v36 = vadd.f32 %v1904_v18, %v404_v41 }
  0xcd   : > { %v488_v51 = vpack.c.bf16 %v468_v38, %v467_v26  ;;  %v470_v55 = vmax.f32 %v438_v47, 0.0  ;;  %v372_v57 = vsub.f32 %v336_v43, %v1897_v13  ;;  %v441_v58 = vadd.f32 %v1904_v18, %v405_v49  ;;  %p1407_p10 = pnand %p1406_p1, %p1400_p4 }
  0xce   : > { %v442_v59 = vadd.f32 %v1904_v18, %v406_v52  ;;  %v482_v45 = vpack.c.bf16 %v456_v40, %v455_v35  ;;  %v483_v60 = vpack.c.bf16 %v458_v50, %v457_v44  ;;  %v428_v61 = vadd.f32 %v1904_v18, %v1989_v46 }
  0xcf   : > { %v471_v62 = vmax.f32 %v439_v56, 0.0  ;;  %v472_v13 = vmax.f32 %v440_v36, 0.0  ;;  %v407_v63 = vmul.f32 %v1899_v14, %v371_v53  ;;  %v408_v0 = vmul.f32 %v1899_v14, %v372_v57 }
  0xd0   : > { %1128 = vmatmul.mubr.bf16.gmra.mrb[4].mxu0 %v1967_v30  ;;  %v489_v30 = vpack.c.bf16 %v470_v55, %v469_v48  ;;  %v473_v1 = vmax.f32 %v441_v58, 0.0  ;;  %v474_v17 = vmax.f32 %v442_v59, 0.0  ;;  %v460_v35 = vmax.f32 %v428_v61, 0.0 }
  0xd1   : > { %1131 = vmatprep.mubr.bf16.mxu0 %v481_v54  ;;  %v427_v54 = vadd.f32 %v1904_v18, %v1976_v37  ;;  %1144 = vmatmul.mubr.bf16.gmra.mrb[4].mxu1 %v488_v51  ;;  %v490_v37 = vpack.c.bf16 %v472_v13, %v471_v62  ;;  %v443_v40 = vadd.f32 %v1904_v18, %v407_v63 }
  0xd2   : > { %1147 = vmatprep.mubr.bf16.mxu1 %v489_v30  ;;  %v444_v46 = vadd.f32 %v1904_v18, %v408_v0  ;;  %v491_v2 = vpack.c.bf16 %v474_v17, %v473_v1 }
  0xd3   : > { %v459_v22 = vmax.f32 %v427_v54, 0.0  ;;  %v475_v14 = vmax.f32 %v443_v40, 0.0 }
  0xd4   : > { %v476_v4 = vmax.f32 %v444_v46, 0.0 }
  0xd5   : > { %v484_v3 = vpack.c.bf16 %v460_v35, %v459_v22 }
  0xd6   : > { %v492_v5 = vpack.c.bf16 %v476_v4, %v475_v14 }
  0xd8   : > { %1132 = vmatmul.mubr.bf16.gmra.mrb[8].mxu0 %v482_v45 }
  0xd9   : > { %1135 = vmatprep.mubr.bf16.mxu0 %v483_v60  ;;  %1148 = vmatmul.mubr.bf16.gmra.mrb[8].mxu1 %v490_v37 }
  0xda   : > { %1151 = vmatprep.mubr.bf16.mxu1 %v491_v2 }
  0xe0   : > { %1136 = vmatmul.mubr.bf16.gmra.mrb[12].mxu0 %v484_v3 }
  0xe1   : > { %1152 = vmatmul.mubr.bf16.gmra.mrb[12].mxu1 %v492_v5 }
 0x19b   : > { %v1125_v6 = vpop.f32.mrb[0].mxu0 }
 0x19c   : > { %720 = vst [vmem:[%s1888_s2 + $0x10] sm:$0xff] %v1125_v6  ;;  %v591_v7 = vpop.f32.mrb[1].mxu0  ;;  %v2058_v12 = vpop.f32.mrb[0].mxu1  ;;  %v789_v15 = vmul.f32 %v1125_v6, %v1125_v6 }
 0x19d   : > { %718 = vst [vmem:[%s1888_s2] sm:$0xff] %v591_v7  ;;  %v1126_v8 = vpop.f32.mrb[2].mxu0  ;;  %v787_v18 = vmul.f32 %v591_v7, %v591_v7  ;;  %736 = vst [vmem:[%s1888_s2 + $0x90] sm:$0xff] %v2058_v12  ;;  %v2062_v20 = vpop.f32.mrb[1].mxu1 }
 0x19e   : > { %721 = vst [vmem:[%s1888_s2 + $0x18] sm:$0xff] %v1126_v8  ;;  %v594_v9 = vpop.f32.mrb[3].mxu0  ;;  %734 = vst [vmem:[%s1888_s2 + $0x80] sm:$0xff] %v2062_v20  ;;  %v2066_v21 = vpop.f32.mrb[2].mxu1  ;;  %v790_v23 = vmul.f32 %v1126_v8, %v1126_v8 }
 0x19f   : > { %719 = vst [vmem:[%s1888_s2 + $0x8] sm:$0xff] %v594_v9  ;;  %v750_v10 = vadd.f32 %v594_v9, %v591_v7  ;;  %v788_v11 = vmul.f32 %v594_v9, %v594_v9  ;;  %737 = vst [vmem:[%s1888_s2 + $0x98] sm:$0xff] %v2066_v21  ;;  %v2070_v27 = vpop.f32.mrb[3].mxu1 }
 0x1a0   : > { %735 = vst [vmem:[%s1888_s2 + $0x88] sm:$0xff] %v2070_v27 }
 0x1a1   : > { %v751_v16 = vadd.f32 %v1125_v6, %v750_v10  ;;  %v819_v19 = vadd.f32 %v788_v11, %v787_v18 }
 0x1a3   : > { %v820_v24 = vadd.f32 %v819_v19, %v789_v15  ;;  %v1129_v25 = vpop.f32.mrb[4].mxu0  ;;  %v752_v26 = vadd.f32 %v1126_v8, %v751_v16 }
 0x1a4   : > { %724 = vst [vmem:[%s1888_s2 + $0x30] sm:$0xff] %v1129_v25  ;;  %v607_v28 = vpop.f32.mrb[5].mxu0  ;;  %v2078_v42 = vpop.f32.mrb[4].mxu1  ;;  %v793_v43 = vmul.f32 %v1129_v25, %v1129_v25 }
 0x1a5   : > { %722 = vst [vmem:[%s1888_s2 + $0x20] sm:$0xff] %v607_v28  ;;  %v753_v29 = vadd.f32 %v752_v26, %v607_v28  ;;  %v791_v31 = vmul.f32 %v607_v28, %v607_v28  ;;  %v821_v32 = vadd.f32 %v820_v24, %v790_v23  ;;  %v1130_v33 = vpop.f32.mrb[6].mxu0  ;;  %740 = vst [vmem:[%s1888_s2 + $0xb0] sm:$0xff] %v2078_v42  ;;  %v2082_v48 = vpop.f32.mrb[5].mxu1 }
 0x1a6   : > { %725 = vst [vmem:[%s1888_s2 + $0x38] sm:$0xff] %v1130_v33  ;;  %v610_v34 = vpop.f32.mrb[7].mxu0  ;;  %738 = vst [vmem:[%s1888_s2 + $0xa0] sm:$0xff] %v2082_v48  ;;  %v2086_v49 = vpop.f32.mrb[6].mxu1  ;;  %v794_v50 = vmul.f32 %v1130_v33, %v1130_v33 }
 0x1a7   : > { %v822_v38 = vadd.f32 %v821_v32, %v791_v31  ;;  %723 = vst [vmem:[%s1888_s2 + $0x28] sm:$0xff] %v610_v34  ;;  %v754_v39 = vadd.f32 %v753_v29, %v610_v34  ;;  %v792_v41 = vmul.f32 %v610_v34, %v610_v34  ;;  %741 = vst [vmem:[%s1888_s2 + $0xb8] sm:$0xff] %v2086_v49  ;;  %v2090_v55 = vpop.f32.mrb[7].mxu1 }
 0x1a8   : > { %739 = vst [vmem:[%s1888_s2 + $0xa8] sm:$0xff] %v2090_v55 }
 0x1a9   : > { %v755_v44 = vadd.f32 %v1129_v25, %v754_v39  ;;  %v823_v47 = vadd.f32 %v822_v38, %v792_v41  ;;  %v803_v25 = vmul.f32 %v2062_v20, %v2062_v20 }
 0x1ab   : > { %v824_v51 = vadd.f32 %v823_v47, %v793_v43  ;;  %v1133_v52 = vpop.f32.mrb[8].mxu0  ;;  %v756_v53 = vadd.f32 %v1130_v33, %v755_v44 }
 0x1ac   : > { %728 = vst [vmem:[%s1888_s2 + $0x50] sm:$0xff] %v1133_v52  ;;  %v623_v56 = vpop.f32.mrb[9].mxu0  ;;  %v2098_v61 = vpop.f32.mrb[8].mxu1  ;;  %v797_v62 = vmul.f32 %v1133_v52, %v1133_v52 }
 0x1ad   : > { %726 = vst [vmem:[%s1888_s2 + $0x40] sm:$0xff] %v623_v56  ;;  %v757_v36 = vadd.f32 %v756_v53, %v623_v56  ;;  %v795_v57 = vmul.f32 %v623_v56, %v623_v56  ;;  %v825_v58 = vadd.f32 %v824_v51, %v794_v50  ;;  %v1134_v59 = vpop.f32.mrb[10].mxu0  ;;  %744 = vst [vmem:[%s1888_s2 + $0xd0] sm:$0xff] %v2098_v61  ;;  %v2102_v0 = vpop.f32.mrb[9].mxu1 }
 0x1ae   : > { %729 = vst [vmem:[%s1888_s2 + $0x58] sm:$0xff] %v1134_v59  ;;  %v626_v30 = vpop.f32.mrb[11].mxu0  ;;  %742 = vst [vmem:[%s1888_s2 + $0xc0] sm:$0xff] %v2102_v0  ;;  %v2108_v1 = vpop.f32.mrb[10].mxu1  ;;  %v798_v17 = vmul.f32 %v1134_v59, %v1134_v59 }
 0x1af   : > { %v826_v45 = vadd.f32 %v825_v58, %v795_v57  ;;  %727 = vst [vmem:[%s1888_s2 + $0x48] sm:$0xff] %v626_v30  ;;  %v758_v60 = vadd.f32 %v757_v36, %v626_v30  ;;  %v796_v54 = vmul.f32 %v626_v30, %v626_v30  ;;  %745 = vst [vmem:[%s1888_s2 + $0xd8] sm:$0xff] %v2108_v1  ;;  %v2112_v40 = vpop.f32.mrb[11].mxu1 }
 0x1b0   : > { %743 = vst [vmem:[%s1888_s2 + $0xc8] sm:$0xff] %v2112_v40 }
 0x1b1   : > { %v759_v13 = vadd.f32 %v1133_v52, %v758_v60  ;;  %v827_v63 = vadd.f32 %v826_v45, %v796_v54 }
 0x1b3   : > { %v828_v22 = vadd.f32 %v827_v63, %v797_v62  ;;  %v1137_v35 = vpop.f32.mrb[12].mxu0  ;;  %v760_v37 = vadd.f32 %v1134_v59, %v759_v13 }
 0x1b4   : > { %732 = vst [vmem:[%s1888_s2 + $0x70] sm:$0xff] %v1137_v35  ;;  %v639_v46 = vpop.f32.mrb[13].mxu0  ;;  %v2121_v9 = vpop.f32.mrb[12].mxu1  ;;  %v801_v18 = vmul.f32 %v1137_v35, %v1137_v35 }
 0x1b5   : > { %730 = vst [vmem:[%s1888_s2 + $0x60] sm:$0xff] %v639_v46  ;;  %v761_v2 = vadd.f32 %v760_v37, %v639_v46  ;;  %v799_v3 = vmul.f32 %v639_v46, %v639_v46  ;;  %v829_v14 = vadd.f32 %v828_v22, %v798_v17  ;;  %v1138_v4 = vpop.f32.mrb[14].mxu0  ;;  %748 = vst [vmem:[%s1888_s2 + $0xf0] sm:$0xff] %v2121_v9  ;;  %v2125_v15 = vpop.f32.mrb[13].mxu1 }
 0x1b6   : > { %733 = vst [vmem:[%s1888_s2 + $0x78] sm:$0xff] %v1138_v4  ;;  %v642_v5 = vpop.f32.mrb[15].mxu0  ;;  %746 = vst [vmem:[%s1888_s2 + $0xe0] sm:$0xff] %v2125_v15  ;;  %v2131_v16 = vpop.f32.mrb[14].mxu1  ;;  %v802_v19 = vmul.f32 %v1138_v4, %v1138_v4 }
 0x1b7   : > { %v830_v6 = vadd.f32 %v829_v14, %v799_v3  ;;  %731 = vst [vmem:[%s1888_s2 + $0x68] sm:$0xff] %v642_v5  ;;  %v762_v7 = vadd.f32 %v761_v2, %v642_v5  ;;  %v800_v8 = vmul.f32 %v642_v5, %v642_v5  ;;  %749 = vst [vmem:[%s1888_s2 + $0xf8] sm:$0xff] %v2131_v16  ;;  %v2142_v26 = vpop.f32.mrb[15].mxu1 }
 0x1b8   : > { %747 = vst [vmem:[%s1888_s2 + $0xe8] sm:$0xff] %v2142_v26 }
 0x1b9   : > { %v763_v10 = vadd.f32 %v1137_v35, %v762_v7  ;;  %v831_v11 = vadd.f32 %v830_v6, %v800_v8 }
 0x1bb   : > { %v832_v23 = vadd.f32 %v831_v11, %v801_v18  ;;  %v764_v24 = vadd.f32 %v1138_v4, %v763_v10 }
 0x1bd   : > { %v765_v28 = vadd.f32 %v764_v24, %v2062_v20  ;;  %v833_v29 = vadd.f32 %v832_v23, %v802_v19 }
 0x1be   : > { %1410 = shalt.err (!%p1407_p10)
}
 0x1bf   : > { %s1411_s2 = scalar_lea.hbm %s2136_s29, 4096  ;;  %s1415_s28 = scalar_lea.hbm %s2349_s12, 32768 }
 0x1c0   : > { %p1412_p5 = scmp.ne.s32.totalorder %s2136_s29, %s1411_s2  ;;  %p1416_p9 = scmp.lt.u32.totalorder %s2136_s29, %s2349_s12 }
 0x1c1   : > { %p1417_p6 = scmp.lt.u32.totalorder %s1415_s28, %s1411_s2  ;;  %p1419_p13 = scmp.lt.u32.totalorder %s1411_s2, %s2136_s29 }
 0x1c2   : > { %p1413_p2 = pnand %p1412_p5, %p2350_p7 }
 0x1c3   : > { %p1418_p11 = por %p1417_p6, %p1416_p9 }
 0x1c4   : > { %p1414_p8 = pneg %p1413_p2 }
 0x1c5   : > { %p1420_p0 = por %p1419_p13, %p1418_p11 }
 0x1c7   : > { %p1421_p4 = pnand %p1420_p0, %p1414_p8 }
 0x1c9   : > { %1424 = shalt.err (!%p1421_p4)
}
 0x1ca   : > { %s1570_s26 = smov 128   ;;  %s1571_s13 = smov 8   ;;  %v834_v20 = vadd.f32 %v833_v29, %v803_v25  ;;  %v766_v31 = vadd.f32 %v765_v28, %v2070_v27  ;;  %v804_v32 = vmul.f32 %v2070_v27, %v2070_v27  ;;  %v805_v33 = vmul.f32 %v2058_v12, %v2058_v12  ;;  %v858_v23 = vld [vmem:[%s1890_s22] sm:$0x3] }
 0x1cb   : > { %1179 = dma.vmem_to_hbm [thread:$0]  (%p2350_p7), %s2127_s14, 4096, %s2136_s29, %s862_s8, %s1570_s26, %s1570_s26, %s1571_s13   ;;  %v806_v39 = vmul.f32 %v2066_v21, %v2066_v21  ;;  %v807_v44 = vmul.f32 %v2082_v48, %v2082_v48  ;;  %v808_v52 = vmul.f32 %v2090_v55, %v2090_v55  ;;  %v812_v45 = vmul.f32 %v2112_v40, %v2112_v40 }
 0x1cc   : > { %v767_v34 = vadd.f32 %v2058_v12, %v766_v31  ;;  %v835_v38 = vadd.f32 %v834_v20, %v804_v32  ;;  %v809_v12 = vmul.f32 %v2078_v42, %v2078_v42  ;;  %v815_v63 = vmul.f32 %v2125_v15, %v2125_v15  ;;  %s1080_s4 = sshll.u32 %s2347_s6, 5  ;;  %s898_s14 = sshll.u32 %s1890_s22, 4  ;;  %s2224_s14 = int_to_ptr.vmem [resolvable:$true] %s898_s14 }
 0x1cd   : > { %v816_v37 = vmul.f32 %v2142_v26, %v2142_v26  ;;  %vm856_vm0 = vcmask 1040384   ;;  %s2351_s8 = sld [smem:[#allocation25_spill]]  ;;  %s867_s11 = scalar_lea.sflag [#allocation10], %s1874_s7 }
 0x1ce   : > { %v836_v41 = vadd.f32 %v835_v38, %v805_v33  ;;  %v768_v43 = vadd.f32 %v2066_v21, %v767_v34  ;;  %v810_v21 = vmul.f32 %v2086_v49, %v2086_v49  ;;  %s1425_s10 = scalar_lea.vmem %s2224_s14, 32  ;;  %p2352_p3 = scmp.ne.s32.totalorder %s2336_s27, 0 }
 0x1cf   : > { %p1426_p7 = scmp.ne.s32.totalorder %s2224_s14, %s1425_s10  ;;  %s1572_s6 = smov [#allocation9]  }
 0x1d0   : > { %v769_v47 = vadd.f32 %v768_v43, %v2082_v48  ;;  %v837_v50 = vadd.f32 %v836_v41, %v806_v39  ;;  %v811_v48 = vmul.f32 %v2102_v0, %v2102_v0  ;;  %s1429_s28 = sshll.u32 %s1572_s6, 4  ;;  %s1430_s28 = int_to_ptr.vmem [resolvable:$false] %s1429_s28 }
 0x1d1   : > { %p1427_p12 = pnand %p1426_p7, %p2352_p3  ;;  %s1431_s9 = scalar_lea.vmem %s1430_s28, 64 }
 0x1d2   : > { %v838_v51 = vadd.f32 %v837_v50, %v807_v44  ;;  %v770_v27 = vadd.f32 %v769_v47, %v2090_v55  ;;  %p1432_p10 = scmp.lt.s32.totalorder %s2224_s14, %s1430_s28  ;;  %p1433_p5 = scmp.lt.s32.totalorder %s1431_s9, %s1425_s10 }
 0x1d3   : > { %s2222_s2 = scalar_lea.hbm %s2351_s8, %s1080_s4  ;;  %p1428_p1 = pneg %p1427_p12 }
 0x1d4   : > { %v771_v53 = vadd.f32 %v2078_v42, %v770_v27  ;;  %v839_v56 = vadd.f32 %v838_v51, %v808_v52  ;;  %v813_v42 = vmul.f32 %v2098_v61, %v2098_v61  ;;  %p1434_p2 = por %p1433_p5, %p1432_p10 }
 0x1d6   : > { %v840_v36 = vadd.f32 %v839_v56, %v809_v12  ;;  %v772_v57 = vadd.f32 %v2086_v49, %v771_v53  ;;  %v814_v49 = vmul.f32 %v2108_v1, %v2108_v1  ;;  %p1435_p8 = pnand %p1434_p2, %p1428_p1 }
 0x1d8   : > { %v773_v58 = vadd.f32 %v772_v57, %v2102_v0  ;;  %v841_v59 = vadd.f32 %v840_v36, %v810_v21 }
 0x1da   : > { %v842_v30 = vadd.f32 %v841_v59, %v811_v48  ;;  %v774_v55 = vadd.f32 %v773_v58, %v2112_v40 }
 0x1dc   : > { %v775_v60 = vadd.f32 %v2098_v61, %v774_v55  ;;  %v843_v54 = vadd.f32 %v842_v30, %v812_v45  ;;  %v817_v61 = vmul.f32 %v2121_v9, %v2121_v9 }
 0x1de   : > { %v844_v62 = vadd.f32 %v843_v54, %v813_v42  ;;  %v776_v13 = vadd.f32 %v2108_v1, %v775_v60  ;;  %v818_v1 = vmul.f32 %v2131_v16, %v2131_v16 }
 0x1e0   : > { %v777_v0 = vadd.f32 %v776_v13, %v2125_v15  ;;  %v845_v17 = vadd.f32 %v844_v62, %v814_v49 }
 0x1e2   : > { %v846_v22 = vadd.f32 %v845_v17, %v815_v63  ;;  %v778_v35 = vadd.f32 %v777_v0, %v2142_v26 }
 0x1e4   : > { %v779_v40 = vadd.f32 %v2121_v9, %v778_v35  ;;  %v847_v46 = vadd.f32 %v846_v22, %v816_v37 }
 0x1e6   : > { %v780_v2 = vadd.f32 %v2131_v16, %v779_v40  ;;  %v848_v3 = vadd.f32 %v847_v46, %v817_v61 }
 0x1e8   : > { %v781_v14 = vrot.slane %v780_v2, 4  ;;  %v849_v4 = vadd.f32 %v848_v3, %v818_v1 }
 0x1ea   : > { %v782_v5 = vadd.f32 %v781_v14, %v780_v2  ;;  %v850_v6 = vrot.slane %v849_v4, 4 }
 0x1ec   : > { %v783_v7 = vrot.slane %v782_v5, 2  ;;  %v851_v8 = vadd.f32 %v850_v6, %v849_v4 }
 0x1ee   : > { %v784_v18 = vadd.f32 %v783_v7, %v782_v5  ;;  %v852_v9 = vrot.slane %v851_v8, 2 }
 0x1f0   : > { %v785_v10 = vrot.slane %v784_v18, 1  ;;  %v853_v11 = vadd.f32 %v852_v9, %v851_v8 }
 0x1f2   : > { %v854_v15 = vrot.slane %v853_v11, 1  ;;  %v786_v16 = vadd.f32 %v785_v10, %v784_v18 }
 0x1f4   : > { %v855_v19 = vadd.f32 %v854_v15, %v853_v11 }
 0x1f6   : > { %v857_v24 = vsel %vm856_vm0, %v786_v16, %v855_v19 }
 0x1f7   : > { %v859_v25 = vadd.f32 %v858_v23, %v857_v24 }
 0x1f9   : > { %860 = vst [vmem:[%s1890_s22] sm:$0x3] %v859_v25 }
 0x1fa   : > { %1438 = shalt.err (!%p1435_p8)
}
 0x1fb   : > { %s1439_s7 = scalar_lea.hbm %s2222_s2, 32  ;;  %s1443_s26 = scalar_lea.hbm %s2351_s8, 64 }
 0x1fc   : > { %p1440_p9 = scmp.ne.s32.totalorder %s2222_s2, %s1439_s7  ;;  %p1444_p13 = scmp.lt.u32.totalorder %s2222_s2, %s2351_s8 }
 0x1fd   : > { %p1445_p0 = scmp.lt.u32.totalorder %s1443_s26, %s1439_s7  ;;  %p1447_p7 = scmp.lt.u32.totalorder %s1439_s7, %s2222_s2 }
 0x1fe   : > { %p1441_p6 = pnand %p1440_p9, %p2352_p3 }
 0x1ff   : > { %p1446_p4 = por %p1445_p0, %p1444_p13 }
 0x200   : > { %p1442_p11 = pneg %p1441_p6 }
 0x201   : > { %p1448_p12 = por %p1447_p7, %p1446_p4 }
 0x203   : > { %p1449_p1 = pnand %p1448_p12, %p1442_p11 }
 0x205   : > { %1452 = shalt.err (!%p1449_p1)
}
 0x206   : > { %1180 = dma.vmem_to_hbm [thread:$0]  (%p2352_p3), %s2224_s14, 32, %s2222_s2, %s867_s11  }
 0x207 PF: > { %s2353_s5 = sld [smem:[#allocation16_spill]]  ;;  %s2354_s29 = sld [smem:[#allocation19_spill]] }
 0x208   : > { %p1204_p10 = scmp.ge.s32.totalorder %s1559_s25, 2 }
 0x20d   : > { %s910_s10 = sand.u32 1, %s2353_s5   ;;  %p2355_p5 = scmp.ne.s32.totalorder %s2354_s29, 0 }
 0x20e   : > { %s911_s6 = scalar_lea.sflag [#allocation4], %s910_s10 }
 0x20f   : > { %p1195_p2 = pnand %p1204_p10, %p2355_p5 }
 0x211   : > { %1510 = dma.done.wait (!%p1195_p2), %s911_s6, 4096  }
 0x212   : > { %1512 = vsyncadd (!%p1195_p2), %s911_s6, 4294963200  ;;  %s919_s28 = sand.u32 1, %s1519_s15   ;;  %p2356_p8 = scmp.ne.s32.totalorder %s2338_s3, 0 }
 0x213   : > { %s920_s27 = scalar_lea.sflag [#allocation10], %s919_s28 }
 0x214   : > { %p1198_p9 = pnand %p1204_p10, %p2356_p8 }
 0x216   : > { %1514 = dma.done.wait (!%p1198_p9), %s920_s27, 32  }
 0x217   : > { %1516 = vsyncadd (!%p1198_p9), %s920_s27, 4294967264  ;;  %s27_s25 = sadd.s32 1, %s1559_s25   ;;  %s2357_s14 = sld [smem:[#allocation20_spill]] }
 0x218   : > { %p24_p3 = scmp.ge.s32.totalorder %s27_s25, 10   ;;  %s2358_s2 = sld [smem:[#allocation22_spill]] }
 0x219   : > { %s2359_s15 = smov %s1523_s16  ;;  %s2360_s16 = smov %s1527_s17 }
 0x21a   : > { %s2361_s17 = smov %s1792_s21  ;;  %s2362_s18 = smov %s1535_s19 }
 0x21b   : > { %s2363_s19 = smov %s1539_s20  ;;  %s2364_s20 = smov %s1743_s30 }
 0x21c   : > { %s2365_s21 = smov %s1551_s23  ;;  %s2366_s22 = smov %s1555_s24 }
 0x21d   : > { %s2367_s23 = smov %s2357_s14  ;;  %26 = sbr.rel (!%p24_p3) target bundleno = 17 (0x11), region = 115 }
 0x21e   : > { %s2368_s24 = smov %s2358_s2 }
 0x224   :  { %925 = vsyncpa [#allocation3], 1 }
 0x225   :  { %927 = vsyncpa [#allocation3 + $0x1], 1 }
 0x226   :  { %928 = vsyncpa [#allocation6], 1 }
 0x227   :  { %930 = vsyncpa [#allocation6 + $0x1], 1 }
 0x228   :  { %931 = vsyncpa [#allocation4], 1 }
 0x229   :  { %933 = vsyncpa [#allocation4 + $0x1], 1 }
 0x22a   :  { %934 = vsyncpa [#allocation10], 1 }
 0x22b   :  { %936 = vsyncpa [#allocation10 + $0x1], 1 }

// kernel: pointcn_forward.7
= control target key start
LH: loop header
LB: loop body
LE: loop exit
PB: predicated region body
PF: predicated region fallthrough
CT: control target
= control target key end

     0   :  { %s3675_s0 = inlined_call_operand.hbm [shape: f32[2,1024,128], index: 0, kind: input, shape index: {}]   ;;  %s3676_s1 = inlined_call_operand.hbm [shape: f32[2,3,128], index: 1, kind: input, shape index: {}]   ;;  %s3677_s2 = inlined_call_operand.hbm [shape: bf16[128,128], index: 2, kind: input, shape index: {}]   ;;  %s3678_s3 = inlined_call_operand.hbm [shape: f32[2,1024,128], index: 3, kind: input, shape index: {}]   ;;  %s3679_s4 = inlined_call_operand.hbm [shape: bf16[128,128], index: 4, kind: input, shape index: {}]   ;;  %s3680_s5 = inlined_call_operand.hbm [shape: f32[3,128], index: 5, kind: input, shape index: {}]   ;;  %s3681_s6 = inlined_call_operand.hbm [shape: f32[2,1024,128], index: 6, kind: output, shape index: {}]  }
   0x1   :  { %3699 = sst [smem:[#allocation30_spill]] %s3675_s0 }
   0x2   :  { %3700 = sst [smem:[#allocation31_spill]] %s3677_s2 }
   0x3   :  { %3701 = sst [smem:[#allocation32_spill]] %s3679_s4 }
   0x4   :  { %3702 = sst [smem:[#allocation33_spill]] %s3680_s5 }
   0x5   :  { %3703 = sst [smem:[#allocation34_spill]] %s3681_s6 }
   0x6   :  { %11 = vsyncpa [#allocation3], 0 }
   0x7   :  { %13 = vsyncpa [#allocation3 + $0x1], 0 }
   0x8   :  { %14 = vsyncpa [#allocation6], 0 }
   0x9   :  { %16 = vsyncpa [#allocation6 + $0x1], 0 }
   0xa   :  { %17 = vsyncpa [#allocation9], 0 }
   0xb   :  { %19 = vsyncpa [#allocation9 + $0x1], 0 }
   0xc   :  { %20 = vsyncpa [#allocation12], 0 }
   0xd   :  { %21 = vsyncpa [#allocation4], 0 }
   0xe   :  { %23 = vsyncpa [#allocation4 + $0x1], 0  ;;  %s2764_s21 = smov 0   ;;  %s2766_s22 = smov 0  }
   0xf   :  { %s2768_s23 = smov 0   ;;  %s2770_s24 = smov 0  }
  0x10   :  { %s2772_s25 = smov 0   ;;  %s2774_s26 = smov 0  }
  0x11   :  { %s2776_s27 = smov 0   ;;  %s2778_s28 = smov 0  }
  0x12   :  { %s2780_s29 = smov 0   ;;  %s2782_s30 = smov 0  }
  0x13   :  { %s2784_s7 = smov 0  }
  0x14 LB: > { %3704 = sst [smem:[#allocation21_spill]] %s2685_s24  ;;  %s2820_s8 = sadd.s32 4294967295, %s2713_s7   ;;  %s2713_s7 = sphi %s2784_s7, %s29_s7   ;;  %s2709_s30 = sphi %s2782_s30, %s3762_s30   ;;  %s2705_s29 = sphi %s2780_s29, %s3752_s29   ;;  %s2701_s28 = sphi %s2778_s28, %s3761_s28   ;;  %s2697_s27 = sphi %s2776_s27, %s3760_s27   ;;  %s2693_s26 = sphi %s2774_s26, %s3759_s26   ;;  %s2689_s25 = sphi %s2772_s25, %s3758_s25   ;;  %s2685_s24 = sphi %s2770_s24, %s3757_s24   ;;  %s2681_s23 = sphi %s2768_s23, %s3756_s23   ;;  %s2677_s22 = sphi %s2766_s22, %s3755_s22   ;;  %s2673_s21 = sphi %s2764_s21, %s3754_s21  }
  0x15   : > { %3705 = sst [smem:[#allocation22_spill]] %s2697_s27  ;;  %s1844_s9 = sadd.s32 4294967294, %s2713_s7  }
  0x16   : > { %3706 = sst [smem:[#allocation23_spill]] %s2701_s28  ;;  %p63_p0 = scmp.ne.s32.totalorder %s2689_s25, %s2685_s24 }
  0x17   : > { %3707 = sst [smem:[#allocation24_spill]] %s2705_s29  ;;  %p3685_p1 = scmp.eq.s32.totalorder %s2820_s8, 0 }
  0x18   : > { %p212_p2 = scmp.eq.s32.totalorder %s1844_s9, 7  ;;  %p1845_p4 = scmp.ge.s32.totalorder %s2713_s7, 1 }
  0x19   : > { %p2828_p3 = por %p3685_p1, %p63_p0  ;;  %p219_p6 = scmp.lt.s32.totalorder %s2713_s7, 9 }
  0x1a   : > { %p2833_p5 = por %p212_p2, %p63_p0  ;;  %s2715_s13 = smov [#allocation7]  }
  0x1b   : > { %s3708_s10 = scalar_select %p2828_p3, 1, 0 }
  0x1c   : > { %s3710_s11 = scalar_select %p2833_p5, 1, 0 }
  0x1d   : > { %3709 = sst [smem:[#allocation25_spill]] %s3708_s10  ;;  %p2838_p7 = pnand %p1845_p4, %p219_p6 }
  0x1e   : > { %3711 = sst [smem:[#allocation26_spill]] %s3710_s11  ;;  %s231_s14 = sshll.u32 %s2715_s13, 4  ;;  %s2842_s14 = int_to_ptr.vmem [resolvable:$true] %s231_s14 }
  0x1f   : > { %s3712_s12 = scalar_select %p2838_p7, 1, 0 }
  0x20   : > { %p2121_p8 = pneg %p2838_p7  ;;  %s2716_s16 = smov [#allocation10]  }
  0x21   : > { %3713 = sst [smem:[#allocation27_spill]] %s3712_s12  ;;  %s244_s17 = sshll.u32 %s2716_s16, 4  ;;  %s2852_s17 = int_to_ptr.vmem [resolvable:$true] %s244_s17 }
  0x22   : > { %p2848_p9 = pnand %p2121_p8, %p3685_p1  ;;  %s2717_s18 = smov [#allocation11]  }
  0x23   : > { %s2854_s19 = sshll.u32 %s2717_s18, 4  ;;  %s3715_s2 = sld [smem:[#allocation31_spill]]  ;;  %s259_s19 = int_to_ptr.vmem [resolvable:$true] %s2854_s19 }
  0x24   : > { %p2864_p11 = pneg %p2848_p9 }
  0x29   : > { %s2397_s13 = scalar_lea.hbm %s3715_s2, 1024 }
  0x2a   : > { %p2398_p10 = scmp.ne.s32.totalorder %s3715_s2, %s2397_s13  ;;  %p2404_p0 = scmp.lt.u32.totalorder %s2397_s13, %s3715_s2 }
  0x2c   : > { %p2400_p12 = pnand %p2864_p11, %p2398_p10 }
  0x2e   : > { %p2401_p13 = pneg %p2400_p12 }
  0x30   : > { %p2406_p2 = pnand %p2404_p0, %p2401_p13 }
  0x32   : > { %2409 = shalt.err (!%p2406_p2)
}
  0x33   : > { %s2410_s24 = scalar_lea.vmem %s2842_s14, 1024  ;;  %p2418_p1 = scmp.lt.s32.totalorder %s2842_s14, %s2842_s14 }
  0x34   : > { %p2411_p4 = scmp.ne.s32.totalorder %s2842_s14, %s2410_s24  ;;  %p2419_p5 = scmp.lt.s32.totalorder %s2410_s24, %s2410_s24 }
  0x36   : > { %p2413_p6 = pnand %p2411_p4, %p2864_p11  ;;  %p2420_p10 = por %p2419_p5, %p2418_p1 }
  0x38   : > { %p2414_p8 = pneg %p2413_p6 }
  0x3a   : > { %p2421_p12 = pnand %p2420_p10, %p2414_p8 }
  0x3c   : > { %2424 = shalt.err (!%p2421_p12)
}
  0x3d   : > { %s2718_s11 = smov 64   ;;  %s2719_s20 = smov 4  }
  0x3e   : > { %2124 = dma.hbm_to_vmem [thread:$0]  (!%p2848_p9), %s3715_s2, 1024, %s2842_s14, [#allocation6], %s2718_s11, %s2718_s11, %s2719_s20  }
  0x3f   : > { %s3717_s4 = sld [smem:[#allocation32_spill]] }
  0x45   : > { %s2425_s28 = scalar_lea.hbm %s3717_s4, 1024 }
  0x46   : > { %p2426_p1 = scmp.ne.s32.totalorder %s3717_s4, %s2425_s28  ;;  %p2432_p0 = scmp.lt.u32.totalorder %s2425_s28, %s3717_s4 }
  0x48   : > { %p2428_p5 = pnand %p2426_p1, %p2864_p11 }
  0x4a   : > { %p2429_p13 = pneg %p2428_p5 }
  0x4c   : > { %p2434_p2 = pnand %p2432_p0, %p2429_p13 }
  0x4e   : > { %2437 = shalt.err (!%p2434_p2)
}
  0x4f   : > { %s2438_s14 = scalar_lea.vmem %s2852_s17, 1024  ;;  %p2446_p10 = scmp.lt.s32.totalorder %s2852_s17, %s2852_s17 }
  0x50   : > { %p2439_p4 = scmp.ne.s32.totalorder %s2852_s17, %s2438_s14  ;;  %p2447_p12 = scmp.lt.s32.totalorder %s2438_s14, %s2438_s14 }
  0x52   : > { %p2441_p6 = pnand %p2439_p4, %p2864_p11  ;;  %p2448_p1 = por %p2447_p12, %p2446_p10 }
  0x54   : > { %p2442_p8 = pneg %p2441_p6 }
  0x56   : > { %p2449_p5 = pnand %p2448_p1, %p2442_p8 }
  0x58   : > { %2452 = shalt.err (!%p2449_p5)
}
  0x59   : > { %2127 = dma.hbm_to_vmem [thread:$0]  (!%p2848_p9), %s3717_s4, 1024, %s2852_s17, [#allocation9], %s2718_s11, %s2718_s11, %s2719_s20  }
  0x5a   : > { %s3718_s5 = sld [smem:[#allocation33_spill]] }
  0x60   : > { %s2453_s9 = scalar_lea.hbm %s3718_s5, 64 }
  0x61   : > { %p2454_p13 = scmp.ne.s32.totalorder %s3718_s5, %s2453_s9  ;;  %p2460_p4 = scmp.lt.u32.totalorder %s2453_s9, %s3718_s5 }
  0x63   : > { %p2456_p0 = pnand %p2454_p13, %p2864_p11 }
  0x65   : > { %p2457_p2 = pneg %p2456_p0 }
  0x67   : > { %p2462_p6 = pnand %p2460_p4, %p2457_p2 }
  0x69   : > { %2465 = shalt.err (!%p2462_p6)
}
  0x6a   : > { %s2466_s14 = scalar_lea.vmem %s259_s19, 64  ;;  %p2474_p1 = scmp.lt.s32.totalorder %s259_s19, %s259_s19 }
  0x6b   : > { %p2467_p8 = scmp.ne.s32.totalorder %s259_s19, %s2466_s14  ;;  %p2475_p5 = scmp.lt.s32.totalorder %s2466_s14, %s2466_s14 }
  0x6d   : > { %p2469_p10 = pnand %p2467_p8, %p2864_p11  ;;  %p2476_p3 = por %p2475_p5, %p2474_p1 }
  0x6f   : > { %p2470_p12 = pneg %p2469_p10 }
  0x71   : > { %p2477_p7 = pnand %p2476_p3, %p2470_p12 }
  0x73   : > { %2480 = shalt.err (!%p2477_p7)
}
  0x74   : > { %2130 = dma.hbm_to_vmem [thread:$0]  (!%p2848_p9), %s3718_s5, 64, %s259_s19, [#allocation12]  }
  0x75   : > { %s38_s6 = sadd.s32 1, %s2705_s29  ;;  %s41_s15 = sadd.s32 1, %s2709_s30 }
  0x76   : > { %p39_p3 = scmp.ge.s32.totalorder %s38_s6, 4  ;;  %p206_p7 = scmp.eq.s32.totalorder %s2820_s8, 7 }
  0x77   : > { %p57_p11 = scmp.ne.s32.totalorder %s2693_s26, %s2689_s25  ;;  %s50_s20 = sadd.s32 1, %s2693_s26 }
  0x78   : > { %s3764_s6 = smov (%p39_p3, %s38_s6), 0  ;;  %s3766_s15 = smov (!%p39_p3, %s41_s15), %s2709_s30 }
  0x79   : > { %3719 = sst [smem:[#allocation28_spill]] %s3764_s6  ;;  %p3692_p13 = scmp.eq.s32.totalorder %s2713_s7, 0 }
  0x7a   : > { %p43_p0 = scmp.ge.s32.totalorder %s3766_s15, 2  ;;  %p2937_p2 = por %p206_p7, %p57_p11 }
  0x7b   : > { %s46_s19 = ssub.s32 %s2705_s29, %s3764_s6  ;;  %p2945_p9 = por %p3692_p13, %p57_p11 }
  0x7c   : > { %s3720_s27 = scalar_select %p2937_p2, 1, 0 }
  0x7d   : > { %s3768_s15 = smov (%p43_p0, %s3766_s15), 0  ;;  %p3691_p4 = scmp.lt.s32.totalorder %s2713_s7, 8 }
  0x7e   : > { %3722 = sst [smem:[#allocation29_spill]] %s3768_s15  ;;  %s269_s10 = sand.u32 1, %s2693_s26  }
  0x7f   : > { %s2955_s12 = ssub.s32 %s2709_s30, %s3768_s15  ;;  %s1851_s9 = sshll.u32 %s2705_s29, 5 }
  0x80   : > { %s47_s13 = sor.u32 %s46_s19, %s2955_s12  ;;  %s2959_s16 = sshll.u32 %s269_s10, 8 }
  0x81   : > { %p48_p6 = scmp.eq.s32.totalorder %s47_s13, 0  ;;  %s1852_s18 = sshll.u32 %s2709_s30, 7 }
  0x82   : > { %s2965_s14 = sadd.s32 %s1852_s18, %s1851_s9  ;;  %s273_s17 = scalar_lea.vmem [#allocation2], %s2959_s16 }
  0x83   : > { %s2963_s24 = scalar_select %p48_p6, %s2693_s26, %s50_s20  }
  0x84   : > { %s282_s11 = sshll.u32 %s273_s17, 4  ;;  %s1853_s2 = sshll.u32 %s2965_s14, 7  ;;  %s2969_s11 = int_to_ptr.vmem [resolvable:$true] %s282_s11 }
  0x85   : > { %s3723_s0 = sld [smem:[#allocation30_spill]]  ;;  %p2982_p8 = pnand %p3691_p4, %p2945_p9 }
  0x86   : > { %s2986_s9 = scalar_lea.sflag [#allocation3], %s269_s10 }
  0x87   : > { %p3696_p12 = pneg %p2982_p8 }
  0x8b   : > { %s2976_s19 = scalar_lea.hbm %s3723_s0, %s1853_s2  ;;  %s2486_s28 = scalar_lea.hbm %s3723_s0, 32768 }
  0x8c   : > { %s2481_s13 = scalar_lea.hbm %s2976_s19, 4096  ;;  %p2487_p3 = scmp.lt.u32.totalorder %s2976_s19, %s3723_s0 }
  0x8d   : > { %p2482_p10 = scmp.ne.s32.totalorder %s2976_s19, %s2481_s13  ;;  %p2488_p7 = scmp.lt.u32.totalorder %s2486_s28, %s2481_s13 }
  0x8e   : > { %p2490_p0 = scmp.lt.u32.totalorder %s2481_s13, %s2976_s19 }
  0x8f   : > { %p2484_p1 = pnand %p3696_p12, %p2482_p10  ;;  %p2489_p11 = por %p2488_p7, %p2487_p3 }
  0x91   : > { %p2485_p5 = pneg %p2484_p1  ;;  %p2491_p9 = por %p2490_p0, %p2489_p11 }
  0x93   : > { %p2492_p6 = pnand %p2491_p9, %p2485_p5 }
  0x95   : > { %2495 = shalt.err (!%p2492_p6)
}
  0x96   : > { %s2496_s10 = scalar_lea.vmem %s2969_s11, 4096  ;;  %s2720_s4 = smov [#allocation2]  }
  0x97   : > { %p2497_p10 = scmp.ne.s32.totalorder %s2969_s11, %s2496_s10  ;;  %s2501_s5 = sshll.u32 %s2720_s4, 4  ;;  %s2502_s5 = int_to_ptr.vmem [resolvable:$false] %s2501_s5 }
  0x98   : > { %s2503_s18 = scalar_lea.vmem %s2502_s5, 8192  ;;  %p2504_p13 = scmp.lt.s32.totalorder %s2969_s11, %s2502_s5 }
  0x99   : > { %p2499_p1 = pnand %p2497_p10, %p3696_p12  ;;  %p2505_p3 = scmp.lt.s32.totalorder %s2503_s18, %s2496_s10 }
  0x9b   : > { %p2500_p4 = pneg %p2499_p1  ;;  %p2506_p7 = por %p2505_p3, %p2504_p13 }
  0x9d   : > { %p2507_p11 = pnand %p2506_p7, %p2500_p4 }
  0x9f   : > { %2510 = shalt.err (!%p2507_p11)
}
  0xa0   : > { %s2721_s13 = smov 128   ;;  %s2722_s28 = smov 8  }
  0xa1   : > { %2134 = dma.hbm_to_vmem [thread:$0]  (!%p2982_p8), %s2976_s19, 4096, %s2969_s11, %s2986_s9, %s2721_s13, %s2721_s13, %s2722_s28  }
  0xa2   : > { %p74_p13 = scmp.eq.s32.totalorder %s2955_s12, 0  ;;  %s3023_s4 = scalar_lea.hbm %s3678_s3, %s1853_s2 }
  0xa3   : > { %s314_s5 = scalar_lea.vmem [#allocation8], %s2959_s16  ;;  %s76_s0 = sadd.s32 1, %s2681_s23 }
  0xa4   : > { %s323_s18 = sshll.u32 %s314_s5, 4  ;;  %p83_p4 = scmp.ne.s32.totalorder %s2681_s23, %s2677_s22  ;;  %s3058_s18 = int_to_ptr.vmem [resolvable:$true] %s323_s18 }
  0xa5   : > { %s3028_s15 = scalar_select %p74_p13, %s2681_s23, %s76_s0  }
  0xa6   : > { %p89_p5 = scmp.ne.s32.totalorder %s2677_s22, %s2673_s21  ;;  %s292_s6 = sand.u32 1, %s2713_s7  }
  0xa7   : > { %s294_s29 = sand.u32 1, %s2681_s23   ;;  %p3725_p0 = scmp.eq.s32.totalorder %s2713_s7, 0 }
  0xa8   : > { %p3726_p6 = scmp.eq.s32.totalorder %s2820_s8, 0  ;;  %s1854_s2 = sshll.u32 %s294_s29, 2 }
  0xa9   : > { %p85_p9 = por %p83_p4, %p3725_p0  ;;  %s1855_s14 = sshll.u32 %s2709_s30, 6 }
  0xaa   : > { %p3040_p10 = por %p89_p5, %p3726_p6  ;;  %s3048_s19 = scalar_lea.hbm %s3676_s1, %s1855_s14 }
  0xab   : > { %s296_s0 = scalar_lea.vmem [#allocation5], %s1854_s2  ;;  %p3728_p1 = scmp.lt.s32.totalorder %s2713_s7, 8 }
  0xac   : > { %s3727_s12 = scalar_select %p3040_p10, 1, 0 }
  0xad   : > { %s303_s21 = sshll.u32 %s296_s0, 4  ;;  %p3054_p3 = pnand %p3728_p1, %p85_p9  ;;  %s3050_s21 = int_to_ptr.vmem [resolvable:$true] %s303_s21 }
  0xae   : > { %s293_s29 = scalar_lea.sflag [#allocation6], %s292_s6  ;;  %s2511_s17 = scalar_lea.hbm %s3048_s19, 64 }
  0xaf   : > { %p2512_p7 = scmp.ne.s32.totalorder %s3048_s19, %s2511_s17  ;;  %p2513_p11 = pneg %p3054_p3 }
  0xb0   : > { %s2516_s2 = scalar_lea.hbm %s3676_s1, 128  ;;  %p2517_p5 = scmp.lt.u32.totalorder %s3048_s19, %s3676_s1 }
  0xb1   : > { %p2514_p13 = pnand %p2513_p11, %p2512_p7  ;;  %p2518_p0 = scmp.lt.u32.totalorder %s2516_s2, %s2511_s17 }
  0xb2   : > { %p2520_p6 = scmp.lt.u32.totalorder %s2511_s17, %s3048_s19 }
  0xb3   : > { %p2515_p4 = pneg %p2514_p13  ;;  %p2519_p9 = por %p2518_p0, %p2517_p5 }
  0xb5   : > { %p2521_p1 = por %p2520_p6, %p2519_p9 }
  0xb7   : > { %p2522_p12 = pnand %p2521_p1, %p2515_p4 }
  0xb9   : > { %2525 = shalt.err (!%p2522_p12)
}
  0xba   : > { %s2526_s11 = scalar_lea.vmem %s3050_s21, 64  ;;  %s2723_s0 = smov [#allocation5]  }
  0xbb   : > { %p2527_p7 = scmp.ne.s32.totalorder %s3050_s21, %s2526_s11  ;;  %s2531_s10 = sshll.u32 %s2723_s0, 4  ;;  %s2532_s10 = int_to_ptr.vmem [resolvable:$false] %s2531_s10 }
  0xbc   : > { %s2533_s5 = scalar_lea.vmem %s2532_s10, 128  ;;  %p2534_p10 = scmp.lt.s32.totalorder %s3050_s21, %s2532_s10 }
  0xbd   : > { %p2529_p13 = pnand %p2527_p7, %p2513_p11  ;;  %p2535_p5 = scmp.lt.s32.totalorder %s2533_s5, %s2526_s11 }
  0xbf   : > { %p2530_p2 = pneg %p2529_p13  ;;  %p2536_p0 = por %p2535_p5, %p2534_p10 }
  0xc1   : > { %p2537_p9 = pnand %p2536_p0, %p2530_p2 }
  0xc3   : > { %2540 = shalt.err (!%p2537_p9)
}
  0xc4   : > { %2137 = dma.hbm_to_vmem [thread:$0]  (!%p3054_p3), %s3048_s19, 64, %s3050_s21, %s293_s29  }
  0xc5   : > { %s3089_s17 = scalar_lea.sflag [#allocation9], %s292_s6  ;;  %s2541_s2 = scalar_lea.hbm %s3023_s4, 4096 }
  0xc6   : > { %p2542_p12 = scmp.ne.s32.totalorder %s3023_s4, %s2541_s2  ;;  %p3730_p10 = pneg %p2982_p8 }
  0xc7   : > { %s2546_s16 = scalar_lea.hbm %s3678_s3, 32768  ;;  %p2547_p4 = scmp.lt.u32.totalorder %s3023_s4, %s3678_s3 }
  0xc8   : > { %p2544_p2 = pnand %p2542_p12, %p3730_p10  ;;  %p2548_p6 = scmp.lt.u32.totalorder %s2546_s16, %s2541_s2 }
  0xc9   : > { %p2550_p3 = scmp.lt.u32.totalorder %s2541_s2, %s3023_s4 }
  0xca   : > { %p2545_p11 = pneg %p2544_p2  ;;  %p2549_p1 = por %p2548_p6, %p2547_p4 }
  0xcc   : > { %p2551_p7 = por %p2550_p3, %p2549_p1 }
  0xce   : > { %p2552_p13 = pnand %p2551_p7, %p2545_p11 }
  0xd0   : > { %2555 = shalt.err (!%p2552_p13)
}
  0xd1   : > { %s2556_s6 = scalar_lea.vmem %s3058_s18, 4096  ;;  %p3731_p0 = pmov %p3730_p10 }
  0xd2   : > { %p2557_p5 = scmp.ne.s32.totalorder %s3058_s18, %s2556_s6  ;;  %s2724_s19 = smov [#allocation8]  }
  0xd3   : > { %s2561_s21 = sshll.u32 %s2724_s19, 4  ;;  %s2562_s21 = int_to_ptr.vmem [resolvable:$false] %s2561_s21 }
  0xd4   : > { %p2559_p9 = pnand %p2557_p5, %p3731_p0  ;;  %s2563_s29 = scalar_lea.vmem %s2562_s21, 8192 }
  0xd5   : > { %p2564_p10 = scmp.lt.s32.totalorder %s3058_s18, %s2562_s21  ;;  %p2565_p2 = scmp.lt.s32.totalorder %s2563_s29, %s2556_s6 }
  0xd6   : > { %p2560_p12 = pneg %p2559_p9 }
  0xd7   : > { %p2566_p4 = por %p2565_p2, %p2564_p10 }
  0xd9   : > { %p2567_p6 = pnand %p2566_p4, %p2560_p12 }
  0xdb   : > { %2570 = shalt.err (!%p2567_p6)
}
  0xdc   : > { %2140 = dma.hbm_to_vmem [thread:$0]  (!%p2982_p8), %s3023_s4, 4096, %s3058_s18, %s3089_s17, %s2721_s13, %s2721_s13, %s2722_s28  }
  0xdd   : > { %s3732_s10 = sld [smem:[#allocation27_spill]] }
  0xe3   : > { %p3733_p11 = scmp.ne.s32.totalorder %s3732_s10, 0 }
  0xe4   : > { %s3734_s5 = sld [smem:[#allocation25_spill]] (!%p3733_p11)  ;;  %s3121_s2 = sand.u32 (!%p3733_p11), 1, %s2689_s25  }
  0xe5   : > { %335 = sbr.rel (%p3733_p11) target bundleno = 893 (0x37d), region = 44  ;;  %s3124_s14 = sshll.u32 (!%p3733_p11), %s3121_s2, 8 }
  0xe6   : > { %s338_s20 = scalar_lea.sflag (!%p3733_p11), [#allocation3], %s3121_s2  ;;  %s3128_s9 = scalar_lea.vmem (!%p3733_p11), [#allocation2], %s3124_s14 }
  0xea   : > { %p3735_p1 = scmp.ne.s32.totalorder (!%p3733_p11), %s3734_s5, 0 }
  0xec   : > { %2644 = dma.done.wait (%p3735_p1), %s338_s20, 4096  }
  0xed   : > { %2646 = vsyncadd (%p3735_p1), %s338_s20, 4294963200  ;;  %s346_s13 = sand.u32 1, %s2820_s8   ;;  %s348_s28 = sand.u32 1, %s2677_s22  }
  0xee   : > { %s3136_s4 = sshll.u32 %s348_s28, 2  ;;  %s347_s18 = scalar_lea.sflag [#allocation6], %s346_s13 }
  0xef   : > { %s350_s17 = scalar_lea.vmem [#allocation5], %s3136_s4  ;;  %p3736_p8 = scmp.ne.s32.totalorder %s3727_s12, 0 }
  0xf1   : > { %2648 = dma.done.wait (%p3736_p8), %s347_s18, 64  }
  0xf2   : > { %2650 = vsyncadd (%p3736_p8), %s347_s18, 4294967232  ;;  %p3737_p3 = scmp.eq.s32.totalorder %s2820_s8, 0 }
  0xf4   : > { %2652 = dma.done.wait (%p3737_p3), [#allocation6], 1024   ;;  %p3738_p7 = pmov %p3737_p3 }
  0xf5   : > { %s360_s16 = scalar_lea.sflag [#allocation9], %s346_s13  ;;  %s3148_s11 = scalar_lea.vmem [#allocation8], %s3124_s14 }
  0xf6   : > { %2654 = vsyncadd (%p3738_p7), [#allocation6], 4294966272 }
  0xf7   : > { %2656 = dma.done.wait (%p3735_p1), %s360_s16, 4096  }
  0xf8   : > { %2658 = vsyncadd (%p3735_p1), %s360_s16, 4294963200  ;;  %p3739_p13 = pmov %p3737_p3 }
  0xf9   : > { %p3740_p5 = pmov %p3737_p3 }
  0xfa   : > { %2660 = dma.done.wait (%p3739_p13), [#allocation9], 1024  }
  0xfb   : > { %2662 = vsyncadd (%p3740_p5), [#allocation9], 4294966272  ;;  %p3741_p0 = pmov %p3737_p3 }
  0xfd   : > { %2664 = dma.done.wait (%p3741_p0), [#allocation12], 64   ;;  %p3742_p9 = pmov %p3741_p0 }
  0xfe   : > { %v2253_v0 = vld [vmem:[#allocation10] sm:$0xff]   ;;  %v2255_v2 = vld [vmem:[#allocation10 + $0x8] sm:$0xff]   ;;  %v2257_v4 = vld [vmem:[#allocation10 + $0x10] sm:$0xff]   ;;  %v447_v5 = vlaneseq  ;;  %s3540_s8 = scalar_lea.vmem [#allocation13], %s3124_s14  ;;  %s3743_s12 = sld [smem:[#allocation22_spill]] }
  0xff   : > { %2666 = vsyncadd (%p3742_p9), [#allocation12], 4294967232  ;;  %v2254_v1 = vld [vmem:[#allocation7] sm:$0xff]   ;;  %1973 = vmatprep.subr.bf16.mxu1 %v2253_v0  ;;  %v2256_v3 = vld [vmem:[#allocation7 + $0x8] sm:$0xff]   ;;  %s3744_s0 = sld [smem:[#allocation23_spill]]  ;;  %s1676_s29 = sshll.u32 %s3540_s8, 4  ;;  %s3605_s29 = int_to_ptr.vmem [resolvable:$true] %s1676_s29 }
 0x100   : > { %2021 = vmatprep.subr.bf16.mxu0 %v2254_v1  ;;  %1974 = vmatpush3.bf16.msra.mxu1 %v2253_v0  ;;  %v2258_v6 = vld [vmem:[#allocation7 + $0x10] sm:$0xff]   ;;  %v2259_v7 = vld [vmem:[#allocation10 + $0x18] sm:$0xff]   ;;  %v448_v8 = vshrl.u32 %v447_v5, 7  ;;  %v2261_v10 = vld [vmem:[#allocation10 + $0x20] sm:$0xff]   ;;  %s3745_s20 = sld [smem:[#allocation34_spill]]  ;;  %s1661_s13 = scalar_lea.sflag [#allocation4], %s3121_s2 }
 0x101   : > { %2022 = vmatpush3.bf16.msra.mxu0 %v2254_v1  ;;  %1975 = vmatprep.subr.bf16.mxu1 %v2255_v2  ;;  %v2260_v9 = vld [vmem:[#allocation7 + $0x18] sm:$0xff]   ;;  %v2262_v12 = vld [vmem:[#allocation7 + $0x20] sm:$0xff]   ;;  %v2263_v14 = vld [vmem:[#allocation10 + $0x28] sm:$0xff]   ;;  %s2571_s28 = scalar_lea.vmem %s3605_s29, 4096  ;;  %p3746_p10 = scmp.ne.s32.totalorder %s3720_s27, 0 }
 0x102   : > { %2023 = vmatprep.subr.bf16.mxu0 %v2256_v3  ;;  %v449_v11 = vsub.s32 0, %v448_v8  ;;  %v485_v13 = vsub.s32 1, %v448_v8  ;;  %v521_v15 = vsub.s32 2, %v448_v8  ;;  %v587_v16 = vld [vmem:[%s3148_s11] sm:$0xff]  ;;  %v588_v17 = vld [vmem:[%s3148_s11 + $0x8] sm:$0xff]  ;;  %v415_v21 = vld [vmem:[%s3128_s9] sm:$0xff]  ;;  %p2572_p12 = scmp.ne.s32.totalorder %s3605_s29, %s2571_s28 }
 0x103   : > { %v414_v18 = vld [vmem:[%s350_s17] sm:$0x7]  ;;  %v2264_v19 = vld [vmem:[#allocation7 + $0x28] sm:$0xff]   ;;  %v619_v20 = vpack.c.bf16 %v588_v17, %v587_v16  ;;  %v416_v22 = vld [vmem:[%s3128_s9 + $0x8] sm:$0xff]  ;;  %s2726_s4 = smov [#allocation13]  }
 0x104   : > { %1976 = vmatpush3.bf16.msra.mxu1 %v2255_v2  ;;  %v3168_v23 = vrot.slane %v414_v18, %v449_v11  ;;  %v3170_v24 = vrot.slane %v414_v18, %v485_v13  ;;  %v417_v25 = vld [vmem:[%s3128_s9 + $0x10] sm:$0xff]  ;;  %v418_v26 = vld [vmem:[%s3128_s9 + $0x18] sm:$0xff]  ;;  %v3176_v29 = vrot.slane %v414_v18, %v521_v15  ;;  %v419_v30 = vld [vmem:[%s3128_s9 + $0x20] sm:$0xff]  ;;  %s1920_s6 = sshll.u32 %s3743_s12, 5  ;;  %p2573_p2 = pnand %p2572_p12, %p3746_p10 }
 0x105   : > { %2024 = vmatpush3.bf16.msra.mxu0 %v2256_v3  ;;  %1977 = vmatprep.subr.bf16.mxu1 %v2257_v4  ;;  %v2265_v31 = vld [vmem:[#allocation10 + $0x30] sm:$0xff]   ;;  %v420_v34 = vld [vmem:[%s3128_s9 + $0x28] sm:$0xff]  ;;  %v421_v45 = vld [vmem:[%s3128_s9 + $0x30] sm:$0xff]  ;;  %s1921_s19 = sshll.u32 %s3744_s0, 7  ;;  %s2575_s18 = sshll.u32 %s2726_s4, 4  ;;  %s2576_s18 = int_to_ptr.vmem [resolvable:$false] %s2575_s18 }
 0x106   : > { %2025 = vmatprep.subr.bf16.mxu0 %v2258_v6  ;;  %1989 = vmatprep.mubr.bf16.mxu1 %v619_v20  ;;  %v451_v27 = vsub.f32 %v415_v21, %v3168_v23  ;;  %v452_v28 = vsub.f32 %v416_v22, %v3168_v23  ;;  %v453_v32 = vsub.f32 %v417_v25, %v3168_v23  ;;  %v2266_v35 = vld [vmem:[#allocation7 + $0x30] sm:$0xff]   ;;  %v2267_v46 = vld [vmem:[#allocation10 + $0x38] sm:$0xff]   ;;  %v424_v52 = vld [vmem:[%s3128_s9 + $0x48] sm:$0xff]  ;;  %s1673_s21 = sadd.s32 %s1921_s19, %s1920_s6  ;;  %p2574_p4 = pneg %p2573_p2 }
 0x107   : > { %v454_v33 = vsub.f32 %v418_v26, %v3168_v23  ;;  %v455_v38 = vsub.f32 %v419_v30, %v3168_v23  ;;  %v456_v39 = vsub.f32 %v420_v34, %v3168_v23  ;;  %v422_v48 = vld [vmem:[%s3128_s9 + $0x38] sm:$0xff]  ;;  %v2268_v49 = vld [vmem:[#allocation7 + $0x38] sm:$0xff]   ;;  %v457_v54 = vsub.f32 %v421_v45, %v3168_v23  ;;  %v591_v60 = vld [vmem:[%s3148_s11 + $0x20] sm:$0xff]  ;;  %s1922_s10 = sshll.u32 %s1673_s21, 7  ;;  %s2577_s17 = scalar_lea.vmem %s2576_s18, 8192 }
 0x108   : > { %1978 = vmatpush3.bf16.msra.mxu1 %v2257_v4  ;;  %v487_v36 = vmul.f32 %v3170_v24, %v451_v27  ;;  %v488_v37 = vmul.f32 %v3170_v24, %v452_v28  ;;  %v489_v40 = vmul.f32 %v3170_v24, %v453_v32  ;;  %v423_v51 = vld [vmem:[%s3128_s9 + $0x40] sm:$0xff]  ;;  %v589_v55 = vld [vmem:[%s3148_s11 + $0x10] sm:$0xff]  ;;  %v458_v59 = vsub.f32 %v422_v48, %v3168_v23  ;;  %v592_v61 = vld [vmem:[%s3148_s11 + $0x28] sm:$0xff]  ;;  %p2578_p6 = scmp.lt.s32.totalorder %s3605_s29, %s2576_s18  ;;  %p2579_p11 = scmp.lt.s32.totalorder %s2577_s17, %s2571_s28 }
 0x109   : > { %2026 = vmatpush3.bf16.msra.mxu0 %v2258_v6  ;;  %1979 = vmatprep.subr.bf16.mxu1 %v2259_v7  ;;  %v490_v43 = vmul.f32 %v3170_v24, %v454_v33  ;;  %v491_v44 = vmul.f32 %v3170_v24, %v455_v38  ;;  %v492_v47 = vmul.f32 %v3170_v24, %v456_v39  ;;  %v590_v56 = vld [vmem:[%s3148_s11 + $0x18] sm:$0xff]  ;;  %v596_v20 = vld [vmem:[%s3148_s11 + $0x48] sm:$0xff]  ;;  %v430_v34 = vld [vmem:[%s3128_s9 + $0x78] sm:$0xff] }
 0x10a   : > { %2027 = vmatprep.subr.bf16.mxu0 %v2260_v9  ;;  %v523_v41 = vadd.f32 %v3176_v29, %v487_v36  ;;  %v524_v42 = vadd.f32 %v3176_v29, %v488_v37  ;;  %v525_v53 = vadd.f32 %v3176_v29, %v489_v40  ;;  %v459_v63 = vsub.f32 %v423_v51, %v3168_v23  ;;  %v427_v11 = vld [vmem:[%s3128_s9 + $0x60] sm:$0xff]  ;;  %v429_v33 = vld [vmem:[%s3128_s9 + $0x70] sm:$0xff]  ;;  %v432_v39 = vld [vmem:[%s3128_s9 + $0x88] sm:$0xff]  ;;  %p2580_p1 = por %p2579_p11, %p2578_p6 }
 0x10b   : > { %v526_v57 = vadd.f32 %v3176_v29, %v490_v43  ;;  %v527_v58 = vadd.f32 %v3176_v29, %v491_v44  ;;  %v528_v62 = vadd.f32 %v3176_v29, %v492_v47  ;;  %v460_v0 = vsub.f32 %v424_v52, %v3168_v23  ;;  %v594_v15 = vld [vmem:[%s3148_s11 + $0x38] sm:$0xff]  ;;  %v600_v47 = vld [vmem:[%s3148_s11 + $0x68] sm:$0xff] }
 0x10c   : > { %1980 = vmatpush3.bf16.msra.mxu1 %v2259_v7  ;;  %v555_v50 = vpack.c.bf16 %v524_v42, %v523_v41  ;;  %v620_v1 = vpack.c.bf16 %v590_v56, %v589_v55  ;;  %v493_v2 = vmul.f32 %v3170_v24, %v457_v54  ;;  %v621_v4 = vpack.c.bf16 %v592_v61, %v591_v60  ;;  %v431_v38 = vld [vmem:[%s3128_s9 + $0x80] sm:$0xff]  ;;  %v597_v42 = vld [vmem:[%s3148_s11 + $0x50] sm:$0xff]  ;;  %v445_v55 = vld [vmem:[%s3128_s9 + $0xf0] sm:$0xff]  ;;  %p2581_p8 = pnand %p2580_p1, %p2574_p4 }
 0x10d   : > { %2028 = vmatpush3.bf16.msra.mxu0 %v2260_v9  ;;  %1981 = vmatprep.subr.bf16.mxu1 %v2261_v10  ;;  %v556_v3 = vpack.c.bf16 %v526_v57, %v525_v53  ;;  %v494_v5 = vmul.f32 %v3170_v24, %v458_v59  ;;  %v557_v6 = vpack.c.bf16 %v528_v62, %v527_v58  ;;  %v425_v9 = vld [vmem:[%s3128_s9 + $0x50] sm:$0xff]  ;;  %v598_v43 = vld [vmem:[%s3148_s11 + $0x58] sm:$0xff]  ;;  %v446_v56 = vld [vmem:[%s3128_s9 + $0xf8] sm:$0xff] }
 0x10e   : > { %2029 = vmatprep.subr.bf16.mxu0 %v2262_v12  ;;  %2037 = vmatprep.mubr.bf16.mxu0 %v555_v50  ;;  %v495_v7 = vmul.f32 %v3170_v24, %v459_v63  ;;  %v496_v8 = vmul.f32 %v3170_v24, %v460_v0  ;;  %v529_v13 = vadd.f32 %v3176_v29, %v493_v2  ;;  %v433_v59 = vld [vmem:[%s3128_s9 + $0x90] sm:$0xff]  ;;  %v434_v63 = vld [vmem:[%s3128_s9 + $0x98] sm:$0xff]  ;;  %v435_v0 = vld [vmem:[%s3128_s9 + $0xa0] sm:$0xff] }
 0x10f   : > { %v530_v16 = vadd.f32 %v3176_v29, %v494_v5  ;;  %v461_v17 = vsub.f32 %v425_v9, %v3168_v23  ;;  %v463_v25 = vsub.f32 %v427_v11, %v3168_v23  ;;  %v465_v40 = vsub.f32 %v429_v33, %v3168_v23  ;;  %v603_v9 = vld [vmem:[%s3148_s11 + $0x80] sm:$0xff]  ;;  %v438_v33 = vld [vmem:[%s3128_s9 + $0xb8] sm:$0xff] }
 0x110   : > { %1982 = vmatpush3.bf16.msra.mxu1 %v2261_v10  ;;  %v426_v10 = vld [vmem:[%s3128_s9 + $0x58] sm:$0xff]  ;;  %v531_v21 = vadd.f32 %v3176_v29, %v495_v7  ;;  %v532_v22 = vadd.f32 %v3176_v29, %v496_v8  ;;  %v466_v41 = vsub.f32 %v430_v34, %v3168_v23  ;;  %v467_v50 = vsub.f32 %v431_v38, %v3168_v23  ;;  %v602_v8 = vld [vmem:[%s3148_s11 + $0x78] sm:$0xff] }
 0x111   : > { %2030 = vmatpush3.bf16.msra.mxu0 %v2262_v12  ;;  %1983 = vmatprep.subr.bf16.mxu1 %v2263_v14  ;;  %v428_v12 = vld [vmem:[%s3128_s9 + $0x68] sm:$0xff]  ;;  %v462_v18 = vsub.f32 %v426_v10, %v3168_v23  ;;  %v558_v28 = vpack.c.bf16 %v530_v16, %v529_v13  ;;  %v499_v36 = vmul.f32 %v3170_v24, %v463_v25  ;;  %v604_v10 = vld [vmem:[%s3148_s11 + $0x88] sm:$0xff]  ;;  %v439_v34 = vld [vmem:[%s3128_s9 + $0xc0] sm:$0xff] }
 0x112   : > { %2031 = vmatprep.subr.bf16.mxu0 %v2264_v19  ;;  %v464_v26 = vsub.f32 %v428_v12, %v3168_v23  ;;  %v468_v51 = vsub.f32 %v432_v39, %v3168_v23  ;;  %v624_v52 = vpack.c.bf16 %v598_v43, %v597_v42  ;;  %v501_v53 = vmul.f32 %v3170_v24, %v465_v40  ;;  %v606_v38 = vld [vmem:[%s3148_s11 + $0x98] sm:$0xff]  ;;  %v607_v42 = vld [vmem:[%s3148_s11 + $0xa0] sm:$0xff]  ;;  %v608_v43 = vld [vmem:[%s3148_s11 + $0xa8] sm:$0xff] }
 0x113   : > { %v498_v32 = vmul.f32 %v3170_v24, %v462_v18  ;;  %v535_v48 = vadd.f32 %v3176_v29, %v499_v36  ;;  %v502_v54 = vmul.f32 %v3170_v24, %v466_v41  ;;  %v503_v61 = vmul.f32 %v3170_v24, %v467_v50 }
 0x114   : > { %1984 = vmatpush3.bf16.msra.mxu1 %v2263_v14  ;;  %v593_v14 = vld [vmem:[%s3148_s11 + $0x30] sm:$0xff]  ;;  %v500_v37 = vmul.f32 %v3170_v24, %v464_v26  ;;  %v504_v62 = vmul.f32 %v3170_v24, %v468_v51  ;;  %v481_v2 = vsub.f32 %v445_v55, %v3168_v23  ;;  %v537_v5 = vadd.f32 %v3176_v29, %v501_v53 }
 0x115   : > { %2032 = vmatpush3.bf16.msra.mxu0 %v2264_v19  ;;  %1985 = vmatprep.subr.bf16.mxu1 %v2265_v31  ;;  %v595_v19 = vld [vmem:[%s3148_s11 + $0x40] sm:$0xff]  ;;  %v622_v27 = vpack.c.bf16 %v594_v15, %v593_v14  ;;  %v534_v45 = vadd.f32 %v3176_v29, %v498_v32  ;;  %v469_v7 = vsub.f32 %v433_v59, %v3168_v23 }
 0x116   : > { %2033 = vmatprep.subr.bf16.mxu0 %v2266_v35  ;;  %v623_v30 = vpack.c.bf16 %v596_v20, %v595_v19  ;;  %v470_v11 = vsub.f32 %v434_v63, %v3168_v23  ;;  %v517_v12 = vmul.f32 %v3170_v24, %v481_v2  ;;  %v539_v14 = vadd.f32 %v3176_v29, %v503_v61  ;;  %v444_v59 = vld [vmem:[%s3128_s9 + $0xe8] sm:$0xff]  ;;  %v609_v61 = vld [vmem:[%s3148_s11 + $0xb0] sm:$0xff] }
 0x117   : > { %v540_v15 = vadd.f32 %v3176_v29, %v504_v62  ;;  %v471_v16 = vsub.f32 %v435_v0, %v3168_v23  ;;  %v505_v25 = vmul.f32 %v3170_v24, %v469_v7  ;;  %v474_v41 = vsub.f32 %v438_v33, %v3168_v23  ;;  %v610_v62 = vld [vmem:[%s3148_s11 + $0xb8] sm:$0xff]  ;;  %v611_v2 = vld [vmem:[%s3148_s11 + $0xc0] sm:$0xff] }
 0x118   : > { %1986 = vmatpush3.bf16.msra.mxu1 %v2265_v31  ;;  %v497_v31 = vmul.f32 %v3170_v24, %v461_v17  ;;  %v3275_v18 = vadd.f32 %v3176_v29, %v517_v12  ;;  %v506_v26 = vmul.f32 %v3170_v24, %v470_v11  ;;  %v629_v51 = vpack.c.bf16 %v608_v43, %v607_v42  ;;  %v618_v33 = vld [vmem:[%s3148_s11 + $0xf8] sm:$0xff] }
 0x119   : > { %2034 = vmatpush3.bf16.msra.mxu0 %v2266_v35  ;;  %1987 = vmatprep.subr.bf16.mxu1 %v2267_v46  ;;  %v559_v35 = vpack.c.bf16 %v532_v22, %v531_v21  ;;  %v627_v21 = vpack.c.bf16 %v604_v10, %v603_v9  ;;  %v541_v39 = vadd.f32 %v3176_v29, %v505_v25 }
 0x11a   : > { %2035 = vmatprep.subr.bf16.mxu0 %v2268_v49  ;;  %v533_v44 = vadd.f32 %v3176_v29, %v497_v31  ;;  %v507_v31 = vmul.f32 %v3170_v24, %v471_v16  ;;  %v542_v40 = vadd.f32 %v3176_v29, %v506_v26  ;;  %v480_v7 = vsub.f32 %v444_v59, %v3168_v23  ;;  %v613_v16 = vld [vmem:[%s3148_s11 + $0xd0] sm:$0xff] }
 0x11c   : > { %1988 = vmatpush3.bf16.msra.mxu1 %v2267_v46  ;;  %v599_v46 = vld [vmem:[%s3148_s11 + $0x60] sm:$0xff]  ;;  %v560_v57 = vpack.c.bf16 %v534_v45, %v533_v44  ;;  %v543_v44 = vadd.f32 %v3176_v29, %v507_v31  ;;  %v564_v50 = vpack.c.bf16 %v542_v40, %v541_v39 }
 0x11d   : > { %2036 = vmatpush3.bf16.msra.mxu0 %v2268_v49  ;;  %v536_v49 = vadd.f32 %v3176_v29, %v500_v37  ;;  %v625_v58 = vpack.c.bf16 %v600_v47, %v599_v46  ;;  %v605_v37 = vld [vmem:[%s3148_s11 + $0x90] sm:$0xff]  ;;  %v475_v46 = vsub.f32 %v439_v34, %v3168_v23 }
 0x11f   : > { %1990 = vmatmul.mubr.bf16.vlgmr.msra.gmra.mrb[0].mxu1 %v620_v1  ;;  %v561_v60 = vpack.c.bf16 %v536_v49, %v535_v48  ;;  %v436_v1 = vld [vmem:[%s3128_s9 + $0xa8] sm:$0xff]  ;;  %v628_v48 = vpack.c.bf16 %v606_v38, %v605_v37 }
 0x120   : > { %2038 = vmatmul.mubr.bf16.vlgmr.msra.gmra.mrb[0].mxu0 %v556_v3  ;;  %1993 = vmatprep.mubr.bf16.mxu1 %v621_v4  ;;  %v482_v3 = vsub.f32 %v446_v56, %v3168_v23  ;;  %v601_v4 = vld [vmem:[%s3148_s11 + $0x70] sm:$0xff]  ;;  %v472_v17 = vsub.f32 %v436_v1, %v3168_v23  ;;  %v441_v56 = vld [vmem:[%s3128_s9 + $0xd0] sm:$0xff] }
 0x121   : > { %2041 = vmatprep.mubr.bf16.mxu0 %v557_v6  ;;  %v538_v6 = vadd.f32 %v3176_v29, %v502_v54  ;;  %v626_v20 = vpack.c.bf16 %v602_v8, %v601_v4  ;;  %v511_v54 = vmul.f32 %v3170_v24, %v475_v46  ;;  %v477_v0 = vsub.f32 %v441_v56, %v3168_v23 }
 0x122   : > { %v518_v13 = vmul.f32 %v3170_v24, %v482_v3  ;;  %v508_v32 = vmul.f32 %v3170_v24, %v472_v17  ;;  %v612_v3 = vld [vmem:[%s3148_s11 + $0xc8] sm:$0xff]  ;;  %v630_v8 = vpack.c.bf16 %v610_v62, %v609_v61 }
 0x123   : > { %v562_v22 = vpack.c.bf16 %v538_v6, %v537_v5  ;;  %v547_v4 = vadd.f32 %v3176_v29, %v511_v54  ;;  %v631_v10 = vpack.c.bf16 %v612_v3, %v611_v2  ;;  %v513_v11 = vmul.f32 %v3170_v24, %v477_v0 }
 0x124   : > { %v3278_v19 = vadd.f32 %v3176_v29, %v518_v13  ;;  %v544_v45 = vadd.f32 %v3176_v29, %v508_v32  ;;  %v617_v32 = vld [vmem:[%s3148_s11 + $0xf0] sm:$0xff] }
 0x125   : > { %v549_v17 = vadd.f32 %v3176_v29, %v513_v11  ;;  %v634_v34 = vpack.c.bf16 %v618_v33, %v617_v32 }
 0x126   : > { %v565_v53 = vpack.c.bf16 %v544_v45, %v543_v44  ;;  %v3341_v44 = vld [vmem:[#allocation11 + $0x1] ss:$0 sm:$0xff] }
 0x127   : > { %1994 = vmatmul.mubr.bf16.gmra.mrb[4].mxu1 %v622_v27  ;;  %v437_v27 = vld [vmem:[%s3128_s9 + $0xb0] sm:$0xff] }
 0x128   : > { %2042 = vmatmul.mubr.bf16.gmra.mrb[4].mxu0 %v558_v28  ;;  %1997 = vmatprep.mubr.bf16.mxu1 %v623_v30  ;;  %v570_v28 = vpack.c.bf16 %v3278_v19, %v3275_v18  ;;  %v563_v30 = vpack.c.bf16 %v540_v15, %v539_v14  ;;  %v473_v36 = vsub.f32 %v437_v27, %v3168_v23 }
 0x129   : > { %2045 = vmatprep.mubr.bf16.mxu0 %v559_v35  ;;  %v440_v35 = vld [vmem:[%s3128_s9 + $0xc8] sm:$0xff]  ;;  %v516_v15 = vmul.f32 %v3170_v24, %v480_v7 }
 0x12a   : > { %v476_v47 = vsub.f32 %v440_v35, %v3168_v23  ;;  %v509_v49 = vmul.f32 %v3170_v24, %v473_v36 }
 0x12b   : > { %v552_v26 = vadd.f32 %v3176_v29, %v516_v15 }
 0x12c   : > { %v512_v55 = vmul.f32 %v3170_v24, %v476_v47 }
 0x12e   : > { %v548_v5 = vadd.f32 %v3176_v29, %v512_v55 }
 0x12f   : > { %1998 = vmatmul.mubr.bf16.gmra.mrb[8].mxu1 %v624_v52  ;;  %v510_v52 = vmul.f32 %v3170_v24, %v474_v41 }
 0x130   : > { %2046 = vmatmul.mubr.bf16.gmra.mrb[8].mxu0 %v560_v57  ;;  %2001 = vmatprep.mubr.bf16.mxu1 %v625_v58  ;;  %v442_v57 = vld [vmem:[%s3128_s9 + $0xd8] sm:$0xff]  ;;  %v443_v58 = vld [vmem:[%s3128_s9 + $0xe0] sm:$0xff]  ;;  %v567_v13 = vpack.c.bf16 %v548_v5, %v547_v4  ;;  %s3611_s9 = scalar_lea.hbm %s3745_s20, %s1922_s10 }
 0x131   : > { %2049 = vmatprep.mubr.bf16.mxu0 %v561_v60  ;;  %v545_v60 = vadd.f32 %v3176_v29, %v509_v49  ;;  %v546_v63 = vadd.f32 %v3176_v29, %v510_v52  ;;  %v478_v1 = vsub.f32 %v442_v57, %v3168_v23  ;;  %v479_v6 = vsub.f32 %v443_v58, %v3168_v23  ;;  %v614_v23 = vld [vmem:[%s3148_s11 + $0xd8] sm:$0xff] }
 0x132   : > { %v632_v27 = vpack.c.bf16 %v614_v23, %v613_v16 }
 0x133   : > { %v566_v9 = vpack.c.bf16 %v546_v63, %v545_v60  ;;  %v514_v12 = vmul.f32 %v3170_v24, %v478_v1  ;;  %v515_v14 = vmul.f32 %v3170_v24, %v479_v6 }
 0x135   : > { %v551_v25 = vadd.f32 %v3176_v29, %v515_v14 }
 0x137   : > { %2002 = vmatmul.mubr.bf16.gmra.mrb[12].mxu1 %v626_v20  ;;  %v550_v20 = vadd.f32 %v3176_v29, %v514_v12  ;;  %v569_v31 = vpack.c.bf16 %v552_v26, %v551_v25  ;;  %v3339_v29 = vld [vmem:[#allocation11] ss:$0 sm:$0xff] }
 0x138   : > { %2050 = vmatmul.mubr.bf16.gmra.mrb[12].mxu0 %v562_v22  ;;  %2005 = vmatprep.mubr.bf16.mxu1 %v627_v21  ;;  %v615_v21 = vld [vmem:[%s3148_s11 + $0xe0] sm:$0xff]  ;;  %v616_v22 = vld [vmem:[%s3148_s11 + $0xe8] sm:$0xff] }
 0x139   : > { %2053 = vmatprep.mubr.bf16.mxu0 %v563_v30  ;;  %v568_v24 = vpack.c.bf16 %v550_v20, %v549_v17  ;;  %v633_v30 = vpack.c.bf16 %v616_v22, %v615_v21 }
 0x13f   : > { %2006 = vmatmul.mubr.bf16.gmra.mrb[16].mxu1 %v628_v48 }
 0x140   : > { %2054 = vmatmul.mubr.bf16.gmra.mrb[16].mxu0 %v564_v50  ;;  %2009 = vmatprep.mubr.bf16.mxu1 %v629_v51 }
 0x141   : > { %2057 = vmatprep.mubr.bf16.mxu0 %v565_v53 }
 0x147   : > { %2010 = vmatmul.mubr.bf16.gmra.mrb[20].mxu1 %v630_v8 }
 0x148   : > { %2058 = vmatmul.mubr.bf16.gmra.mrb[20].mxu0 %v566_v9  ;;  %2013 = vmatprep.mubr.bf16.mxu1 %v631_v10 }
 0x149   : > { %2061 = vmatprep.mubr.bf16.mxu0 %v567_v13 }
 0x14f   : > { %2014 = vmatmul.mubr.bf16.gmra.mrb[24].mxu1 %v632_v27 }
 0x150   : > { %2062 = vmatmul.mubr.bf16.gmra.mrb[24].mxu0 %v568_v24  ;;  %2017 = vmatprep.mubr.bf16.mxu1 %v633_v30 }
 0x151   : > { %2065 = vmatprep.mubr.bf16.mxu0 %v569_v31 }
 0x157   : > { %2018 = vmatmul.mubr.bf16.gmra.mrb[28].mxu1 %v634_v34 }
 0x158   : > { %2066 = vmatmul.mubr.bf16.gmra.mrb[28].mxu0 %v570_v28 }
 0x1f2   : > { %v1991_v35 = vpop.f32.mrb[0].mxu1 }
 0x1f3   : > { %v2039_v36 = vpop.f32.mrb[0].mxu0  ;;  %v733_v37 = vpop.f32.mrb[1].mxu1 }
 0x1f4   : > { %v951_v38 = vadd.f32 %v2039_v36, %v1991_v35  ;;  %v942_v39 = vpop.f32.mrb[1].mxu0  ;;  %v1992_v40 = vpop.f32.mrb[2].mxu1 }
 0x1f5   : > { %v943_v41 = vadd.f32 %v942_v39, %v733_v37  ;;  %v2040_v42 = vpop.f32.mrb[2].mxu0  ;;  %v736_v43 = vpop.f32.mrb[3].mxu1 }
 0x1f6   : > { %v954_v45 = vadd.f32 %v2040_v42, %v1992_v40  ;;  %v945_v46 = vpop.f32.mrb[3].mxu0  ;;  %v3344_v47 = vadd.f32 %v3339_v29, %v951_v38 }
 0x1f7   : > { %v946_v18 = vadd.f32 %v945_v46, %v736_v43  ;;  %v3347_v19 = vadd.f32 %v3339_v29, %v943_v41 }
 0x1f8   : > { %v3350_v28 = vadd.f32 %v3339_v29, %v954_v45  ;;  %v1114_v48 = vmul.f32 %v3341_v44, %v3344_v47 }
 0x1f9   : > { %v3355_v49 = vadd.f32 %v3339_v29, %v946_v18  ;;  %v1112_v50 = vmul.f32 %v3341_v44, %v3347_v19 }
 0x1fa   : > { %1148 = vadd.xlane.f32.xlu1 %v1114_v48  ;;  %v1995_v51 = vpop.f32.mrb[4].mxu1  ;;  %v1115_v57 = vmul.f32 %v3341_v44, %v3350_v28 }
 0x1fb   : > { %v2043_v52 = vpop.f32.mrb[4].mxu0  ;;  %1144 = vadd.xlane.f32.xlu0 %v1112_v50  ;;  %v749_v53 = vpop.f32.mrb[5].mxu1  ;;  %v1113_v61 = vmul.f32 %v3341_v44, %v3355_v49 }
 0x1fc   : > { %v967_v54 = vadd.f32 %v2043_v52, %v1995_v51  ;;  %v958_v55 = vpop.f32.mrb[5].mxu0  ;;  %v1996_v56 = vpop.f32.mrb[6].mxu1 }
 0x1fd   : > { %v959_v58 = vadd.f32 %v958_v55, %v749_v53  ;;  %v2044_v59 = vpop.f32.mrb[6].mxu0  ;;  %v752_v60 = vpop.f32.mrb[7].mxu1 }
 0x1fe   : > { %v3364_v62 = vadd.f32 %v3339_v29, %v967_v54  ;;  %v970_v63 = vadd.f32 %v2044_v59, %v1996_v56  ;;  %1150 = vadd.xlane.f32.xlu1 %v1115_v57  ;;  %v961_v0 = vpop.f32.mrb[7].mxu0 }
 0x1ff   : > { %v3367_v1 = vadd.f32 %v3339_v29, %v959_v58  ;;  %v962_v2 = vadd.f32 %v961_v0, %v752_v60  ;;  %1146 = vadd.xlane.f32.xlu0 %v1113_v61 }
 0x200   : > { %v3370_v3 = vadd.f32 %v3339_v29, %v970_v63  ;;  %v1118_v4 = vmul.f32 %v3341_v44, %v3364_v62 }
 0x201   : > { %v3375_v5 = vadd.f32 %v3339_v29, %v962_v2  ;;  %v1116_v10 = vmul.f32 %v3341_v44, %v3367_v1 }
 0x202   : > { %v1999_v6 = vpop.f32.mrb[8].mxu1  ;;  %v1119_v7 = vmul.f32 %v3341_v44, %v3370_v3 }
 0x203   : > { %v2047_v8 = vpop.f32.mrb[8].mxu0  ;;  %1156 = vadd.xlane.f32.xlu0 %v1118_v4  ;;  %v765_v9 = vpop.f32.mrb[9].mxu1  ;;  %v1117_v20 = vmul.f32 %v3341_v44, %v3375_v5 }
 0x204   : > { %v983_v11 = vadd.f32 %v2047_v8, %v1999_v6  ;;  %1158 = vadd.xlane.f32.xlu1 %v1119_v7  ;;  %v974_v12 = vpop.f32.mrb[9].mxu0  ;;  %v2000_v13 = vpop.f32.mrb[10].mxu1 }
 0x205   : > { %v975_v14 = vadd.f32 %v974_v12, %v765_v9  ;;  %v2048_v15 = vpop.f32.mrb[10].mxu0  ;;  %v768_v16 = vpop.f32.mrb[11].mxu1 }
 0x206   : > { %v3382_v23 = vadd.f32 %v3339_v29, %v983_v11  ;;  %v986_v17 = vadd.f32 %v2048_v15, %v2000_v13  ;;  %v977_v21 = vpop.f32.mrb[11].mxu0 }
 0x207   : > { %v3387_v22 = vadd.f32 %v3339_v29, %v975_v14  ;;  %1152 = vadd.xlane.f32.xlu0 %v1116_v10  ;;  %v978_v25 = vadd.f32 %v977_v21, %v768_v16 }
 0x208   : > { %v3390_v26 = vadd.f32 %v3339_v29, %v986_v17  ;;  %1154 = vadd.xlane.f32.xlu1 %v1117_v20  ;;  %v1122_v27 = vmul.f32 %v3341_v44, %v3382_v23 }
 0x209   : > { %v3395_v24 = vadd.f32 %v3339_v29, %v978_v25  ;;  %v1120_v34 = vmul.f32 %v3341_v44, %v3387_v22 }
 0x20a   : > { %v2003_v30 = vpop.f32.mrb[12].mxu1  ;;  %v1123_v31 = vmul.f32 %v3341_v44, %v3390_v26 }
 0x20b   : > { %v2051_v32 = vpop.f32.mrb[12].mxu0  ;;  %v781_v33 = vpop.f32.mrb[13].mxu1  ;;  %1164 = vadd.xlane.f32.xlu0 %v1122_v27  ;;  %v1121_v38 = vmul.f32 %v3341_v44, %v3395_v24 }
 0x20c   : > { %v999_v35 = vadd.f32 %v2051_v32, %v2003_v30  ;;  %v990_v36 = vpop.f32.mrb[13].mxu0  ;;  %1166 = vadd.xlane.f32.xlu1 %v1123_v31  ;;  %v2004_v37 = vpop.f32.mrb[14].mxu1 }
 0x20d   : > { %v991_v39 = vadd.f32 %v990_v36, %v781_v33  ;;  %v2052_v40 = vpop.f32.mrb[14].mxu0  ;;  %v784_v41 = vpop.f32.mrb[15].mxu1 }
 0x20e   : > { %v3404_v42 = vadd.f32 %v3339_v29, %v999_v35  ;;  %v1002_v43 = vadd.f32 %v2052_v40, %v2004_v37  ;;  %v993_v45 = vpop.f32.mrb[15].mxu0 }
 0x20f   : > { %v3407_v46 = vadd.f32 %v3339_v29, %v991_v39  ;;  %1160 = vadd.xlane.f32.xlu0 %v1120_v34  ;;  %v994_v18 = vadd.f32 %v993_v45, %v784_v41 }
 0x210   : > { %v3410_v48 = vadd.f32 %v3339_v29, %v1002_v43  ;;  %1162 = vadd.xlane.f32.xlu1 %v1121_v38  ;;  %v1126_v50 = vmul.f32 %v3341_v44, %v3404_v42 }
 0x211   : > { %v3415_v51 = vadd.f32 %v3339_v29, %v994_v18  ;;  %v1124_v56 = vmul.f32 %v3341_v44, %v3407_v46 }
 0x212   : > { %v2007_v52 = vpop.f32.mrb[16].mxu1  ;;  %v1127_v53 = vmul.f32 %v3341_v44, %v3410_v48 }
 0x213   : > { %v2055_v54 = vpop.f32.mrb[16].mxu0  ;;  %v797_v55 = vpop.f32.mrb[17].mxu1  ;;  %1172 = vadd.xlane.f32.xlu0 %v1126_v50  ;;  %v1125_v60 = vmul.f32 %v3341_v44, %v3415_v51 }
 0x214   : > { %v1015_v57 = vadd.f32 %v2055_v54, %v2007_v52  ;;  %v1006_v58 = vpop.f32.mrb[17].mxu0  ;;  %1174 = vadd.xlane.f32.xlu1 %v1127_v53  ;;  %v2008_v59 = vpop.f32.mrb[18].mxu1 }
 0x215   : > { %v1007_v61 = vadd.f32 %v1006_v58, %v797_v55  ;;  %v2056_v63 = vpop.f32.mrb[18].mxu0  ;;  %v800_v0 = vpop.f32.mrb[19].mxu1  ;;  %v2725_v58 = vmov 0  }
 0x216   : > { %v3424_v2 = vadd.f32 %v3339_v29, %v1015_v57  ;;  %v1018_v4 = vadd.f32 %v2056_v63, %v2008_v59  ;;  %v1009_v6 = vpop.f32.mrb[19].mxu0  ;;  %2251 = vset.pattern.permute.xlu1 %v2725_v58  ;;  %2252 = vset.pattern.permute.xlu0 %v2725_v58 }
 0x217   : > { %v3427_v7 = vadd.f32 %v3339_v29, %v1007_v61  ;;  %1168 = vadd.xlane.f32.xlu0 %v1124_v56  ;;  %v1010_v8 = vadd.f32 %v1009_v6, %v800_v0 }
 0x218   : > { %v3430_v9 = vadd.f32 %v3339_v29, %v1018_v4  ;;  %1170 = vadd.xlane.f32.xlu1 %v1125_v60  ;;  %v1130_v10 = vmul.f32 %v3341_v44, %v3424_v2 }
 0x219   : > { %v3435_v11 = vadd.f32 %v3339_v29, %v1010_v8  ;;  %v1128_v16 = vmul.f32 %v3341_v44, %v3427_v7 }
 0x21a   : > { %v2011_v12 = vpop.f32.mrb[20].mxu1  ;;  %v1131_v13 = vmul.f32 %v3341_v44, %v3430_v9 }
 0x21b   : > { %v2059_v14 = vpop.f32.mrb[20].mxu0  ;;  %v813_v15 = vpop.f32.mrb[21].mxu1  ;;  %1180 = vadd.xlane.f32.xlu0 %v1130_v10  ;;  %v1129_v25 = vmul.f32 %v3341_v44, %v3435_v11 }
 0x21c   : > { %v1031_v17 = vadd.f32 %v2059_v14, %v2011_v12  ;;  %v1022_v20 = vpop.f32.mrb[21].mxu0  ;;  %1182 = vadd.xlane.f32.xlu1 %v1131_v13  ;;  %v2012_v21 = vpop.f32.mrb[22].mxu1 }
 0x21d   : > { %v1023_v27 = vadd.f32 %v1022_v20, %v813_v15  ;;  %v2060_v30 = vpop.f32.mrb[22].mxu0  ;;  %v816_v31 = vpop.f32.mrb[23].mxu1 }
 0x21e   : > { %v3444_v32 = vadd.f32 %v3339_v29, %v1031_v17  ;;  %v1034_v33 = vadd.f32 %v2060_v30, %v2012_v21  ;;  %v1025_v34 = vpop.f32.mrb[23].mxu0 }
 0x21f   : > { %v3447_v35 = vadd.f32 %v3339_v29, %v1023_v27  ;;  %1176 = vadd.xlane.f32.xlu0 %v1128_v16  ;;  %v1026_v36 = vadd.f32 %v1025_v34, %v816_v31 }
 0x220   : > { %v3450_v37 = vadd.f32 %v3339_v29, %v1034_v33  ;;  %1178 = vadd.xlane.f32.xlu1 %v1129_v25  ;;  %v1134_v38 = vmul.f32 %v3341_v44, %v3444_v32 }
 0x221   : > { %v3455_v39 = vadd.f32 %v3339_v29, %v1026_v36  ;;  %v1132_v18 = vmul.f32 %v3341_v44, %v3447_v35 }
 0x222   : > { %v2015_v40 = vpop.f32.mrb[24].mxu1  ;;  %v1135_v41 = vmul.f32 %v3341_v44, %v3450_v37 }
 0x223   : > { %v2063_v43 = vpop.f32.mrb[24].mxu0  ;;  %v829_v45 = vpop.f32.mrb[25].mxu1  ;;  %1188 = vadd.xlane.f32.xlu0 %v1134_v38  ;;  %v1133_v54 = vmul.f32 %v3341_v44, %v3455_v39 }
 0x224   : > { %v1047_v50 = vadd.f32 %v2063_v43, %v2015_v40  ;;  %v1038_v52 = vpop.f32.mrb[25].mxu0  ;;  %1190 = vadd.xlane.f32.xlu1 %v1135_v41  ;;  %v2016_v53 = vpop.f32.mrb[26].mxu1 }
 0x225   : > { %v1039_v55 = vadd.f32 %v1038_v52, %v829_v45  ;;  %v2064_v56 = vpop.f32.mrb[26].mxu0  ;;  %v832_v57 = vpop.f32.mrb[27].mxu1  ;;  %v3503_v52 = vld [vmem:[#allocation11 + $0x2] ss:$0 sm:$0xff] }
 0x226   : > { %v3464_v59 = vadd.f32 %v3339_v29, %v1047_v50  ;;  %v1050_v60 = vadd.f32 %v2064_v56, %v2016_v53  ;;  %v1041_v61 = vpop.f32.mrb[27].mxu0 }
 0x227   : > { %v3467_v63 = vadd.f32 %v3339_v29, %v1039_v55  ;;  %1184 = vadd.xlane.f32.xlu0 %v1132_v18  ;;  %v1042_v0 = vadd.f32 %v1041_v61, %v832_v57 }
 0x228   : > { %v3470_v4 = vadd.f32 %v3339_v29, %v1050_v60  ;;  %1186 = vadd.xlane.f32.xlu1 %v1133_v54  ;;  %v1138_v6 = vmul.f32 %v3341_v44, %v3464_v59 }
 0x229   : > { %v3475_v8 = vadd.f32 %v3339_v29, %v1042_v0  ;;  %v1136_v15 = vmul.f32 %v3341_v44, %v3467_v63 }
 0x22a   : > { %v2019_v10 = vpop.f32.mrb[28].mxu1  ;;  %v1139_v12 = vmul.f32 %v3341_v44, %v3470_v4 }
 0x22b   : > { %v2067_v13 = vpop.f32.mrb[28].mxu0  ;;  %v845_v14 = vpop.f32.mrb[29].mxu1  ;;  %1196 = vadd.xlane.f32.xlu0 %v1138_v6  ;;  %v1137_v21 = vmul.f32 %v3341_v44, %v3475_v8 }
 0x22c   : > { %v1063_v16 = vadd.f32 %v2067_v13, %v2019_v10  ;;  %v1054_v17 = vpop.f32.mrb[29].mxu0  ;;  %1198 = vadd.xlane.f32.xlu1 %v1139_v12  ;;  %v2020_v20 = vpop.f32.mrb[30].mxu1 }
 0x22d   : > { %v1055_v25 = vadd.f32 %v1054_v17, %v845_v14  ;;  %v2068_v27 = vpop.f32.mrb[30].mxu0  ;;  %v848_v30 = vpop.f32.mrb[31].mxu1 }
 0x22e   : > { %v1066_v31 = vadd.f32 %v2068_v27, %v2020_v20  ;;  %v1057_v33 = vpop.f32.mrb[31].mxu0  ;;  %v3484_v34 = vadd.f32 %v3339_v29, %v1063_v16 }
 0x22f   : > { %v3487_v36 = vadd.f32 %v3339_v29, %v1055_v25  ;;  %1192 = vadd.xlane.f32.xlu0 %v1136_v15  ;;  %v1058_v38 = vadd.f32 %v1057_v33, %v848_v30 }
 0x230   : > { %v3490_v40 = vadd.f32 %v3339_v29, %v1066_v31  ;;  %1194 = vadd.xlane.f32.xlu1 %v1137_v21  ;;  %v1142_v18 = vmul.f32 %v3341_v44, %v3484_v34 }
 0x231   : > { %v3493_v41 = vadd.f32 %v3339_v29, %v1058_v38  ;;  %v1140_v43 = vmul.f32 %v3341_v44, %v3487_v36 }
 0x232   : > { %v1143_v45 = vmul.f32 %v3341_v44, %v3490_v40 }
 0x233   : > { %1200 = vadd.xlane.f32.xlu0 %v1140_v43  ;;  %v1141_v50 = vmul.f32 %v3341_v44, %v3493_v41 }
 0x234   : > { %1206 = vadd.xlane.f32.xlu1 %v1143_v45 }
 0x237   : > { %1204 = vadd.xlane.f32.xlu0 %v1142_v18 }
 0x238   : > { %1202 = vadd.xlane.f32.xlu1 %v1141_v50 }
 0x287   : > { %v1149_v29 = vpop.xlane.xlu1 %1148 }
 0x288   : > { %v1214_v53 = vadd.f32 %v3503_v52, %v1149_v29  ;;  %v1145_v54 = vpop.xlane.xlu0 %1144 }
 0x289   : > { %v1212_v55 = vadd.f32 %v3503_v52, %v1145_v54 }
 0x28a   : > { %v1889_v56 = vmul.f32 -1.442695, %v1214_v53 }
 0x28b   : > { %v1887_v57 = vmul.f32 -1.442695, %v1212_v55  ;;  %v1151_v58 = vpop.xlane.xlu1 %1150 }
 0x28c   : > { %2269 = vpow2.f32 %v1889_v56  ;;  %v1215_v60 = vadd.f32 %v3503_v52, %v1151_v58  ;;  %v1147_v61 = vpop.xlane.xlu0 %1146 }
 0x28d   : > { %2271 = vpow2.f32 %v1887_v57  ;;  %v1213_v44 = vadd.f32 %v3503_v52, %v1147_v61 }
 0x28e   : > { %v1890_v0 = vmul.f32 -1.442695, %v1215_v60 }
 0x28f   : > { %v1888_v6 = vmul.f32 -1.442695, %v1213_v44 }
 0x290   : > { %2273 = vpow2.f32 %v1890_v0  ;;  %v1157_v10 = vpop.xlane.xlu0 %1156 }
 0x291   : > { %2275 = vpow2.f32 %v1888_v6  ;;  %v1218_v12 = vadd.f32 %v3503_v52, %v1157_v10  ;;  %v1159_v13 = vpop.xlane.xlu1 %1158 }
 0x292   : > { %v1219_v14 = vadd.f32 %v3503_v52, %v1159_v13 }
 0x293   : > { %v1893_v15 = vmul.f32 -1.442695, %v1218_v12 }
 0x294   : > { %v1894_v16 = vmul.f32 -1.442695, %v1219_v14  ;;  %v1153_v17 = vpop.xlane.xlu0 %1152 }
 0x295   : > { %2277 = vpow2.f32 %v1893_v15  ;;  %v1216_v20 = vadd.f32 %v3503_v52, %v1153_v17  ;;  %v1155_v21 = vpop.xlane.xlu1 %1154 }
 0x296   : > { %v2270_v25 = vpop.eup %2269  ;;  %v1217_v27 = vadd.f32 %v3503_v52, %v1155_v21  ;;  %2279 = vpow2.f32 %v1894_v16 }
 0x297   : > { %v2272_v30 = vpop.eup %2271  ;;  %v1342_v31 = vadd.f32 1.0, %v2270_v25  ;;  %v1891_v33 = vmul.f32 -1.442695, %v1216_v20 }
 0x298   : > { %v1340_v38 = vadd.f32 1.0, %v2272_v30  ;;  %v1892_v43 = vmul.f32 -1.442695, %v1217_v27  ;;  %v1165_v45 = vpop.xlane.xlu0 %1164 }
 0x299   : > { %2281 = vrcp.f32 %v1342_v31  ;;  %v1167_v18 = vpop.xlane.xlu1 %1166  ;;  %v1222_v50 = vadd.f32 %v3503_v52, %v1165_v45 }
 0x29a   : > { %v2274_v29 = vpop.eup %2273  ;;  %2283 = vrcp.f32 %v1340_v38  ;;  %v1223_v53 = vadd.f32 %v3503_v52, %v1167_v18 }
 0x29b   : > { %v2276_v54 = vpop.eup %2275  ;;  %v1343_v55 = vadd.f32 1.0, %v2274_v29  ;;  %2285 = vpow2.f32 %v1891_v33  ;;  %v1897_v57 = vmul.f32 -1.442695, %v1222_v50 }
 0x29c   : > { %2287 = vpow2.f32 %v1892_v43  ;;  %v1898_v56 = vmul.f32 -1.442695, %v1223_v53  ;;  %v1161_v58 = vpop.xlane.xlu0 %1160  ;;  %v1341_v60 = vadd.f32 1.0, %v2276_v54 }
 0x29d   : > { %2289 = vrcp.f32 %v1343_v55  ;;  %v1163_v61 = vpop.xlane.xlu1 %1162  ;;  %v1220_v6 = vadd.f32 %v3503_v52, %v1161_v58 }
 0x29e   : > { %v1221_v44 = vadd.f32 %v3503_v52, %v1163_v61  ;;  %2291 = vpow2.f32 %v1898_v56 }
 0x29f   : > { %v2278_v0 = vpop.eup %2277  ;;  %2293 = vpow2.f32 %v1897_v57  ;;  %v1895_v21 = vmul.f32 -1.442695, %v1220_v6 }
 0x2a0   : > { %v1346_v10 = vadd.f32 1.0, %v2278_v0  ;;  %v1896_v12 = vmul.f32 -1.442695, %v1221_v44  ;;  %v1173_v13 = vpop.xlane.xlu0 %1172  ;;  %2295 = vrcp.f32 %v1341_v60  ;;  %v2280_v16 = vpop.eup %2279 }
 0x2a1   : > { %v1175_v14 = vpop.xlane.xlu1 %1174  ;;  %v1226_v15 = vadd.f32 %v3503_v52, %v1173_v13  ;;  %v1347_v53 = vadd.f32 1.0, %v2280_v16 }
 0x2a2   : > { %v1227_v17 = vadd.f32 %v3503_v52, %v1175_v14  ;;  %2297 = vrcp.f32 %v1346_v10 }
 0x2a3   : > { %v2282_v20 = vpop.eup %2281  ;;  %2299 = vpow2.f32 %v1896_v12  ;;  %v1901_v30 = vmul.f32 -1.442695, %v1226_v15 }
 0x2a4   : > { %v2284_v25 = vpop.eup %2283  ;;  %v1902_v27 = vmul.f32 -1.442695, %v1227_v17  ;;  %1448 = vperm.xlu1 %2251, %v2282_v20   ;;  %v1169_v31 = vpop.xlane.xlu0 %1168 }
 0x2a5   : > { %v2286_v33 = vpop.eup %2285  ;;  %v1171_v38 = vpop.xlane.xlu1 %1170  ;;  %1438 = vperm.xlu0 %2252, %v2284_v25   ;;  %v1224_v43 = vadd.f32 %v3503_v52, %v1169_v31 }
 0x2a6   : > { %v2288_v45 = vpop.eup %2287  ;;  %v1344_v18 = vadd.f32 1.0, %v2286_v33  ;;  %2301 = vpow2.f32 %v1902_v27  ;;  %v1225_v50 = vadd.f32 %v3503_v52, %v1171_v38 }
 0x2a7   : > { %v2290_v29 = vpop.eup %2289  ;;  %2303 = vpow2.f32 %v1895_v21  ;;  %v1345_v57 = vadd.f32 1.0, %v2288_v45  ;;  %v1899_v58 = vmul.f32 -1.442695, %v1224_v43 }
 0x2a8   : > { %2305 = vpow2.f32 %v1901_v30  ;;  %v1900_v54 = vmul.f32 -1.442695, %v1225_v50  ;;  %1453 = vperm.xlu1 %2251, %v2290_v29   ;;  %v1181_v55 = vpop.xlane.xlu0 %1180  ;;  %v2292_v56 = vpop.eup %2291 }
 0x2a9   : > { %2307 = vrcp.f32 %v1344_v18  ;;  %v1183_v60 = vpop.xlane.xlu1 %1182  ;;  %v2294_v61 = vpop.eup %2293  ;;  %v1351_v44 = vadd.f32 1.0, %v2292_v56  ;;  %v1230_v6 = vadd.f32 %v3503_v52, %v1181_v55 }
 0x2aa   : > { %2309 = vpow2.f32 %v1900_v54  ;;  %v1231_v0 = vadd.f32 %v3503_v52, %v1183_v60  ;;  %v2296_v10 = vpop.eup %2295  ;;  %v1350_v12 = vadd.f32 1.0, %v2294_v61 }
 0x2ab   : > { %2311 = vrcp.f32 %v1347_v53  ;;  %v1905_v21 = vmul.f32 -1.442695, %v1230_v6 }
 0x2ac   : > { %2313 = vrcp.f32 %v1351_v44  ;;  %v1906_v13 = vmul.f32 -1.442695, %v1231_v0  ;;  %1443 = vperm.xlu1 %2251, %v2296_v10   ;;  %v1177_v14 = vpop.xlane.xlu0 %1176  ;;  %v2298_v15 = vpop.eup %2297 }
 0x2ad   : > { %2315 = vrcp.f32 %v1345_v57  ;;  %v1179_v16 = vpop.xlane.xlu1 %1178  ;;  %v1228_v17 = vadd.f32 %v3503_v52, %v1177_v14  ;;  %v2300_v20 = vpop.eup %2299 }
 0x2ae   : > { %2317 = vpow2.f32 %v1899_v58  ;;  %v1229_v25 = vadd.f32 %v3503_v52, %v1179_v16  ;;  %v1349_v27 = vadd.f32 1.0, %v2300_v20 }
 0x2af   : > { %2319 = vpow2.f32 %v1906_v13  ;;  %v1903_v45 = vmul.f32 -1.442695, %v1228_v17 }
 0x2b0   : > { %v2302_v30 = vpop.eup %2301  ;;  %2321 = vrcp.f32 %v1350_v12  ;;  %v1904_v31 = vmul.f32 -1.442695, %v1229_v25  ;;  %1468 = vperm.xlu1 %2251, %v2298_v15   ;;  %v1189_v33 = vpop.xlane.xlu0 %1188 }
 0x2b1   : > { %v2304_v38 = vpop.eup %2303  ;;  %2323 = vrcp.f32 %v1349_v27  ;;  %v1355_v43 = vadd.f32 1.0, %v2302_v30  ;;  %v1191_v18 = vpop.xlane.xlu1 %1190  ;;  %v1234_v50 = vadd.f32 %v3503_v52, %v1189_v33 }
 0x2b2   : > { %v2306_v29 = vpop.eup %2305  ;;  %2325 = vpow2.f32 %v1905_v21  ;;  %v1235_v53 = vadd.f32 %v3503_v52, %v1191_v18  ;;  %v1348_v56 = vadd.f32 1.0, %v2304_v38 }
 0x2b3   : > { %v2308_v54 = vpop.eup %2307  ;;  %2327 = vrcp.f32 %v1355_v43  ;;  %v1909_v44 = vmul.f32 -1.442695, %v1234_v50  ;;  %v1354_v14 = vadd.f32 1.0, %v2306_v29 }
 0x2b4   : > { %v2310_v55 = vpop.eup %2309  ;;  %2329 = vpow2.f32 %v1904_v31  ;;  %v1910_v57 = vmul.f32 -1.442695, %v1235_v53  ;;  %1458 = vperm.xlu1 %2251, %v2308_v54   ;;  %v1185_v58 = vpop.xlane.xlu0 %1184 }
 0x2b5   : > { %v2312_v60 = vpop.eup %2311  ;;  %v1353_v61 = vadd.f32 1.0, %v2310_v55  ;;  %2331 = vpow2.f32 %v1903_v45  ;;  %v1187_v0 = vpop.xlane.xlu1 %1186  ;;  %v1232_v6 = vadd.f32 %v3503_v52, %v1185_v58 }
 0x2b6   : > { %v2314_v10 = vpop.eup %2313  ;;  %2333 = vpow2.f32 %v1910_v57  ;;  %v1233_v12 = vadd.f32 %v3503_v52, %v1187_v0 }
 0x2b7   : > { %v2316_v13 = vpop.eup %2315  ;;  %2335 = vrcp.f32 %v1353_v61  ;;  %1493 = vperm.xlu0 %2252, %v2314_v10   ;;  %v1907_v21 = vmul.f32 -1.442695, %v1232_v6 }
 0x2b8   : > { %v2318_v15 = vpop.eup %2317  ;;  %2337 = vrcp.f32 %v1348_v56  ;;  %v1908_v16 = vmul.f32 -1.442695, %v1233_v12  ;;  %1473 = vperm.xlu1 %2251, %v2312_v60   ;;  %v1197_v17 = vpop.xlane.xlu0 %1196 }
 0x2b9   : > { %v2320_v20 = vpop.eup %2319  ;;  %2339 = vpow2.f32 %v1909_v44  ;;  %v1199_v25 = vpop.xlane.xlu1 %1198  ;;  %v1238_v33 = vadd.f32 %v3503_v52, %v1197_v17  ;;  %v1352_v45 = vadd.f32 1.0, %v2318_v15 }
 0x2ba   : > { %v2322_v27 = vpop.eup %2321  ;;  %v1359_v30 = vadd.f32 1.0, %v2320_v20  ;;  %2341 = vpow2.f32 %v1908_v16  ;;  %v1239_v31 = vadd.f32 %v3503_v52, %v1199_v25 }
 0x2bb   : > { %v2324_v38 = vpop.eup %2323  ;;  %2343 = vrcp.f32 %v1354_v14  ;;  %v1913_v55 = vmul.f32 -1.442695, %v1238_v33 }
 0x2bc   : > { %v2326_v43 = vpop.eup %2325  ;;  %2345 = vrcp.f32 %v1359_v30  ;;  %v1914_v18 = vmul.f32 -1.442695, %v1239_v31  ;;  %1483 = vperm.xlu0 %2252, %v2324_v38   ;;  %1463 = vperm.xlu1 %2251, %v2316_v13   ;;  %v1193_v50 = vpop.xlane.xlu0 %1192 }
 0x2bd   : > { %v2328_v29 = vpop.eup %2327  ;;  %2347 = vpow2.f32 %v1907_v21  ;;  %v1195_v53 = vpop.xlane.xlu1 %1194  ;;  %v1236_v44 = vadd.f32 %v3503_v52, %v1193_v50  ;;  %v1358_v10 = vadd.f32 1.0, %v2326_v43 }
 0x2be   : > { %v2330_v54 = vpop.eup %2329  ;;  %2349 = vpow2.f32 %v1914_v18  ;;  %v1237_v56 = vadd.f32 %v3503_v52, %v1195_v53 }
 0x2bf   : > { %v2332_v57 = vpop.eup %2331  ;;  %v1357_v58 = vadd.f32 1.0, %v2330_v54  ;;  %2351 = vrcp.f32 %v1352_v45  ;;  %v1911_v21 = vmul.f32 -1.442695, %v1236_v44 }
 0x2c0   : > { %v2334_v60 = vpop.eup %2333  ;;  %v1912_v61 = vmul.f32 -1.442695, %v1237_v56  ;;  %1513 = vperm.xlu0 %2252, %v2328_v29   ;;  %1488 = vperm.xlu1 %2251, %v2322_v27   ;;  %v1201_v0 = vpop.xlane.xlu0 %1200  ;;  %v1356_v15 = vadd.f32 1.0, %v2332_v57 }
 0x2c1   : > { %v2336_v6 = vpop.eup %2335  ;;  %2353 = vrcp.f32 %v1357_v58  ;;  %v1363_v12 = vadd.f32 1.0, %v2334_v60  ;;  %v1207_v13 = vpop.xlane.xlu1 %1206  ;;  %v1240_v25 = vadd.f32 %v3503_v52, %v1201_v0 }
 0x2c2   : > { %v2338_v14 = vpop.eup %2337  ;;  %2355 = vpow2.f32 %v1913_v55  ;;  %v1243_v16 = vadd.f32 %v3503_v52, %v1207_v13 }
 0x2c3   : > { %v2340_v17 = vpop.eup %2339  ;;  %2357 = vrcp.f32 %v1363_v12  ;;  %v1915_v53 = vmul.f32 -1.442695, %v1240_v25 }
 0x2c4   : > { %v2342_v20 = vpop.eup %2341  ;;  %2359 = vpow2.f32 %v1912_v61  ;;  %1503 = vperm.xlu0 %2252, %v2336_v6   ;;  %1478 = vperm.xlu1 %2251, %v2338_v14   ;;  %v1362_v30 = vadd.f32 1.0, %v2340_v17  ;;  %v1205_v38 = vpop.xlane.xlu0 %1204  ;;  %v1918_v45 = vmul.f32 -1.442695, %v1243_v16 }
 0x2c5   : > { %v2344_v27 = vpop.eup %2343  ;;  %2361 = vrcp.f32 %v1358_v10  ;;  %v1361_v31 = vadd.f32 1.0, %v2342_v20  ;;  %v1203_v33 = vpop.xlane.xlu1 %1202  ;;  %v1242_v54 = vadd.f32 %v3503_v52, %v1205_v38 }
 0x2c6   : > { %v2346_v43 = vpop.eup %2345  ;;  %2363 = vrcp.f32 %v1356_v15  ;;  %v1241_v18 = vadd.f32 %v3503_v52, %v1203_v33 }
 0x2c7   : > { %v2348_v50 = vpop.eup %2347  ;;  %2365 = vrcp.f32 %v1361_v31  ;;  %v1917_v44 = vmul.f32 -1.442695, %v1242_v54 }
 0x2c8   : > { %v2350_v29 = vpop.eup %2349  ;;  %2367 = vpow2.f32 %v1911_v21  ;;  %1533 = vperm.xlu0 %2252, %v2346_v43   ;;  %1508 = vperm.xlu1 %2251, %v2344_v27   ;;  %v1916_v56 = vmul.f32 -1.442695, %v1241_v18  ;;  %v1360_v60 = vadd.f32 1.0, %v2348_v50 }
 0x2c9   : > { %2369 = vrcp.f32 %v1362_v30  ;;  %v1367_v55 = vadd.f32 1.0, %v2350_v29  ;;  %v2352_v57 = vpop.eup %2351 }
 0x2ca   : > { %2371 = vpow2.f32 %v1918_v45 }
 0x2cb   : > { %v2354_v58 = vpop.eup %2353  ;;  %2373 = vrcp.f32 %v1367_v55 }
 0x2cc   : > { %v2356_v61 = vpop.eup %2355  ;;  %2375 = vpow2.f32 %v1915_v53  ;;  %1523 = vperm.xlu0 %2252, %v2354_v58   ;;  %1498 = vperm.xlu1 %2251, %v2352_v57  }
 0x2cd   : > { %v2358_v0 = vpop.eup %2357  ;;  %2377 = vpow2.f32 %v1916_v56  ;;  %v1366_v14 = vadd.f32 1.0, %v2356_v61 }
 0x2ce   : > { %v2360_v6 = vpop.eup %2359  ;;  %2379 = vrcp.f32 %v1360_v60 }
 0x2cf   : > { %v2362_v10 = vpop.eup %2361  ;;  %v1365_v52 = vadd.f32 1.0, %v2360_v6  ;;  %2381 = vpow2.f32 %v1917_v44 }
 0x2d0   : > { %v2364_v12 = vpop.eup %2363  ;;  %1553 = vperm.xlu0 %2252, %v2358_v0   ;;  %1528 = vperm.xlu1 %2251, %v2362_v10  }
 0x2d1   : > { %v2366_v13 = vpop.eup %2365  ;;  %2383 = vrcp.f32 %v1365_v52 }
 0x2d2   : > { %v2368_v15 = vpop.eup %2367  ;;  %2385 = vrcp.f32 %v1366_v14 }
 0x2d3   : > { %v2370_v16 = vpop.eup %2369  ;;  %v1364_v21 = vadd.f32 1.0, %v2368_v15 }
 0x2d4   : > { %v2372_v17 = vpop.eup %2371  ;;  %1543 = vperm.xlu0 %2252, %v2366_v13   ;;  %1518 = vperm.xlu1 %2251, %v2364_v12  }
 0x2d5   : > { %v2374_v20 = vpop.eup %2373  ;;  %2387 = vrcp.f32 %v1364_v21  ;;  %v1371_v43 = vadd.f32 1.0, %v2372_v17 }
 0x2d6   : > { %v2376_v25 = vpop.eup %2375 }
 0x2d7   : > { %v2378_v27 = vpop.eup %2377  ;;  %v1368_v33 = vadd.f32 1.0, %v2376_v25 }
 0x2d8   : > { %v1369_v30 = vadd.f32 1.0, %v2378_v27  ;;  %1573 = vperm.xlu0 %2252, %v2374_v20   ;;  %1548 = vperm.xlu1 %2251, %v2370_v16   ;;  %v2380_v31 = vpop.eup %2379 }
 0x2d9   : > { %v2382_v38 = vpop.eup %2381 }
 0x2da   : > { %2389 = vrcp.f32 %v1369_v30  ;;  %v1370_v18 = vadd.f32 1.0, %v2382_v38 }
 0x2db   : > { %v2384_v45 = vpop.eup %2383  ;;  %2391 = vrcp.f32 %v1368_v33 }
 0x2dc   : > { %1563 = vperm.xlu0 %2252, %v2384_v45   ;;  %1538 = vperm.xlu1 %2251, %v2380_v31   ;;  %2393 = vrcp.f32 %v1371_v43  ;;  %v2386_v50 = vpop.eup %2385 }
 0x2dd   : > { %2395 = vrcp.f32 %v1370_v18 }
 0x2df   : > { %v2388_v29 = vpop.eup %2387 }
 0x2e0   : > { %1568 = vperm.xlu1 %2251, %v2386_v50  }
 0x2e4   : > { %v2390_v53 = vpop.eup %2389  ;;  %1558 = vperm.xlu1 %2251, %v2388_v29  }
 0x2e5   : > { %1583 = vperm.xlu0 %2252, %v2390_v53   ;;  %v2392_v54 = vpop.eup %2391 }
 0x2e6   : > { %v2394_v55 = vpop.eup %2393 }
 0x2e7   : > { %v2396_v56 = vpop.eup %2395 }
 0x2e8   : > { %1578 = vperm.xlu1 %2251, %v2392_v54  }
 0x2e9   : > { %1593 = vperm.xlu0 %2252, %v2394_v55  }
 0x2ec   : > { %1588 = vperm.xlu1 %2251, %v2396_v56  }
 0x323   : > { %v1449_v57 = vpop.permute.xlu1 %1448 }
 0x324   : > { %v1598_v58 = vmul.f32 %v1449_v57, %v3344_v47  ;;  %v1439_v60 = vpop.permute.xlu0 %1438 }
 0x325   : > { %v1596_v61 = vmul.f32 %v1439_v60, %v3347_v19 }
 0x326   : > { %1630 = vst [vmem:[%s3540_s8 + $0x10] sm:$0xff] %v1598_v58 }
 0x327   : > { %1628 = vst [vmem:[%s3540_s8] sm:$0xff] %v1596_v61  ;;  %v1454_v44 = vpop.permute.xlu1 %1453 }
 0x328   : > { %v1599_v0 = vmul.f32 %v1454_v44, %v3350_v28 }
 0x32a   : > { %1631 = vst [vmem:[%s3540_s8 + $0x18] sm:$0xff] %v1599_v0 }
 0x32b   : > { %v1444_v47 = vpop.permute.xlu1 %1443 }
 0x32c   : > { %v1597_v6 = vmul.f32 %v1444_v47, %v3355_v49 }
 0x32e   : > { %1629 = vst [vmem:[%s3540_s8 + $0x8] sm:$0xff] %v1597_v6 }
 0x32f   : > { %v1469_v19 = vpop.permute.xlu1 %1468 }
 0x330   : > { %v1602_v10 = vmul.f32 %v1469_v19, %v3364_v62 }
 0x332   : > { %1634 = vst [vmem:[%s3540_s8 + $0x30] sm:$0xff] %v1602_v10 }
 0x333   : > { %v1459_v52 = vpop.permute.xlu1 %1458 }
 0x334   : > { %v1600_v12 = vmul.f32 %v1459_v52, %v3367_v1 }
 0x336   : > { %1632 = vst [vmem:[%s3540_s8 + $0x20] sm:$0xff] %v1600_v12  ;;  %v1494_v13 = vpop.permute.xlu0 %1493 }
 0x337   : > { %v1607_v28 = vmul.f32 %v1494_v13, %v3390_v26  ;;  %v1474_v14 = vpop.permute.xlu1 %1473 }
 0x338   : > { %v1603_v15 = vmul.f32 %v1474_v14, %v3370_v3 }
 0x339   : > { %1639 = vst [vmem:[%s3540_s8 + $0x58] sm:$0xff] %v1607_v28 }
 0x33a   : > { %1635 = vst [vmem:[%s3540_s8 + $0x38] sm:$0xff] %v1603_v15 }
 0x33b   : > { %v1484_v49 = vpop.permute.xlu0 %1483  ;;  %v1464_v16 = vpop.permute.xlu1 %1463 }
 0x33c   : > { %v1605_v62 = vmul.f32 %v1484_v49, %v3395_v24  ;;  %v1601_v17 = vmul.f32 %v1464_v16, %v3375_v5 }
 0x33e   : > { %1637 = vst [vmem:[%s3540_s8 + $0x48] sm:$0xff] %v1605_v62  ;;  %1633 = vst [vmem:[%s3540_s8 + $0x28] sm:$0xff] %v1601_v17 }
 0x33f   : > { %v1514_v1 = vpop.permute.xlu0 %1513  ;;  %v1489_v20 = vpop.permute.xlu1 %1488 }
 0x340   : > { %v1611_v26 = vmul.f32 %v1514_v1, %v3410_v48  ;;  %v1606_v3 = vmul.f32 %v1489_v20, %v3382_v23 }
 0x342   : > { %1643 = vst [vmem:[%s3540_s8 + $0x78] sm:$0xff] %v1611_v26  ;;  %1638 = vst [vmem:[%s3540_s8 + $0x50] sm:$0xff] %v1606_v3 }
 0x343   : > { %v1504_v21 = vpop.permute.xlu0 %1503  ;;  %v1479_v25 = vpop.permute.xlu1 %1478 }
 0x344   : > { %v1609_v24 = vmul.f32 %v1504_v21, %v3415_v51  ;;  %v1604_v5 = vmul.f32 %v1479_v25, %v3387_v22 }
 0x346   : > { %1641 = vst [vmem:[%s3540_s8 + $0x68] sm:$0xff] %v1609_v24  ;;  %1636 = vst [vmem:[%s3540_s8 + $0x40] sm:$0xff] %v1604_v5 }
 0x347   : > { %v1534_v27 = vpop.permute.xlu0 %1533  ;;  %v1509_v30 = vpop.permute.xlu1 %1508 }
 0x348   : > { %v1615_v48 = vmul.f32 %v1534_v27, %v3430_v9  ;;  %v1610_v23 = vmul.f32 %v1509_v30, %v3404_v42 }
 0x34a   : > { %1647 = vst [vmem:[%s3540_s8 + $0x98] sm:$0xff] %v1615_v48  ;;  %1642 = vst [vmem:[%s3540_s8 + $0x70] sm:$0xff] %v1610_v23 }
 0x34b   : > { %v1524_v31 = vpop.permute.xlu0 %1523  ;;  %v1499_v33 = vpop.permute.xlu1 %1498 }
 0x34c   : > { %v1613_v51 = vmul.f32 %v1524_v31, %v3435_v11  ;;  %v1608_v22 = vmul.f32 %v1499_v33, %v3407_v46 }
 0x34e   : > { %1645 = vst [vmem:[%s3540_s8 + $0x88] sm:$0xff] %v1613_v51  ;;  %1640 = vst [vmem:[%s3540_s8 + $0x60] sm:$0xff] %v1608_v22 }
 0x34f   : > { %v1554_v38 = vpop.permute.xlu0 %1553  ;;  %v1529_v43 = vpop.permute.xlu1 %1528 }
 0x350   : > { %v1619_v9 = vmul.f32 %v1554_v38, %v3450_v37  ;;  %v1614_v42 = vmul.f32 %v1529_v43, %v3424_v2 }
 0x352   : > { %1651 = vst [vmem:[%s3540_s8 + $0xb8] sm:$0xff] %v1619_v9  ;;  %1646 = vst [vmem:[%s3540_s8 + $0x90] sm:$0xff] %v1614_v42 }
 0x353   : > { %v1544_v45 = vpop.permute.xlu0 %1543  ;;  %v1519_v18 = vpop.permute.xlu1 %1518 }
 0x354   : > { %v1617_v11 = vmul.f32 %v1544_v45, %v3455_v39  ;;  %v1612_v46 = vmul.f32 %v1519_v18, %v3427_v7 }
 0x356   : > { %1649 = vst [vmem:[%s3540_s8 + $0xa8] sm:$0xff] %v1617_v11  ;;  %1644 = vst [vmem:[%s3540_s8 + $0x80] sm:$0xff] %v1612_v46 }
 0x357   : > { %v1574_v50 = vpop.permute.xlu0 %1573  ;;  %v1549_v29 = vpop.permute.xlu1 %1548 }
 0x358   : > { %v1623_v37 = vmul.f32 %v1574_v50, %v3470_v4  ;;  %v1618_v2 = vmul.f32 %v1549_v29, %v3444_v32 }
 0x35a   : > { %1655 = vst [vmem:[%s3540_s8 + $0xd8] sm:$0xff] %v1623_v37  ;;  %1650 = vst [vmem:[%s3540_s8 + $0xb0] sm:$0xff] %v1618_v2 }
 0x35b   : > { %v1564_v53 = vpop.permute.xlu0 %1563  ;;  %v1539_v54 = vpop.permute.xlu1 %1538 }
 0x35c   : > { %v1621_v39 = vmul.f32 %v1564_v53, %v3475_v8  ;;  %v1616_v7 = vmul.f32 %v1539_v54, %v3447_v35 }
 0x35e   : > { %1653 = vst [vmem:[%s3540_s8 + $0xc8] sm:$0xff] %v1621_v39  ;;  %1648 = vst [vmem:[%s3540_s8 + $0xa0] sm:$0xff] %v1616_v7 }
 0x35f   : > { %v1569_v55 = vpop.permute.xlu1 %1568 }
 0x360   : > { %v1622_v56 = vmul.f32 %v1569_v55, %v3464_v59 }
 0x362   : > { %1654 = vst [vmem:[%s3540_s8 + $0xd0] sm:$0xff] %v1622_v56 }
 0x363   : > { %v1559_v4 = vpop.permute.xlu1 %1558 }
 0x364   : > { %v1584_v32 = vpop.permute.xlu0 %1583  ;;  %v1620_v57 = vmul.f32 %v1559_v4, %v3467_v63 }
 0x365   : > { %v1625_v58 = vmul.f32 %v1584_v32, %v3493_v41 }
 0x366   : > { %1652 = vst [vmem:[%s3540_s8 + $0xc0] sm:$0xff] %v1620_v57 }
 0x367   : > { %1657 = vst [vmem:[%s3540_s8 + $0xe8] sm:$0xff] %v1625_v58  ;;  %v1579_v35 = vpop.permute.xlu1 %1578 }
 0x368   : > { %v1594_v8 = vpop.permute.xlu0 %1593  ;;  %v1624_v59 = vmul.f32 %v1579_v35, %v3487_v36 }
 0x369   : > { %v1627_v60 = vmul.f32 %v1594_v8, %v3490_v40 }
 0x36a   : > { %1656 = vst [vmem:[%s3540_s8 + $0xe0] sm:$0xff] %v1624_v59 }
 0x36b   : > { %1659 = vst [vmem:[%s3540_s8 + $0xf8] sm:$0xff] %v1627_v60  ;;  %v1589_v61 = vpop.permute.xlu1 %1588 }
 0x36c   : > { %v1626_v63 = vmul.f32 %v1589_v61, %v3484_v34 }
 0x36e   : > { %1658 = vst [vmem:[%s3540_s8 + $0xf0] sm:$0xff] %v1626_v63 }
 0x36f   : > { %2584 = shalt.err (!%p2581_p8)
}
 0x370   : > { %s2585_s16 = scalar_lea.hbm %s3611_s9, 4096  ;;  %s2589_s12 = scalar_lea.hbm %s3745_s20, 32768 }
 0x371   : > { %p2586_p3 = scmp.ne.s32.totalorder %s3611_s9, %s2585_s16  ;;  %p2590_p5 = scmp.lt.u32.totalorder %s3611_s9, %s3745_s20 }
 0x372   : > { %p2591_p0 = scmp.lt.u32.totalorder %s2589_s12, %s2585_s16  ;;  %p2593_p12 = scmp.lt.u32.totalorder %s2585_s16, %s3611_s9 }
 0x373   : > { %p2587_p7 = pnand %p2586_p3, %p3746_p10 }
 0x374   : > { %p2592_p9 = por %p2591_p0, %p2590_p5 }
 0x375   : > { %p2588_p13 = pneg %p2587_p7 }
 0x376   : > { %p2594_p2 = por %p2593_p12, %p2592_p9 }
 0x378   : > { %p2595_p4 = pnand %p2594_p2, %p2588_p13 }
 0x37a   : > { %2598 = shalt.err (!%p2595_p4)
}
 0x37b   : > { %s2727_s19 = smov 128   ;;  %s2728_s21 = smov 8  }
 0x37c   : > { %2119 = dma.vmem_to_hbm [thread:$0]  (%p3746_p10), %s3605_s29, 4096, %s3611_s9, %s1661_s13, %s2727_s19, %s2727_s19, %s2728_s21  }
 0x37d PF: > { %s3747_s10 = sld [smem:[#allocation21_spill]]  ;;  %s3748_s5 = sld [smem:[#allocation26_spill]] }
 0x37e   : > { %p2152_p6 = scmp.ge.s32.totalorder %s2713_s7, 2 }
 0x383   : > { %s1691_s14 = sand.u32 1, %s3747_s10   ;;  %p3749_p11 = scmp.ne.s32.totalorder %s3748_s5, 0 }
 0x384   : > { %s1692_s28 = scalar_lea.sflag [#allocation4], %s1691_s14 }
 0x385   : > { %p2142_p1 = pnand %p2152_p6, %p3749_p11 }
 0x387   : > { %2668 = dma.done.wait (!%p2142_p1), %s1692_s28, 4096  }
 0x388   : > { %2670 = vsyncadd (!%p2142_p1), %s1692_s28, 4294963200  ;;  %s29_s7 = sadd.s32 1, %s2713_s7   ;;  %s3750_s27 = smov %s2963_s24 }
 0x389   : > { %p26_p8 = scmp.ge.s32.totalorder %s29_s7, 10   ;;  %s3751_s2 = sld [smem:[#allocation24_spill]] }
 0x38a   : > { %s3752_s29 = sld [smem:[#allocation28_spill]]  ;;  %s3753_s9 = sld [smem:[#allocation29_spill]] }
 0x38b   : > { %s3754_s21 = smov %s2677_s22  ;;  %s3755_s22 = smov %s2681_s23 }
 0x38c   : > { %s3756_s23 = smov %s3028_s15  ;;  %s3757_s24 = smov %s2689_s25 }
 0x38d   : > { %s3758_s25 = smov %s2693_s26  ;;  %s3759_s26 = smov %s3750_s27 }
 0x38e   : > { %s3761_s28 = smov %s2709_s30  ;;  %28 = sbr.rel (!%p26_p8) target bundleno = 20 (0x14), region = 127 }
 0x38f   : > { %s3760_s27 = smov %s3751_s2 }
 0x390   : > { %s3762_s30 = smov %s3753_s9 }
 0x395   :  { %1697 = vsyncpa [#allocation3], 1 }
 0x396   :  { %1699 = vsyncpa [#allocation3 + $0x1], 1 }
 0x397   :  { %1700 = vsyncpa [#allocation6], 1 }
 0x398   :  { %1702 = vsyncpa [#allocation6 + $0x1], 1 }
 0x399   :  { %1703 = vsyncpa [#allocation9], 1 }
 0x39a   :  { %1705 = vsyncpa [#allocation9 + $0x1], 1 }
 0x39b   :  { %1706 = vsyncpa [#allocation12], 1 }
 0x39c   :  { %1707 = vsyncpa [#allocation4], 1 }
 0x39d   :  { %1709 = vsyncpa [#allocation4 + $0x1], 1 }

</bundles_post_ra>
